<compile_context>
chip_gen: v6e
topology: v6e:2x2x1
jax: 0.10.0
libtpu: 0.0.40
codegen_flags: <defaults>
</compile_context>

<pallas_src>
import functools

import jax
import jax.numpy as jnp
from jax import lax
from jax.experimental import pallas as pl
from jax.experimental.pallas import tpu as pltpu


_LANE = 128      # TPU lane width (last-dim tiling)
_SUBLANE = 8     # fp32 sublane width (second-to-last-dim tiling)


def _round_up(x, m):
    return ((x + m - 1) // m) * m


# ----------------------------------------------------------------------------
# Host-side hardware queries (trace-time; safe fallbacks)
# ----------------------------------------------------------------------------
def _device_kind():
    try:
        return jax.devices()[0].device_kind.lower()
    except Exception:
        return ""


def _vmem_capacity_bytes():
    try:
        return int(pltpu.get_tpu_info().vmem_capacity_bytes)
    except Exception:
        kind = _device_kind()
        if "v5" in kind or "v6" in kind:
            return 128 * 2**20
        return 64 * 2**20            # conservative (v7x / unknown)


def _is_multi_tensorcore():
    kind = _device_kind()
    if not kind:
        return False
    # v5e / v6e (and earlier) expose a single TensorCore per Pallas device.
    return not any(t in kind for t in ("v2", "v3", "v4", "v5", "v6"))


def _has_bf16_eup():
    kind = _device_kind()
    if not kind:
        return True
    # v5e and earlier have no bf16 EUP.
    return not any(t in kind for t in ("v2", "v3", "v4", "v5"))


def _choose_time_block(S, Bb, INp, Hp, Op, stream_isz, weight_bytes, budget):
    # Weights are (conservatively) double-buffered by the pipeliner; add the
    # persistent h/c scratch and ~4 MiB slack for compiler internals.
    fixed = 2 * weight_bytes + 2 * Bb * Hp * 4 + (4 << 20)
    per_ts = Bb * (
        2 * stream_isz * (INp + 2 * Hp)    # x / prev / out_h chunk, double-buffered
        + 2 * 4 * 2 * Op                   # f32 skip in + out, double-buffered
        + 4 * (5 * Hp))                    # gx_scr + hseq_scr (f32, single copy)
    ts = int(max(1, (budget - fixed) // max(per_ts, 1)))
    ts = min(ts, 128, S)
    if ts >= 8:
        ts -= ts % 8
    return max(1, ts)


# ----------------------------------------------------------------------------
# Pallas kernel: one SkipLSTM layer, one (batch-block, time-chunk) grid cell
# ----------------------------------------------------------------------------
def _skip_lstm_layer_kernel(*refs, s_real, time_block, first, last,
                            needs_time_mask, mm_dtype, act_dtype, unroll):
    """Fused input-proj + LSTM recurrence + final-proj for one time chunk.

    Grid = (batch_blocks, time_chunks).  The time axis is 'arbitrary' (the
    recurrent state is carried across chunks in persistent VMEM scratch); the
    batch axis is 'parallel'.

    Gate columns of wih/whh/bg were reordered host-side to [i, f, o, g] and
    each gate block padded to a 128-lane multiple, so one contiguous sigmoid
    covers the first 3*Hp lanes and all slices are lane-aligned.
    """
    idx = 0
    x_ref = refs[idx]; idx += 1
    prev_ref = None
    skip_in_ref = None
    if not first:
        prev_ref = refs[idx]; idx += 1
        skip_in_ref = refs[idx]; idx += 1
    wip_ref, wih_ref, bg_ref, whh_ref, wfp_ref, bfp_ref = refs[idx:idx + 6]
    idx += 6
    out_h_ref = None
    if not last:
        out_h_ref = refs[idx]; idx += 1
    skip_ref = refs[idx]; idx += 1
    hn_ref = refs[idx]; idx += 1
    cn_ref = refs[idx]; idx += 1
    gx_scr, hseq_scr, h_scr, c_scr = refs[idx:idx + 4]

    t_blk = pl.program_id(1)                 # time-chunk index (grid axis 1)
    n_tblk = pl.num_programs(1)
    TS, Bb, INp = x_ref.shape
    Hp = whh_ref.shape[0]
    Op = wfp_ref.shape[1]

    # New batch block -> reset the recurrent state.
    @pl.when(t_blk == 0)
    def _():
        h_scr[...] = jnp.zeros_like(h_scr)
        c_scr[...] = jnp.zeros_like(c_scr)

    # ---- input projection for the whole chunk (MXU) -------------------------
    # Bb is a multiple of the sublane pack and INp/Hp multiples of 128, so
    # these reshapes are layout no-ops (no VMEM copies).
    x2d = x_ref[...].reshape(TS * Bb, INp)
    inp = jnp.dot(x2d.astype(mm_dtype), wip_ref[...],
                  preferred_element_type=jnp.float32)
    if prev_ref is not None:
        inp = inp + prev_ref[...].astype(jnp.float32).reshape(TS * Bb, Hp)

    # ---- input contribution to the gates, all chunk timesteps at once -------
    # bip was folded into bg host-side, so no extra broadcast add here.
    gx = jnp.dot(inp.astype(mm_dtype), wih_ref[...],
                 preferred_element_type=jnp.float32) + bg_ref[...]
    gx_scr[...] = gx.reshape(TS, Bb, 4 * Hp)

    # ---- sequential recurrence; h/c carried in vregs across the chunk -------
    def make_step(masked):
        def step(t, carry):
            h, c = carry
            gates = gx_scr[t] + jnp.dot(h.astype(mm_dtype), whh_ref[...],
                                        preferred_element_type=jnp.float32)
            # bf16 nonlinearities on v6e/v7x (2x EUP rate); state stays f32.
            gact = gates.astype(act_dtype)
            sig = jax.nn.sigmoid(gact[:, :3 * Hp]).astype(jnp.float32)
            i_g = sig[:, :Hp]
            f_g = sig[:, Hp:2 * Hp]
            o_g = sig[:, 2 * Hp:3 * Hp]
            g_g = jnp.tanh(gact[:, 3 * Hp:]).astype(jnp.float32)
            c_new = f_g * c + i_g * g_g
            h_new = o_g * jnp.tanh(c_new.astype(act_dtype)).astype(jnp.float32)
            # NOTE: padded timesteps store the un-frozen h_new here; they are
            # sliced away by the wrapper and downstream layers re-freeze state.
            hseq_scr[t] = h_new
            if masked:
                # Freeze the state on padded timesteps so h_n / c_n stay exact.
                keep = ((t_blk * time_block + t) < s_real).astype(jnp.float32)
                h_new = keep * h_new + (1.0 - keep) * h
                c_new = keep * c_new + (1.0 - keep) * c
            return h_new, c_new
        return step

    def run_chunk(masked):
        h_fin, c_fin = lax.fori_loop(0, TS, make_step(masked),
                                     (h_scr[...], c_scr[...]), unroll=unroll)
        h_scr[...] = h_fin
        c_scr[...] = c_fin

    if needs_time_mask:
        # Only the FINAL chunk contains padded timesteps; keep the mask work
        # off the serial critical path of every other chunk.
        @pl.when(t_blk == n_tblk - 1)
        def _():
            run_chunk(True)

        @pl.when(t_blk < n_tblk - 1)
        def _():
            run_chunk(False)
    else:
        run_chunk(False)

    hn_ref[...] = h_scr[...]
    cn_ref[...] = c_scr[...]

    # LSTM outputs for the next layer (skipped entirely for the last layer —
    # nothing consumes them, so no HBM write).
    if out_h_ref is not None:
        out_h_ref[...] = hseq_scr[...].astype(out_h_ref.dtype)

    # ---- final projection of this chunk's LSTM outputs (MXU) ----------------
    h_seq = hseq_scr[...].reshape(TS * Bb, Hp)
    skip = jnp.dot(h_seq.astype(mm_dtype), wfp_ref[...],
                   preferred_element_type=jnp.float32) + bfp_ref[...]
    if skip_in_ref is not None:               # in-place running-skip accumulate
        skip = skip + skip_in_ref[...].reshape(TS * Bb, Op)
    skip_ref[...] = skip.reshape(TS, Bb, Op)


# ----------------------------------------------------------------------------
# pallas_call wrapper for one layer
# ----------------------------------------------------------------------------
def _run_layer(x_tm, prev_tm, skip_acc, p, *, s_real, time_block, batch_block,
               mm_dtype, act_dtype, first, last, vmem_limit):
    S_pad, B_pad, INp = x_tm.shape
    Hp = p["whh"].shape[0]
    Op = p["wfp"].shape[1]
    TS = time_block
    Bb = batch_block
    NT = S_pad // TS
    NB = B_pad // Bb
    needs_time_mask = (s_real % TS) != 0
    stream_dtype = x_tm.dtype

    # Deeper unroll: the recurrence is latency-bound, give the scheduler room.
    if TS <= 16:
        unroll = True
    elif TS % 8 == 0:
        unroll = 8
    elif TS % 4 == 0:
        unroll = 4
    else:
        unroll = 2

    kernel = functools.partial(
        _skip_lstm_layer_kernel,
        s_real=s_real, time_block=TS, first=first, last=last,
        needs_time_mask=needs_time_mask, mm_dtype=mm_dtype,
        act_dtype=act_dtype, unroll=unroll)

    def chunk_spec(feat):
        return pl.BlockSpec((TS, Bb, feat), lambda b, t: (t, b, 0))

    def weight_spec(arr):
        return pl.BlockSpec(arr.shape, lambda b, t: (0, 0))   # resident

    weights = (p["wip"], p["wih"], p["bg"], p["whh"], p["wfp"], p["bfp"])
    w_specs = [weight_spec(w) for w in weights]

    if first:
        inputs = (x_tm,) + weights
        in_specs = [chunk_spec(INp)] + w_specs
        io_alias = {}
    else:
        inputs = (x_tm, prev_tm, skip_acc) + weights
        in_specs = [chunk_spec(INp), chunk_spec(Hp), chunk_spec(Op)] + w_specs
        io_alias = {2: (0 if last else 1)}     # running skip updated in place

    out_shape = []
    out_specs = []
    if not last:
        out_shape.append(jax.ShapeDtypeStruct((S_pad, B_pad, Hp), stream_dtype))
        out_specs.append(chunk_spec(Hp))
    out_shape += [
        jax.ShapeDtypeStruct((S_pad, B_pad, Op), jnp.float32),   # running skip
        jax.ShapeDtypeStruct((B_pad, Hp), jnp.float32),          # h_n
        jax.ShapeDtypeStruct((B_pad, Hp), jnp.float32),          # c_n
    ]
    out_specs += [
        chunk_spec(Op),
        pl.BlockSpec((Bb, Hp), lambda b, t: (b, 0)),
        pl.BlockSpec((Bb, Hp), lambda b, t: (b, 0)),
    ]

    scratch = [
        pltpu.VMEM((TS, Bb, 4 * Hp), jnp.float32),   # gate pre-activations
        pltpu.VMEM((TS, Bb, Hp), jnp.float32),       # chunk h sequence (f32)
        pltpu.VMEM((Bb, Hp), jnp.float32),           # carried h
        pltpu.VMEM((Bb, Hp), jnp.float32),           # carried c
    ]

    # Advisory cost hint for XLA's scheduler.
    flops = 2 * S_pad * B_pad * (INp * Hp + 8 * Hp * Hp + Hp * Op)
    transcendentals = 5 * S_pad * B_pad * Hp
    weight_bytes = sum(int(w.size) * w.dtype.itemsize for w in weights)
    sd = jnp.dtype(stream_dtype).itemsize
    stream_bytes = S_pad * B_pad * (
        INp * sd
        + (0 if first else Hp * sd)          # prev read
        + (0 if last else Hp * sd)           # out_h write
        + (4 * Op if first else 8 * Op))     # skip write (+read)
    stream_bytes += 2 * 4 * B_pad * Hp       # h_n, c_n
    cost = pl.CostEstimate(flops=int(flops),
                           transcendentals=int(transcendentals),
                           bytes_accessed=int(stream_bytes + weight_bytes))

    grid_spec = pltpu.PrefetchScalarGridSpec(
        num_scalar_prefetch=0,
        grid=(NB, NT),
        in_specs=in_specs,
        out_specs=tuple(out_specs),
        scratch_shapes=scratch,
    )

    return pl.pallas_call(
        kernel,
        grid_spec=grid_spec,
        out_shape=tuple(out_shape),
        input_output_aliases=io_alias,
        compiler_params=pltpu.CompilerParams(
            dimension_semantics=("parallel", "arbitrary"),
            vmem_limit_bytes=int(vmem_limit)),
        cost_estimate=cost,
    )(*inputs)


# ----------------------------------------------------------------------------
# Host-side parameter preparation: pad to lane/sublane-friendly shapes,
# reorder LSTM gates [i, f, g, o] -> [i, f, o, g], fold bih+bhh (+bip@wih)
# into one gate bias.
# ----------------------------------------------------------------------------
def _prep_gates(w, H, Hp):
    gi, gf, gg, go = jnp.split(w, 4, axis=-1)        # torch order [i, f, g, o]
    pad = [(0, 0)] * (w.ndim - 1) + [(0, Hp - H)]
    return jnp.concatenate([jnp.pad(g, pad) for g in (gi, gf, go, gg)],
                           axis=-1)


def _prepare_layer_params(raw, Hp, INp, Op, mm_dtype):
    IN, H = raw["wip"].shape
    O = raw["wfp"].shape[1]
    wip = jnp.pad(raw["wip"], ((0, INp - IN), (0, Hp - H)))
    wih = jnp.pad(_prep_gates(raw["wih"], H, Hp), ((0, Hp - H), (0, 0)))
    whh = jnp.pad(_prep_gates(raw["whh"], H, Hp), ((0, Hp - H), (0, 0)))
    # Fold the input-projection bias into the gate bias (exact up to fp
    # reassociation): gates = (x@wip + prev)@wih + (bip@wih + bih + bhh).
    bip = jnp.pad(raw["bip"].reshape(1, H), ((0, 0), (0, Hp - H)))
    bg = (_prep_gates((raw["bih"] + raw["bhh"]).reshape(1, 4 * H), H, Hp)
          + bip @ wih)
    wfp = jnp.pad(raw["wfp"], ((0, Hp - H), (0, Op - O)))
    bfp = jnp.pad(raw["bfp"].reshape(1, O), ((0, 0), (0, Op - O)))
    return dict(
        wip=wip.astype(mm_dtype), wih=wih.astype(mm_dtype),
        whh=whh.astype(mm_dtype), wfp=wfp.astype(mm_dtype),
        bg=bg.astype(jnp.float32), bfp=bfp.astype(jnp.float32),
    )


# ----------------------------------------------------------------------------
# Full SkipLSTM forward (with_texts=False, hs=None)
# ----------------------------------------------------------------------------
def _skip_lstm_forward(x, layer_params, bias, *, time_block=None,
                       mm_dtype="bfloat16"):
    mmdt = jnp.dtype(mm_dtype)
    use_bf16 = (mmdt == jnp.bfloat16)
    # NOTE: bf16 recurrence feeds (h -> whh) compound rounding error over very
    # long sequences; pass mm_dtype="float32" for an exact (slower) path.
    stream_dtype = jnp.bfloat16 if use_bf16 else jnp.float32
    act_dtype = jnp.bfloat16 if (use_bf16 and _has_bf16_eup()) else jnp.float32

    B, S, IN = x.shape
    H = layer_params[0]["whh"].shape[0]
    O = layer_params[0]["wfp"].shape[1]

    INp = _round_up(IN, _LANE)
    Hp = _round_up(H, _LANE)
    Op = _round_up(O, _LANE)

    # Batch padding / blocking: keep the whole batch as one block (splitting
    # on single-TensorCore chips just halves the MXU M-dim and doubles the
    # serial recurrence).  Only split for the megacore when each half still
    # has >= 128 rows.
    sub = 16 if use_bf16 else _SUBLANE       # bf16 blocks need (16,128) tiles
    if B >= 256 and _is_multi_tensorcore():
        B_pad = _round_up(B, 2 * sub)
        batch_block = B_pad // 2
    else:
        B_pad = _round_up(B, sub)
        batch_block = B_pad

    # Generation-aware VMEM budget (v5e/v6e: 128 MiB physical, v7x: 64 MiB).
    budget = max(32 * 2**20, int(0.72 * _vmem_capacity_bytes()))

    mm_isz = mmdt.itemsize
    weight_bytes = mm_isz * (INp * Hp + 8 * Hp * Hp + Hp * Op) + 4 * (4 * Hp + Op)
    if time_block is None:
        TS = _choose_time_block(S, batch_block, INp, Hp, Op,
                                jnp.dtype(stream_dtype).itemsize,
                                weight_bytes, budget)
    else:
        TS = max(1, min(int(time_block), S))
    S_pad = _round_up(S, TS)

    x_tm = jnp.transpose(x, (1, 0, 2)).astype(stream_dtype)      # time-major
    x_tm = jnp.pad(x_tm, ((0, S_pad - S), (0, B_pad - B), (0, INp - IN)))

    prev = None
    skip_acc = None
    h_stack, c_stack = [], []
    n_layers = len(layer_params)
    for li, raw in enumerate(layer_params):
        p = _prepare_layer_params(raw, Hp, INp, Op, mmdt)
        last = (li == n_layers - 1)
        outs = _run_layer(
            x_tm, prev, skip_acc, p,
            s_real=S, time_block=TS, batch_block=batch_block,
            mm_dtype=mmdt, act_dtype=act_dtype,
            first=(li == 0), last=last, vmem_limit=budget)
        if last:
            skip_acc, hn, cn = outs
            prev = None
        else:
            prev, skip_acc, hn, cn = outs
        h_stack.append(hn[:B, :H][None])     # (1, B, H), torch h_n layout
        c_stack.append(cn[:B, :H][None])

    out = skip_acc[:S, :B, :O] + bias        # scalar learned bias
    out = jnp.transpose(out, (1, 0, 2))      # back to (B, S, output_size)
    return out, (h_stack, c_stack)


skip_lstm_forward = jax.jit(_skip_lstm_forward,
                            static_argnames=("time_block", "mm_dtype"))


# ----------------------------------------------------------------------------
# Deterministic parameter init (module's init_parameters: xavier for >=2-D,
# zeros for 1-D; bias_scale lets the test exercise nonzero-bias paths).
# ----------------------------------------------------------------------------
def _xavier(key, shape):
    fan_in, fan_out = shape
    bound = (6.0 / (fan_in + fan_out)) ** 0.5
    return jax.random.uniform(key, shape, jnp.float32, -bound, bound)


def make_params(key, input_size, hidden_size, output_size, num_layers,
                bias_scale=0.0):
    layers = []
    for _ in range(num_layers):
        key, k1, k2, k3, k4, k5, k6, k7, k8 = jax.random.split(key, 9)

        def b(k, n):
            return bias_scale * jax.random.normal(k, (1, n), jnp.float32)

        layers.append(dict(
            wip=_xavier(k1, (input_size, hidden_size)),
            bip=b(k5, hidden_size),
            wih=_xavier(k2, (hidden_size, 4 * hidden_size)),
            bih=b(k6, 4 * hidden_size),
            whh=_xavier(k3, (hidden_size, 4 * hidden_size)),
            bhh=b(k7, 4 * hidden_size),
            wfp=_xavier(k4, (hidden_size, output_size)),
            bfp=b(k8, output_size),
        ))
    bias = jnp.zeros((1,), jnp.float32)      # param.dim()==1 -> constant_(0.0)
    return layers, bias


# ----------------------------------------------------------------------------
# Pure-JAX reference (correctness check only)
# ----------------------------------------------------------------------------
def ref_forward(x, layer_params, bias):
    B, S, _ = x.shape
    last = None
    running = 0.0
    h_list, c_list = [], []
    for p in layer_params:
        H = p["whh"].shape[0]
        inp = x @ p["wip"] + p["bip"]
        if last is not None:
            inp = inp + last

        def step(carry, xt):
            h, c = carry
            gates = xt @ p["wih"] + p["bih"] + h @ p["whh"] + p["bhh"]
            i_g, f_g, g_g, o_g = jnp.split(gates, 4, axis=-1)
            c = jax.nn.sigmoid(f_g) * c + jax.nn.sigmoid(i_g) * jnp.tanh(g_g)
            h = jax.nn.sigmoid(o_g) * jnp.tanh(c)
            return (h, c), h

        h0 = jnp.zeros((B, H), jnp.float32)
        c0 = jnp.zeros((B, H), jnp.float32)
        (hn, cn), hs = lax.scan(step, (h0, c0), jnp.transpose(inp, (1, 0, 2)))
        out_h = jnp.transpose(hs, (1, 0, 2))
        last = out_h
        running = running + out_h @ p["wfp"] + p["bfp"]
        h_list.append(hn)
        c_list.append(cn)
    return running + bias, h_list, c_list


if __name__ == "__main__":
    input_size, hidden_size, output_size, num_layers = 16, 32, 16, 2

    key = jax.random.PRNGKey(0)
    key, pk = jax.random.split(key)
    layer_params, bias = make_params(pk, input_size, hidden_size,
                                     output_size, num_layers, bias_scale=0.05)
    bias = bias + 0.37            # exercise the learned scalar bias add

    # --- main config: B=2, S=8, 4-step time chunks (2-deep time grid) --------
    B, S = 2, 8
    key, xk = jax.random.split(key)
    x = jax.random.normal(xk, (B, S, input_size), jnp.float32)

    ref, ref_h, ref_c = ref_forward(x, layer_params, bias)

    # Exact f32 path (opt-in) for tight correctness check.
    out, (h_stack, c_stack) = skip_lstm_forward(x, layer_params, bias,
                                                time_block=4,
                                                mm_dtype="float32")
    out = jax.block_until_ready(out)
    assert out.shape == (B, S, output_size)
    assert len(h_stack) == num_layers and len(c_stack) == num_layers
    assert jnp.allclose(out, ref, atol=1e-4, rtol=1e-4), "out mismatch (f32)"
    for i in range(num_layers):
        assert jnp.allclose(h_stack[i][0], ref_h[i], atol=1e-4, rtol=1e-4)
        assert jnp.allclose(c_stack[i][0], ref_c[i], atol=1e-4, rtol=1e-4)

    # --- odd shapes: exercises batch/sequence padding + last-chunk freeze ----
    B2, S2 = 3, 9
    key, xk2 = jax.random.split(key)
    x2 = jax.random.normal(xk2, (B2, S2, input_size), jnp.float32)
    out2, (h2, c2) = skip_lstm_forward(x2, layer_params, bias, time_block=4,
                                       mm_dtype="float32")
    out2 = jax.block_until_ready(out2)
    ref2, ref2_h, ref2_c = ref_forward(x2, layer_params, bias)
    assert jnp.allclose(out2, ref2, atol=1e-4, rtol=1e-4), "out mismatch (pad)"
    for i in range(num_layers):
        assert jnp.allclose(h2[i][0], ref2_h[i], atol=1e-4, rtol=1e-4)
        assert jnp.allclose(c2[i][0], ref2_c[i], atol=1e-4, rtol=1e-4)

    # --- default (bf16 MXU feeds + bf16 activation streams) ------------------
    out_bf, (hbf, cbf) = skip_lstm_forward(x, layer_params, bias, time_block=4)
    out_bf = jax.block_until_ready(out_bf)
    assert jnp.all(jnp.isfinite(out_bf))
    assert jnp.allclose(out_bf, ref, atol=2e-1, rtol=2e-1), "bf16 far off"
    for i in range(num_layers):
        assert jnp.allclose(hbf[i][0], ref_h[i], atol=2e-1, rtol=2e-1)

    # --- default path with auto time-chunk sizing + odd shapes ---------------
    out_auto, _ = skip_lstm_forward(x2, layer_params, bias)
    out_auto = jax.block_until_ready(out_auto)
    assert jnp.all(jnp.isfinite(out_auto))
    assert jnp.allclose(out_auto, ref2, atol=2e-1, rtol=2e-1), "auto-TS far off"

    print("KERNEL_OK")
</pallas_src>

<mosaic_0001>
module attributes {stable_mosaic.version = 11 : i64} {
  func.func @_skip_lstm_layer_kernel(%arg0: i32, %arg1: i32, %arg2: memref<4x8x128xf32, #tpu.memory_space<vmem>>, %arg3: memref<128x128xf32, #tpu.memory_space<vmem>>, %arg4: memref<128x512xf32, #tpu.memory_space<vmem>>, %arg5: memref<1x512xf32, #tpu.memory_space<vmem>>, %arg6: memref<128x512xf32, #tpu.memory_space<vmem>>, %arg7: memref<128x128xf32, #tpu.memory_space<vmem>>, %arg8: memref<1x128xf32, #tpu.memory_space<vmem>>, %arg9: memref<4x8x128xf32, #tpu.memory_space<vmem>>, %arg10: memref<4x8x128xf32, #tpu.memory_space<vmem>>, %arg11: memref<8x128xf32, #tpu.memory_space<vmem>>, %arg12: memref<8x128xf32, #tpu.memory_space<vmem>>, %arg13: memref<4x8x512xf32, #tpu.memory_space<vmem>>, %arg14: memref<4x8x128xf32, #tpu.memory_space<vmem>>, %arg15: memref<8x128xf32, #tpu.memory_space<vmem>>, %arg16: memref<8x128xf32, #tpu.memory_space<vmem>>) attributes {dimension_semantics = [#tpu.dimension_semantics<parallel>, #tpu.dimension_semantics<arbitrary>], iteration_bounds = array<i64: 1, 2>, scalar_prefetch = 0 : i64, scratch_operands = 4 : i64, tpu.core_type = #tpu.core_type<tc>, window_params = [{transform_indices = @transform_0, window_bounds = array<i64: 4, 8, 128>}, {pipeline_mode = #tpu.pipeline_mode<synchronous>, transform_indices = @transform_1, window_bounds = array<i64: 128, 128>}, {pipeline_mode = #tpu.pipeline_mode<synchronous>, transform_indices = @transform_2, window_bounds = array<i64: 128, 512>}, {pipeline_mode = #tpu.pipeline_mode<synchronous>, transform_indices = @transform_3, window_bounds = array<i64: 1, 512>}, {pipeline_mode = #tpu.pipeline_mode<synchronous>, transform_indices = @transform_4, window_bounds = array<i64: 128, 512>}, {pipeline_mode = #tpu.pipeline_mode<synchronous>, transform_indices = @transform_5, window_bounds = array<i64: 128, 128>}, {pipeline_mode = #tpu.pipeline_mode<synchronous>, transform_indices = @transform_6, window_bounds = array<i64: 1, 128>}, {transform_indices = @transform_7, window_bounds = array<i64: 4, 8, 128>}, {transform_indices = @transform_8, window_bounds = array<i64: 4, 8, 128>}, {transform_indices = @transform_9, window_bounds = array<i64: 8, 128>}, {transform_indices = @transform_10, window_bounds = array<i64: 8, 128>}]} {
    %c0_i32 = arith.constant 0 : i32
    %0 = arith.cmpi eq, %arg1, %c0_i32 : i32
    %1 = arith.extui %0 : i1 to i32
    %c0_i32_0 = arith.constant 0 : i32
    %2 = arith.cmpi ne, %1, %c0_i32_0 : i32
    scf.if %2 {
      %cst_79 = arith.constant 0.000000e+00 : f32
      %137 = vector.broadcast %cst_79 : f32 to vector<8x128xf32>
      %c0_80 = arith.constant 0 : index
      %c0_81 = arith.constant 0 : index
      %138 = vector.load %arg15[%c0_80, %c0_81] : memref<8x128xf32, #tpu.memory_space<vmem>>, vector<8x128xf32>
      tpu.vector_store %arg15[%c0_80, %c0_81], %137 {strides = array<i32>} : memref<8x128xf32, #tpu.memory_space<vmem>>, vector<8x128xf32>,
      %cst_82 = arith.constant 0.000000e+00 : f32
      %139 = vector.broadcast %cst_82 : f32 to vector<8x128xf32>
      %c0_83 = arith.constant 0 : index
      %c0_84 = arith.constant 0 : index
      %140 = vector.load %arg16[%c0_83, %c0_84] : memref<8x128xf32, #tpu.memory_space<vmem>>, vector<8x128xf32>
      tpu.vector_store %arg16[%c0_83, %c0_84], %139 {strides = array<i32>} : memref<8x128xf32, #tpu.memory_space<vmem>>, vector<8x128xf32>,
    } else {
    }
    %c0 = arith.constant 0 : index
    %c0_1 = arith.constant 0 : index
    %c0_2 = arith.constant 0 : index
    %3 = vector.load %arg2[%c0, %c0_1, %c0_2] : memref<4x8x128xf32, #tpu.memory_space<vmem>>, vector<4x8x128xf32>
    %4 = vector.shape_cast %3 : vector<4x8x128xf32> to vector<32x128xf32>
    %c0_3 = arith.constant 0 : index
    %c0_4 = arith.constant 0 : index
    %5 = vector.load %arg3[%c0_3, %c0_4] : memref<128x128xf32, #tpu.memory_space<vmem>>, vector<128x128xf32>
    %cst = arith.constant dense<0.000000e+00> : vector<32x128xf32>
    %6 = tpu.matmul %4, %5, %cst {dimension_numbers = #tpu.dot_dimension_numbers<[1], [0], [0], [1], [0, 0, 1, 1], [], []>} : vector<32x128xf32>, vector<128x128xf32>, vector<32x128xf32> -> vector<32x128xf32>
    %c0_5 = arith.constant 0 : index
    %c0_6 = arith.constant 0 : index
    %7 = vector.load %arg4[%c0_5, %c0_6] : memref<128x512xf32, #tpu.memory_space<vmem>>, vector<128x512xf32>
    %cst_7 = arith.constant dense<0.000000e+00> : vector<32x512xf32>
    %8 = tpu.matmul %6, %7, %cst_7 {dimension_numbers = #tpu.dot_dimension_numbers<[1], [0], [0], [1], [0, 0, 1, 1], [], []>} : vector<32x128xf32>, vector<128x512xf32>, vector<32x512xf32> -> vector<32x512xf32>
    %c0_8 = arith.constant 0 : index
    %c0_9 = arith.constant 0 : index
    %9 = vector.load %arg5[%c0_8, %c0_9] : memref<1x512xf32, #tpu.memory_space<vmem>>, vector<1x512xf32>
    %10 = vector.broadcast %9 : vector<1x512xf32> to vector<32x512xf32>
    %11 = arith.addf %8, %10 : vector<32x512xf32>
    %12 = vector.shape_cast %11 : vector<32x512xf32> to vector<4x8x512xf32>
    %c0_10 = arith.constant 0 : index
    %c0_11 = arith.constant 0 : index
    %c0_12 = arith.constant 0 : index
    %13 = vector.load %arg13[%c0_10, %c0_11, %c0_12] : memref<4x8x512xf32, #tpu.memory_space<vmem>>, vector<4x8x512xf32>
    tpu.vector_store %arg13[%c0_10, %c0_11, %c0_12], %12 {strides = array<i32>} : memref<4x8x512xf32, #tpu.memory_space<vmem>>, vector<4x8x512xf32>,
    %c0_13 = arith.constant 0 : index
    %c0_14 = arith.constant 0 : index
    %14 = vector.load %arg15[%c0_13, %c0_14] : memref<8x128xf32, #tpu.memory_space<vmem>>, vector<8x128xf32>
    %c0_15 = arith.constant 0 : index
    %c0_16 = arith.constant 0 : index
    %15 = vector.load %arg16[%c0_15, %c0_16] : memref<8x128xf32, #tpu.memory_space<vmem>>, vector<8x128xf32>
    %c0_i32_17 = arith.constant 0 : i32
    %16 = arith.index_cast %c0_i32_17 : i32 to index
    %c0_18 = arith.constant 0 : index
    %c0_19 = arith.constant 0 : index
    %17 = vector.load %arg13[%16, %c0_18, %c0_19] : memref<4x8x512xf32, #tpu.memory_space<vmem>>, vector<1x8x512xf32>
    %18 = vector.shape_cast %17 : vector<1x8x512xf32> to vector<8x512xf32>
    %c0_20 = arith.constant 0 : index
    %c0_21 = arith.constant 0 : index
    %19 = vector.load %arg6[%c0_20, %c0_21] : memref<128x512xf32, #tpu.memory_space<vmem>>, vector<128x512xf32>
    %cst_22 = arith.constant dense<0.000000e+00> : vector<8x512xf32>
    %20 = tpu.matmul %14, %19, %cst_22 {dimension_numbers = #tpu.dot_dimension_numbers<[1], [0], [0], [1], [0, 0, 1, 1], [], []>} : vector<8x128xf32>, vector<128x512xf32>, vector<8x512xf32> -> vector<8x512xf32>
    %21 = arith.addf %18, %20 : vector<8x512xf32>
    %22 = vector.extract_strided_slice %21 {offsets = [0, 0], sizes = [8, 384], strides = [1, 1]} : vector<8x512xf32> to vector<8x384xf32>
    %23 = arith.negf %22 : vector<8x384xf32>
    %24 = math.exp %23 : vector<8x384xf32>
    %cst_23 = arith.constant 1.000000e+00 : f32
    %25 = vector.broadcast %cst_23 : f32 to vector<8x384xf32>
    %26 = arith.addf %25, %24 : vector<8x384xf32>
    %27 = arith.divf %25, %26 : vector<8x384xf32>
    %28 = vector.extract_strided_slice %27 {offsets = [0, 0], sizes = [8, 128], strides = [1, 1]} : vector<8x384xf32> to vector<8x128xf32>
    %29 = vector.extract_strided_slice %27 {offsets = [0, 128], sizes = [8, 128], strides = [1, 1]} : vector<8x384xf32> to vector<8x128xf32>
    %30 = vector.extract_strided_slice %27 {offsets = [0, 256], sizes = [8, 128], strides = [1, 1]} : vector<8x384xf32> to vector<8x128xf32>
    %31 = vector.extract_strided_slice %21 {offsets = [0, 384], sizes = [8, 128], strides = [1, 1]} : vector<8x512xf32> to vector<8x128xf32>
    %32 = math.tanh %31 : vector<8x128xf32>
    %33 = arith.mulf %29, %15 : vector<8x128xf32>
    %34 = arith.mulf %28, %32 : vector<8x128xf32>
    %35 = arith.addf %33, %34 : vector<8x128xf32>
    %36 = math.tanh %35 : vector<8x128xf32>
    %37 = arith.mulf %30, %36 : vector<8x128xf32>
    %38 = arith.index_cast %c0_i32_17 : i32 to index
    %c0_24 = arith.constant 0 : index
    %c0_25 = arith.constant 0 : index
    %39 = vector.load %arg14[%38, %c0_24, %c0_25] : memref<4x8x128xf32, #tpu.memory_space<vmem>>, vector<1x8x128xf32>
    %40 = vector.shape_cast %39 : vector<1x8x128xf32> to vector<8x128xf32>
    %41 = vector.shape_cast %37 : vector<8x128xf32> to vector<1x8x128xf32>
    tpu.vector_store %arg14[%38, %c0_24, %c0_25], %41 {strides = array<i32>} : memref<4x8x128xf32, #tpu.memory_space<vmem>>, vector<1x8x128xf32>,
    %c1_i32 = arith.constant 1 : i32
    %42 = arith.index_cast %c1_i32 : i32 to index
    %c0_26 = arith.constant 0 : index
    %c0_27 = arith.constant 0 : index
    %43 = vector.load %arg13[%42, %c0_26, %c0_27] : memref<4x8x512xf32, #tpu.memory_space<vmem>>, vector<1x8x512xf32>
    %44 = vector.shape_cast %43 : vector<1x8x512xf32> to vector<8x512xf32>
    %c0_28 = arith.constant 0 : index
    %c0_29 = arith.constant 0 : index
    %45 = vector.load %arg6[%c0_28, %c0_29] : memref<128x512xf32, #tpu.memory_space<vmem>>, vector<128x512xf32>
    %cst_30 = arith.constant dense<0.000000e+00> : vector<8x512xf32>
    %46 = tpu.matmul %37, %45, %cst_30 {dimension_numbers = #tpu.dot_dimension_numbers<[1], [0], [0], [1], [0, 0, 1, 1], [], []>} : vector<8x128xf32>, vector<128x512xf32>, vector<8x512xf32> -> vector<8x512xf32>
    %47 = arith.addf %44, %46 : vector<8x512xf32>
    %48 = vector.extract_strided_slice %47 {offsets = [0, 0], sizes = [8, 384], strides = [1, 1]} : vector<8x512xf32> to vector<8x384xf32>
    %49 = arith.negf %48 : vector<8x384xf32>
    %50 = math.exp %49 : vector<8x384xf32>
    %cst_31 = arith.constant 1.000000e+00 : f32
    %51 = vector.broadcast %cst_31 : f32 to vector<8x384xf32>
    %52 = arith.addf %51, %50 : vector<8x384xf32>
    %53 = arith.divf %51, %52 : vector<8x384xf32>
    %54 = vector.extract_strided_slice %53 {offsets = [0, 0], sizes = [8, 128], strides = [1, 1]} : vector<8x384xf32> to vector<8x128xf32>
    %55 = vector.extract_strided_slice %53 {offsets = [0, 128], sizes = [8, 128], strides = [1, 1]} : vector<8x384xf32> to vector<8x128xf32>
    %56 = vector.extract_strided_slice %53 {offsets = [0, 256], sizes = [8, 128], strides = [1, 1]} : vector<8x384xf32> to vector<8x128xf32>
    %57 = vector.extract_strided_slice %47 {offsets = [0, 384], sizes = [8, 128], strides = [1, 1]} : vector<8x512xf32> to vector<8x128xf32>
    %58 = math.tanh %57 : vector<8x128xf32>
    %59 = arith.mulf %55, %35 : vector<8x128xf32>
    %60 = arith.mulf %54, %58 : vector<8x128xf32>
    %61 = arith.addf %59, %60 : vector<8x128xf32>
    %62 = math.tanh %61 : vector<8x128xf32>
    %63 = arith.mulf %56, %62 : vector<8x128xf32>
    %64 = arith.index_cast %c1_i32 : i32 to index
    %c0_32 = arith.constant 0 : index
    %c0_33 = arith.constant 0 : index
    %65 = vector.load %arg14[%64, %c0_32, %c0_33] : memref<4x8x128xf32, #tpu.memory_space<vmem>>, vector<1x8x128xf32>
    %66 = vector.shape_cast %65 : vector<1x8x128xf32> to vector<8x128xf32>
    %67 = vector.shape_cast %63 : vector<8x128xf32> to vector<1x8x128xf32>
    tpu.vector_store %arg14[%64, %c0_32, %c0_33], %67 {strides = array<i32>} : memref<4x8x128xf32, #tpu.memory_space<vmem>>, vector<1x8x128xf32>,
    %c2_i32 = arith.constant 2 : i32
    %68 = arith.index_cast %c2_i32 : i32 to index
    %c0_34 = arith.constant 0 : index
    %c0_35 = arith.constant 0 : index
    %69 = vector.load %arg13[%68, %c0_34, %c0_35] : memref<4x8x512xf32, #tpu.memory_space<vmem>>, vector<1x8x512xf32>
    %70 = vector.shape_cast %69 : vector<1x8x512xf32> to vector<8x512xf32>
    %c0_36 = arith.constant 0 : index
    %c0_37 = arith.constant 0 : index
    %71 = vector.load %arg6[%c0_36, %c0_37] : memref<128x512xf32, #tpu.memory_space<vmem>>, vector<128x512xf32>
    %cst_38 = arith.constant dense<0.000000e+00> : vector<8x512xf32>
    %72 = tpu.matmul %63, %71, %cst_38 {dimension_numbers = #tpu.dot_dimension_numbers<[1], [0], [0], [1], [0, 0, 1, 1], [], []>} : vector<8x128xf32>, vector<128x512xf32>, vector<8x512xf32> -> vector<8x512xf32>
    %73 = arith.addf %70, %72 : vector<8x512xf32>
    %74 = vector.extract_strided_slice %73 {offsets = [0, 0], sizes = [8, 384], strides = [1, 1]} : vector<8x512xf32> to vector<8x384xf32>
    %75 = arith.negf %74 : vector<8x384xf32>
    %76 = math.exp %75 : vector<8x384xf32>
    %cst_39 = arith.constant 1.000000e+00 : f32
    %77 = vector.broadcast %cst_39 : f32 to vector<8x384xf32>
    %78 = arith.addf %77, %76 : vector<8x384xf32>
    %79 = arith.divf %77, %78 : vector<8x384xf32>
    %80 = vector.extract_strided_slice %79 {offsets = [0, 0], sizes = [8, 128], strides = [1, 1]} : vector<8x384xf32> to vector<8x128xf32>
    %81 = vector.extract_strided_slice %79 {offsets = [0, 128], sizes = [8, 128], strides = [1, 1]} : vector<8x384xf32> to vector<8x128xf32>
    %82 = vector.extract_strided_slice %79 {offsets = [0, 256], sizes = [8, 128], strides = [1, 1]} : vector<8x384xf32> to vector<8x128xf32>
    %83 = vector.extract_strided_slice %73 {offsets = [0, 384], sizes = [8, 128], strides = [1, 1]} : vector<8x512xf32> to vector<8x128xf32>
    %84 = math.tanh %83 : vector<8x128xf32>
    %85 = arith.mulf %81, %61 : vector<8x128xf32>
    %86 = arith.mulf %80, %84 : vector<8x128xf32>
    %87 = arith.addf %85, %86 : vector<8x128xf32>
    %88 = math.tanh %87 : vector<8x128xf32>
    %89 = arith.mulf %82, %88 : vector<8x128xf32>
    %90 = arith.index_cast %c2_i32 : i32 to index
    %c0_40 = arith.constant 0 : index
    %c0_41 = arith.constant 0 : index
    %91 = vector.load %arg14[%90, %c0_40, %c0_41] : memref<4x8x128xf32, #tpu.memory_space<vmem>>, vector<1x8x128xf32>
    %92 = vector.shape_cast %91 : vector<1x8x128xf32> to vector<8x128xf32>
    %93 = vector.shape_cast %89 : vector<8x128xf32> to vector<1x8x128xf32>
    tpu.vector_store %arg14[%90, %c0_40, %c0_41], %93 {strides = array<i32>} : memref<4x8x128xf32, #tpu.memory_space<vmem>>, vector<1x8x128xf32>,
    %c3_i32 = arith.constant 3 : i32
    %94 = arith.index_cast %c3_i32 : i32 to index
    %c0_42 = arith.constant 0 : index
    %c0_43 = arith.constant 0 : index
    %95 = vector.load %arg13[%94, %c0_42, %c0_43] : memref<4x8x512xf32, #tpu.memory_space<vmem>>, vector<1x8x512xf32>
    %96 = vector.shape_cast %95 : vector<1x8x512xf32> to vector<8x512xf32>
    %c0_44 = arith.constant 0 : index
    %c0_45 = arith.constant 0 : index
    %97 = vector.load %arg6[%c0_44, %c0_45] : memref<128x512xf32, #tpu.memory_space<vmem>>, vector<128x512xf32>
    %cst_46 = arith.constant dense<0.000000e+00> : vector<8x512xf32>
    %98 = tpu.matmul %89, %97, %cst_46 {dimension_numbers = #tpu.dot_dimension_numbers<[1], [0], [0], [1], [0, 0, 1, 1], [], []>} : vector<8x128xf32>, vector<128x512xf32>, vector<8x512xf32> -> vector<8x512xf32>
    %99 = arith.addf %96, %98 : vector<8x512xf32>
    %100 = vector.extract_strided_slice %99 {offsets = [0, 0], sizes = [8, 384], strides = [1, 1]} : vector<8x512xf32> to vector<8x384xf32>
    %101 = arith.negf %100 : vector<8x384xf32>
    %102 = math.exp %101 : vector<8x384xf32>
    %cst_47 = arith.constant 1.000000e+00 : f32
    %103 = vector.broadcast %cst_47 : f32 to vector<8x384xf32>
    %104 = arith.addf %103, %102 : vector<8x384xf32>
    %105 = arith.divf %103, %104 : vector<8x384xf32>
    %106 = vector.extract_strided_slice %105 {offsets = [0, 0], sizes = [8, 128], strides = [1, 1]} : vector<8x384xf32> to vector<8x128xf32>
    %107 = vector.extract_strided_slice %105 {offsets = [0, 128], sizes = [8, 128], strides = [1, 1]} : vector<8x384xf32> to vector<8x128xf32>
    %108 = vector.extract_strided_slice %105 {offsets = [0, 256], sizes = [8, 128], strides = [1, 1]} : vector<8x384xf32> to vector<8x128xf32>
    %109 = vector.extract_strided_slice %99 {offsets = [0, 384], sizes = [8, 128], strides = [1, 1]} : vector<8x512xf32> to vector<8x128xf32>
    %110 = math.tanh %109 : vector<8x128xf32>
    %111 = arith.mulf %107, %87 : vector<8x128xf32>
    %112 = arith.mulf %106, %110 : vector<8x128xf32>
    %113 = arith.addf %111, %112 : vector<8x128xf32>
    %114 = math.tanh %113 : vector<8x128xf32>
    %115 = arith.mulf %108, %114 : vector<8x128xf32>
    %116 = arith.index_cast %c3_i32 : i32 to index
    %c0_48 = arith.constant 0 : index
    %c0_49 = arith.constant 0 : index
    %117 = vector.load %arg14[%116, %c0_48, %c0_49] : memref<4x8x128xf32, #tpu.memory_space<vmem>>, vector<1x8x128xf32>
    %118 = vector.shape_cast %117 : vector<1x8x128xf32> to vector<8x128xf32>
    %119 = vector.shape_cast %115 : vector<8x128xf32> to vector<1x8x128xf32>
    tpu.vector_store %arg14[%116, %c0_48, %c0_49], %119 {strides = array<i32>} : memref<4x8x128xf32, #tpu.memory_space<vmem>>, vector<1x8x128xf32>,
    %c4_i32 = arith.constant 4 : i32
    %c0_50 = arith.constant 0 : index
    %c0_51 = arith.constant 0 : index
    %120 = vector.load %arg15[%c0_50, %c0_51] : memref<8x128xf32, #tpu.memory_space<vmem>>, vector<8x128xf32>
    tpu.vector_store %arg15[%c0_50, %c0_51], %115 {strides = array<i32>} : memref<8x128xf32, #tpu.memory_space<vmem>>, vector<8x128xf32>,
    %c0_52 = arith.constant 0 : index
    %c0_53 = arith.constant 0 : index
    %121 = vector.load %arg16[%c0_52, %c0_53] : memref<8x128xf32, #tpu.memory_space<vmem>>, vector<8x128xf32>
    tpu.vector_store %arg16[%c0_52, %c0_53], %113 {strides = array<i32>} : memref<8x128xf32, #tpu.memory_space<vmem>>, vector<8x128xf32>,
    %c0_54 = arith.constant 0 : index
    %c0_55 = arith.constant 0 : index
    %122 = vector.load %arg15[%c0_54, %c0_55] : memref<8x128xf32, #tpu.memory_space<vmem>>, vector<8x128xf32>
    %c0_56 = arith.constant 0 : index
    %c0_57 = arith.constant 0 : index
    %123 = vector.load %arg11[%c0_56, %c0_57] : memref<8x128xf32, #tpu.memory_space<vmem>>, vector<8x128xf32>
    tpu.vector_store %arg11[%c0_56, %c0_57], %122 {strides = array<i32>} : memref<8x128xf32, #tpu.memory_space<vmem>>, vector<8x128xf32>,
    %c0_58 = arith.constant 0 : index
    %c0_59 = arith.constant 0 : index
    %124 = vector.load %arg16[%c0_58, %c0_59] : memref<8x128xf32, #tpu.memory_space<vmem>>, vector<8x128xf32>
    %c0_60 = arith.constant 0 : index
    %c0_61 = arith.constant 0 : index
    %125 = vector.load %arg12[%c0_60, %c0_61] : memref<8x128xf32, #tpu.memory_space<vmem>>, vector<8x128xf32>
    tpu.vector_store %arg12[%c0_60, %c0_61], %124 {strides = array<i32>} : memref<8x128xf32, #tpu.memory_space<vmem>>, vector<8x128xf32>,
    %c0_62 = arith.constant 0 : index
    %c0_63 = arith.constant 0 : index
    %c0_64 = arith.constant 0 : index
    %126 = vector.load %arg14[%c0_62, %c0_63, %c0_64] : memref<4x8x128xf32, #tpu.memory_space<vmem>>, vector<4x8x128xf32>
    %c0_65 = arith.constant 0 : index
    %c0_66 = arith.constant 0 : index
    %c0_67 = arith.constant 0 : index
    %127 = vector.load %arg9[%c0_65, %c0_66, %c0_67] : memref<4x8x128xf32, #tpu.memory_space<vmem>>, vector<4x8x128xf32>
    tpu.vector_store %arg9[%c0_65, %c0_66, %c0_67], %126 {strides = array<i32>} : memref<4x8x128xf32, #tpu.memory_space<vmem>>, vector<4x8x128xf32>,
    %c0_68 = arith.constant 0 : index
    %c0_69 = arith.constant 0 : index
    %c0_70 = arith.constant 0 : index
    %128 = vector.load %arg14[%c0_68, %c0_69, %c0_70] : memref<4x8x128xf32, #tpu.memory_space<vmem>>, vector<4x8x128xf32>
    %129 = vector.shape_cast %128 : vector<4x8x128xf32> to vector<32x128xf32>
    %c0_71 = arith.constant 0 : index
    %c0_72 = arith.constant 0 : index
    %130 = vector.load %arg7[%c0_71, %c0_72] : memref<128x128xf32, #tpu.memory_space<vmem>>, vector<128x128xf32>
    %cst_73 = arith.constant dense<0.000000e+00> : vector<32x128xf32>
    %131 = tpu.matmul %129, %130, %cst_73 {dimension_numbers = #tpu.dot_dimension_numbers<[1], [0], [0], [1], [0, 0, 1, 1], [], []>} : vector<32x128xf32>, vector<128x128xf32>, vector<32x128xf32> -> vector<32x128xf32>
    %c0_74 = arith.constant 0 : index
    %c0_75 = arith.constant 0 : index
    %132 = vector.load %arg8[%c0_74, %c0_75] : memref<1x128xf32, #tpu.memory_space<vmem>>, vector<1x128xf32>
    %133 = vector.broadcast %132 : vector<1x128xf32> to vector<32x128xf32>
    %134 = arith.addf %131, %133 : vector<32x128xf32>
    %135 = vector.shape_cast %134 : vector<32x128xf32> to vector<4x8x128xf32>
    %c0_76 = arith.constant 0 : index
    %c0_77 = arith.constant 0 : index
    %c0_78 = arith.constant 0 : index
    %136 = vector.load %arg10[%c0_76, %c0_77, %c0_78] : memref<4x8x128xf32, #tpu.memory_space<vmem>>, vector<4x8x128xf32>
    tpu.vector_store %arg10[%c0_76, %c0_77, %c0_78], %135 {strides = array<i32>} : memref<4x8x128xf32, #tpu.memory_space<vmem>>, vector<4x8x128xf32>,
    return
  }
  func.func @transform_0(%arg0: i32, %arg1: i32) -> (i32, i32, i32) {
    %c0_i32 = arith.constant 0 : i32
    %c0_i32_0 = arith.constant 0 : i32
    return %arg1, %arg0, %c0_i32 : i32, i32, i32
  }
  func.func @transform_1(%arg0: i32, %arg1: i32) -> (i32, i32) {
    %c0_i32 = arith.constant 0 : i32
    %c0_i32_0 = arith.constant 0 : i32
    %c0_i32_1 = arith.constant 0 : i32
    return %c0_i32, %c0_i32_0 : i32, i32
  }
  func.func @transform_2(%arg0: i32, %arg1: i32) -> (i32, i32) {
    %c0_i32 = arith.constant 0 : i32
    %c0_i32_0 = arith.constant 0 : i32
    %c0_i32_1 = arith.constant 0 : i32
    return %c0_i32, %c0_i32_0 : i32, i32
  }
  func.func @transform_3(%arg0: i32, %arg1: i32) -> (i32, i32) {
    %c0_i32 = arith.constant 0 : i32
    %c0_i32_0 = arith.constant 0 : i32
    %c0_i32_1 = arith.constant 0 : i32
    return %c0_i32, %c0_i32_0 : i32, i32
  }
  func.func @transform_4(%arg0: i32, %arg1: i32) -> (i32, i32) {
    %c0_i32 = arith.constant 0 : i32
    %c0_i32_0 = arith.constant 0 : i32
    %c0_i32_1 = arith.constant 0 : i32
    return %c0_i32, %c0_i32_0 : i32, i32
  }
  func.func @transform_5(%arg0: i32, %arg1: i32) -> (i32, i32) {
    %c0_i32 = arith.constant 0 : i32
    %c0_i32_0 = arith.constant 0 : i32
    %c0_i32_1 = arith.constant 0 : i32
    return %c0_i32, %c0_i32_0 : i32, i32
  }
  func.func @transform_6(%arg0: i32, %arg1: i32) -> (i32, i32) {
    %c0_i32 = arith.constant 0 : i32
    %c0_i32_0 = arith.constant 0 : i32
    %c0_i32_1 = arith.constant 0 : i32
    return %c0_i32, %c0_i32_0 : i32, i32
  }
  func.func @transform_7(%arg0: i32, %arg1: i32) -> (i32, i32, i32) {
    %c0_i32 = arith.constant 0 : i32
    %c0_i32_0 = arith.constant 0 : i32
    return %arg1, %arg0, %c0_i32 : i32, i32, i32
  }
  func.func @transform_8(%arg0: i32, %arg1: i32) -> (i32, i32, i32) {
    %c0_i32 = arith.constant 0 : i32
    %c0_i32_0 = arith.constant 0 : i32
    return %arg1, %arg0, %c0_i32 : i32, i32, i32
  }
  func.func @transform_9(%arg0: i32, %arg1: i32) -> (i32, i32) {
    %c0_i32 = arith.constant 0 : i32
    %c0_i32_0 = arith.constant 0 : i32
    return %arg0, %c0_i32 : i32, i32
  }
  func.func @transform_10(%arg0: i32, %arg1: i32) -> (i32, i32) {
    %c0_i32 = arith.constant 0 : i32
    %c0_i32_0 = arith.constant 0 : i32
    return %arg0, %c0_i32 : i32, i32
  }
}

module attributes {stable_mosaic.version = 11 : i64} {
  func.func @_skip_lstm_layer_kernel(%arg0: i32, %arg1: i32, %arg2: memref<4x8x128xf32, #tpu.memory_space<vmem>>, %arg3: memref<4x8x128xf32, #tpu.memory_space<vmem>>, %arg4: memref<4x8x128xf32, #tpu.memory_space<vmem>>, %arg5: memref<128x128xf32, #tpu.memory_space<vmem>>, %arg6: memref<128x512xf32, #tpu.memory_space<vmem>>, %arg7: memref<1x512xf32, #tpu.memory_space<vmem>>, %arg8: memref<128x512xf32, #tpu.memory_space<vmem>>, %arg9: memref<128x128xf32, #tpu.memory_space<vmem>>, %arg10: memref<1x128xf32, #tpu.memory_space<vmem>>, %arg11: memref<4x8x128xf32, #tpu.memory_space<vmem>>, %arg12: memref<8x128xf32, #tpu.memory_space<vmem>>, %arg13: memref<8x128xf32, #tpu.memory_space<vmem>>, %arg14: memref<4x8x512xf32, #tpu.memory_space<vmem>>, %arg15: memref<4x8x128xf32, #tpu.memory_space<vmem>>, %arg16: memref<8x128xf32, #tpu.memory_space<vmem>>, %arg17: memref<8x128xf32, #tpu.memory_space<vmem>>) attributes {dimension_semantics = [#tpu.dimension_semantics<parallel>, #tpu.dimension_semantics<arbitrary>], iteration_bounds = array<i64: 1, 2>, scalar_prefetch = 0 : i64, scratch_operands = 4 : i64, tpu.core_type = #tpu.core_type<tc>, window_params = [{transform_indices = @transform_0, window_bounds = array<i64: 4, 8, 128>}, {transform_indices = @transform_1, window_bounds = array<i64: 4, 8, 128>}, {transform_indices = @transform_2, window_bounds = array<i64: 4, 8, 128>}, {pipeline_mode = #tpu.pipeline_mode<synchronous>, transform_indices = @transform_3, window_bounds = array<i64: 128, 128>}, {pipeline_mode = #tpu.pipeline_mode<synchronous>, transform_indices = @transform_4, window_bounds = array<i64: 128, 512>}, {pipeline_mode = #tpu.pipeline_mode<synchronous>, transform_indices = @transform_5, window_bounds = array<i64: 1, 512>}, {pipeline_mode = #tpu.pipeline_mode<synchronous>, transform_indices = @transform_6, window_bounds = array<i64: 128, 512>}, {pipeline_mode = #tpu.pipeline_mode<synchronous>, transform_indices = @transform_7, window_bounds = array<i64: 128, 128>}, {pipeline_mode = #tpu.pipeline_mode<synchronous>, transform_indices = @transform_8, window_bounds = array<i64: 1, 128>}, {transform_indices = @transform_9, window_bounds = array<i64: 4, 8, 128>}, {transform_indices = @transform_10, window_bounds = array<i64: 8, 128>}, {transform_indices = @transform_11, window_bounds = array<i64: 8, 128>}]} {
    %c0_i32 = arith.constant 0 : i32
    %0 = arith.cmpi eq, %arg1, %c0_i32 : i32
    %1 = arith.extui %0 : i1 to i32
    %c0_i32_0 = arith.constant 0 : i32
    %2 = arith.cmpi ne, %1, %c0_i32_0 : i32
    scf.if %2 {
      %cst_79 = arith.constant 0.000000e+00 : f32
      %141 = vector.broadcast %cst_79 : f32 to vector<8x128xf32>
      %c0_80 = arith.constant 0 : index
      %c0_81 = arith.constant 0 : index
      %142 = vector.load %arg16[%c0_80, %c0_81] : memref<8x128xf32, #tpu.memory_space<vmem>>, vector<8x128xf32>
      tpu.vector_store %arg16[%c0_80, %c0_81], %141 {strides = array<i32>} : memref<8x128xf32, #tpu.memory_space<vmem>>, vector<8x128xf32>,
      %cst_82 = arith.constant 0.000000e+00 : f32
      %143 = vector.broadcast %cst_82 : f32 to vector<8x128xf32>
      %c0_83 = arith.constant 0 : index
      %c0_84 = arith.constant 0 : index
      %144 = vector.load %arg17[%c0_83, %c0_84] : memref<8x128xf32, #tpu.memory_space<vmem>>, vector<8x128xf32>
      tpu.vector_store %arg17[%c0_83, %c0_84], %143 {strides = array<i32>} : memref<8x128xf32, #tpu.memory_space<vmem>>, vector<8x128xf32>,
    } else {
    }
    %c0 = arith.constant 0 : index
    %c0_1 = arith.constant 0 : index
    %c0_2 = arith.constant 0 : index
    %3 = vector.load %arg2[%c0, %c0_1, %c0_2] : memref<4x8x128xf32, #tpu.memory_space<vmem>>, vector<4x8x128xf32>
    %4 = vector.shape_cast %3 : vector<4x8x128xf32> to vector<32x128xf32>
    %c0_3 = arith.constant 0 : index
    %c0_4 = arith.constant 0 : index
    %5 = vector.load %arg5[%c0_3, %c0_4] : memref<128x128xf32, #tpu.memory_space<vmem>>, vector<128x128xf32>
    %cst = arith.constant dense<0.000000e+00> : vector<32x128xf32>
    %6 = tpu.matmul %4, %5, %cst {dimension_numbers = #tpu.dot_dimension_numbers<[1], [0], [0], [1], [0, 0, 1, 1], [], []>} : vector<32x128xf32>, vector<128x128xf32>, vector<32x128xf32> -> vector<32x128xf32>
    %c0_5 = arith.constant 0 : index
    %c0_6 = arith.constant 0 : index
    %c0_7 = arith.constant 0 : index
    %7 = vector.load %arg3[%c0_5, %c0_6, %c0_7] : memref<4x8x128xf32, #tpu.memory_space<vmem>>, vector<4x8x128xf32>
    %8 = vector.shape_cast %7 : vector<4x8x128xf32> to vector<32x128xf32>
    %9 = arith.addf %6, %8 : vector<32x128xf32>
    %c0_8 = arith.constant 0 : index
    %c0_9 = arith.constant 0 : index
    %10 = vector.load %arg6[%c0_8, %c0_9] : memref<128x512xf32, #tpu.memory_space<vmem>>, vector<128x512xf32>
    %cst_10 = arith.constant dense<0.000000e+00> : vector<32x512xf32>
    %11 = tpu.matmul %9, %10, %cst_10 {dimension_numbers = #tpu.dot_dimension_numbers<[1], [0], [0], [1], [0, 0, 1, 1], [], []>} : vector<32x128xf32>, vector<128x512xf32>, vector<32x512xf32> -> vector<32x512xf32>
    %c0_11 = arith.constant 0 : index
    %c0_12 = arith.constant 0 : index
    %12 = vector.load %arg7[%c0_11, %c0_12] : memref<1x512xf32, #tpu.memory_space<vmem>>, vector<1x512xf32>
    %13 = vector.broadcast %12 : vector<1x512xf32> to vector<32x512xf32>
    %14 = arith.addf %11, %13 : vector<32x512xf32>
    %15 = vector.shape_cast %14 : vector<32x512xf32> to vector<4x8x512xf32>
    %c0_13 = arith.constant 0 : index
    %c0_14 = arith.constant 0 : index
    %c0_15 = arith.constant 0 : index
    %16 = vector.load %arg14[%c0_13, %c0_14, %c0_15] : memref<4x8x512xf32, #tpu.memory_space<vmem>>, vector<4x8x512xf32>
    tpu.vector_store %arg14[%c0_13, %c0_14, %c0_15], %15 {strides = array<i32>} : memref<4x8x512xf32, #tpu.memory_space<vmem>>, vector<4x8x512xf32>,
    %c0_16 = arith.constant 0 : index
    %c0_17 = arith.constant 0 : index
    %17 = vector.load %arg16[%c0_16, %c0_17] : memref<8x128xf32, #tpu.memory_space<vmem>>, vector<8x128xf32>
    %c0_18 = arith.constant 0 : index
    %c0_19 = arith.constant 0 : index
    %18 = vector.load %arg17[%c0_18, %c0_19] : memref<8x128xf32, #tpu.memory_space<vmem>>, vector<8x128xf32>
    %c0_i32_20 = arith.constant 0 : i32
    %19 = arith.index_cast %c0_i32_20 : i32 to index
    %c0_21 = arith.constant 0 : index
    %c0_22 = arith.constant 0 : index
    %20 = vector.load %arg14[%19, %c0_21, %c0_22] : memref<4x8x512xf32, #tpu.memory_space<vmem>>, vector<1x8x512xf32>
    %21 = vector.shape_cast %20 : vector<1x8x512xf32> to vector<8x512xf32>
    %c0_23 = arith.constant 0 : index
    %c0_24 = arith.constant 0 : index
    %22 = vector.load %arg8[%c0_23, %c0_24] : memref<128x512xf32, #tpu.memory_space<vmem>>, vector<128x512xf32>
    %cst_25 = arith.constant dense<0.000000e+00> : vector<8x512xf32>
    %23 = tpu.matmul %17, %22, %cst_25 {dimension_numbers = #tpu.dot_dimension_numbers<[1], [0], [0], [1], [0, 0, 1, 1], [], []>} : vector<8x128xf32>, vector<128x512xf32>, vector<8x512xf32> -> vector<8x512xf32>
    %24 = arith.addf %21, %23 : vector<8x512xf32>
    %25 = vector.extract_strided_slice %24 {offsets = [0, 0], sizes = [8, 384], strides = [1, 1]} : vector<8x512xf32> to vector<8x384xf32>
    %26 = arith.negf %25 : vector<8x384xf32>
    %27 = math.exp %26 : vector<8x384xf32>
    %cst_26 = arith.constant 1.000000e+00 : f32
    %28 = vector.broadcast %cst_26 : f32 to vector<8x384xf32>
    %29 = arith.addf %28, %27 : vector<8x384xf32>
    %30 = arith.divf %28, %29 : vector<8x384xf32>
    %31 = vector.extract_strided_slice %30 {offsets = [0, 0], sizes = [8, 128], strides = [1, 1]} : vector<8x384xf32> to vector<8x128xf32>
    %32 = vector.extract_strided_slice %30 {offsets = [0, 128], sizes = [8, 128], strides = [1, 1]} : vector<8x384xf32> to vector<8x128xf32>
    %33 = vector.extract_strided_slice %30 {offsets = [0, 256], sizes = [8, 128], strides = [1, 1]} : vector<8x384xf32> to vector<8x128xf32>
    %34 = vector.extract_strided_slice %24 {offsets = [0, 384], sizes = [8, 128], strides = [1, 1]} : vector<8x512xf32> to vector<8x128xf32>
    %35 = math.tanh %34 : vector<8x128xf32>
    %36 = arith.mulf %32, %18 : vector<8x128xf32>
    %37 = arith.mulf %31, %35 : vector<8x128xf32>
    %38 = arith.addf %36, %37 : vector<8x128xf32>
    %39 = math.tanh %38 : vector<8x128xf32>
    %40 = arith.mulf %33, %39 : vector<8x128xf32>
    %41 = arith.index_cast %c0_i32_20 : i32 to index
    %c0_27 = arith.constant 0 : index
    %c0_28 = arith.constant 0 : index
    %42 = vector.load %arg15[%41, %c0_27, %c0_28] : memref<4x8x128xf32, #tpu.memory_space<vmem>>, vector<1x8x128xf32>
    %43 = vector.shape_cast %42 : vector<1x8x128xf32> to vector<8x128xf32>
    %44 = vector.shape_cast %40 : vector<8x128xf32> to vector<1x8x128xf32>
    tpu.vector_store %arg15[%41, %c0_27, %c0_28], %44 {strides = array<i32>} : memref<4x8x128xf32, #tpu.memory_space<vmem>>, vector<1x8x128xf32>,
    %c1_i32 = arith.constant 1 : i32
    %45 = arith.index_cast %c1_i32 : i32 to index
    %c0_29 = arith.constant 0 : index
    %c0_30 = arith.constant 0 : index
    %46 = vector.load %arg14[%45, %c0_29, %c0_30] : memref<4x8x512xf32, #tpu.memory_space<vmem>>, vector<1x8x512xf32>
    %47 = vector.shape_cast %46 : vector<1x8x512xf32> to vector<8x512xf32>
    %c0_31 = arith.constant 0 : index
    %c0_32 = arith.constant 0 : index
    %48 = vector.load %arg8[%c0_31, %c0_32] : memref<128x512xf32, #tpu.memory_space<vmem>>, vector<128x512xf32>
    %cst_33 = arith.constant dense<0.000000e+00> : vector<8x512xf32>
    %49 = tpu.matmul %40, %48, %cst_33 {dimension_numbers = #tpu.dot_dimension_numbers<[1], [0], [0], [1], [0, 0, 1, 1], [], []>} : vector<8x128xf32>, vector<128x512xf32>, vector<8x512xf32> -> vector<8x512xf32>
    %50 = arith.addf %47, %49 : vector<8x512xf32>
    %51 = vector.extract_strided_slice %50 {offsets = [0, 0], sizes = [8, 384], strides = [1, 1]} : vector<8x512xf32> to vector<8x384xf32>
    %52 = arith.negf %51 : vector<8x384xf32>
    %53 = math.exp %52 : vector<8x384xf32>
    %cst_34 = arith.constant 1.000000e+00 : f32
    %54 = vector.broadcast %cst_34 : f32 to vector<8x384xf32>
    %55 = arith.addf %54, %53 : vector<8x384xf32>
    %56 = arith.divf %54, %55 : vector<8x384xf32>
    %57 = vector.extract_strided_slice %56 {offsets = [0, 0], sizes = [8, 128], strides = [1, 1]} : vector<8x384xf32> to vector<8x128xf32>
    %58 = vector.extract_strided_slice %56 {offsets = [0, 128], sizes = [8, 128], strides = [1, 1]} : vector<8x384xf32> to vector<8x128xf32>
    %59 = vector.extract_strided_slice %56 {offsets = [0, 256], sizes = [8, 128], strides = [1, 1]} : vector<8x384xf32> to vector<8x128xf32>
    %60 = vector.extract_strided_slice %50 {offsets = [0, 384], sizes = [8, 128], strides = [1, 1]} : vector<8x512xf32> to vector<8x128xf32>
    %61 = math.tanh %60 : vector<8x128xf32>
    %62 = arith.mulf %58, %38 : vector<8x128xf32>
    %63 = arith.mulf %57, %61 : vector<8x128xf32>
    %64 = arith.addf %62, %63 : vector<8x128xf32>
    %65 = math.tanh %64 : vector<8x128xf32>
    %66 = arith.mulf %59, %65 : vector<8x128xf32>
    %67 = arith.index_cast %c1_i32 : i32 to index
    %c0_35 = arith.constant 0 : index
    %c0_36 = arith.constant 0 : index
    %68 = vector.load %arg15[%67, %c0_35, %c0_36] : memref<4x8x128xf32, #tpu.memory_space<vmem>>, vector<1x8x128xf32>
    %69 = vector.shape_cast %68 : vector<1x8x128xf32> to vector<8x128xf32>
    %70 = vector.shape_cast %66 : vector<8x128xf32> to vector<1x8x128xf32>
    tpu.vector_store %arg15[%67, %c0_35, %c0_36], %70 {strides = array<i32>} : memref<4x8x128xf32, #tpu.memory_space<vmem>>, vector<1x8x128xf32>,
    %c2_i32 = arith.constant 2 : i32
    %71 = arith.index_cast %c2_i32 : i32 to index
    %c0_37 = arith.constant 0 : index
    %c0_38 = arith.constant 0 : index
    %72 = vector.load %arg14[%71, %c0_37, %c0_38] : memref<4x8x512xf32, #tpu.memory_space<vmem>>, vector<1x8x512xf32>
    %73 = vector.shape_cast %72 : vector<1x8x512xf32> to vector<8x512xf32>
    %c0_39 = arith.constant 0 : index
    %c0_40 = arith.constant 0 : index
    %74 = vector.load %arg8[%c0_39, %c0_40] : memref<128x512xf32, #tpu.memory_space<vmem>>, vector<128x512xf32>
    %cst_41 = arith.constant dense<0.000000e+00> : vector<8x512xf32>
    %75 = tpu.matmul %66, %74, %cst_41 {dimension_numbers = #tpu.dot_dimension_numbers<[1], [0], [0], [1], [0, 0, 1, 1], [], []>} : vector<8x128xf32>, vector<128x512xf32>, vector<8x512xf32> -> vector<8x512xf32>
    %76 = arith.addf %73, %75 : vector<8x512xf32>
    %77 = vector.extract_strided_slice %76 {offsets = [0, 0], sizes = [8, 384], strides = [1, 1]} : vector<8x512xf32> to vector<8x384xf32>
    %78 = arith.negf %77 : vector<8x384xf32>
    %79 = math.exp %78 : vector<8x384xf32>
    %cst_42 = arith.constant 1.000000e+00 : f32
    %80 = vector.broadcast %cst_42 : f32 to vector<8x384xf32>
    %81 = arith.addf %80, %79 : vector<8x384xf32>
    %82 = arith.divf %80, %81 : vector<8x384xf32>
    %83 = vector.extract_strided_slice %82 {offsets = [0, 0], sizes = [8, 128], strides = [1, 1]} : vector<8x384xf32> to vector<8x128xf32>
    %84 = vector.extract_strided_slice %82 {offsets = [0, 128], sizes = [8, 128], strides = [1, 1]} : vector<8x384xf32> to vector<8x128xf32>
    %85 = vector.extract_strided_slice %82 {offsets = [0, 256], sizes = [8, 128], strides = [1, 1]} : vector<8x384xf32> to vector<8x128xf32>
    %86 = vector.extract_strided_slice %76 {offsets = [0, 384], sizes = [8, 128], strides = [1, 1]} : vector<8x512xf32> to vector<8x128xf32>
    %87 = math.tanh %86 : vector<8x128xf32>
    %88 = arith.mulf %84, %64 : vector<8x128xf32>
    %89 = arith.mulf %83, %87 : vector<8x128xf32>
    %90 = arith.addf %88, %89 : vector<8x128xf32>
    %91 = math.tanh %90 : vector<8x128xf32>
    %92 = arith.mulf %85, %91 : vector<8x128xf32>
    %93 = arith.index_cast %c2_i32 : i32 to index
    %c0_43 = arith.constant 0 : index
    %c0_44 = arith.constant 0 : index
    %94 = vector.load %arg15[%93, %c0_43, %c0_44] : memref<4x8x128xf32, #tpu.memory_space<vmem>>, vector<1x8x128xf32>
    %95 = vector.shape_cast %94 : vector<1x8x128xf32> to vector<8x128xf32>
    %96 = vector.shape_cast %92 : vector<8x128xf32> to vector<1x8x128xf32>
    tpu.vector_store %arg15[%93, %c0_43, %c0_44], %96 {strides = array<i32>} : memref<4x8x128xf32, #tpu.memory_space<vmem>>, vector<1x8x128xf32>,
    %c3_i32 = arith.constant 3 : i32
    %97 = arith.index_cast %c3_i32 : i32 to index
    %c0_45 = arith.constant 0 : index
    %c0_46 = arith.constant 0 : index
    %98 = vector.load %arg14[%97, %c0_45, %c0_46] : memref<4x8x512xf32, #tpu.memory_space<vmem>>, vector<1x8x512xf32>
    %99 = vector.shape_cast %98 : vector<1x8x512xf32> to vector<8x512xf32>
    %c0_47 = arith.constant 0 : index
    %c0_48 = arith.constant 0 : index
    %100 = vector.load %arg8[%c0_47, %c0_48] : memref<128x512xf32, #tpu.memory_space<vmem>>, vector<128x512xf32>
    %cst_49 = arith.constant dense<0.000000e+00> : vector<8x512xf32>
    %101 = tpu.matmul %92, %100, %cst_49 {dimension_numbers = #tpu.dot_dimension_numbers<[1], [0], [0], [1], [0, 0, 1, 1], [], []>} : vector<8x128xf32>, vector<128x512xf32>, vector<8x512xf32> -> vector<8x512xf32>
    %102 = arith.addf %99, %101 : vector<8x512xf32>
    %103 = vector.extract_strided_slice %102 {offsets = [0, 0], sizes = [8, 384], strides = [1, 1]} : vector<8x512xf32> to vector<8x384xf32>
    %104 = arith.negf %103 : vector<8x384xf32>
    %105 = math.exp %104 : vector<8x384xf32>
    %cst_50 = arith.constant 1.000000e+00 : f32
    %106 = vector.broadcast %cst_50 : f32 to vector<8x384xf32>
    %107 = arith.addf %106, %105 : vector<8x384xf32>
    %108 = arith.divf %106, %107 : vector<8x384xf32>
    %109 = vector.extract_strided_slice %108 {offsets = [0, 0], sizes = [8, 128], strides = [1, 1]} : vector<8x384xf32> to vector<8x128xf32>
    %110 = vector.extract_strided_slice %108 {offsets = [0, 128], sizes = [8, 128], strides = [1, 1]} : vector<8x384xf32> to vector<8x128xf32>
    %111 = vector.extract_strided_slice %108 {offsets = [0, 256], sizes = [8, 128], strides = [1, 1]} : vector<8x384xf32> to vector<8x128xf32>
    %112 = vector.extract_strided_slice %102 {offsets = [0, 384], sizes = [8, 128], strides = [1, 1]} : vector<8x512xf32> to vector<8x128xf32>
    %113 = math.tanh %112 : vector<8x128xf32>
    %114 = arith.mulf %110, %90 : vector<8x128xf32>
    %115 = arith.mulf %109, %113 : vector<8x128xf32>
    %116 = arith.addf %114, %115 : vector<8x128xf32>
    %117 = math.tanh %116 : vector<8x128xf32>
    %118 = arith.mulf %111, %117 : vector<8x128xf32>
    %119 = arith.index_cast %c3_i32 : i32 to index
    %c0_51 = arith.constant 0 : index
    %c0_52 = arith.constant 0 : index
    %120 = vector.load %arg15[%119, %c0_51, %c0_52] : memref<4x8x128xf32, #tpu.memory_space<vmem>>, vector<1x8x128xf32>
    %121 = vector.shape_cast %120 : vector<1x8x128xf32> to vector<8x128xf32>
    %122 = vector.shape_cast %118 : vector<8x128xf32> to vector<1x8x128xf32>
    tpu.vector_store %arg15[%119, %c0_51, %c0_52], %122 {strides = array<i32>} : memref<4x8x128xf32, #tpu.memory_space<vmem>>, vector<1x8x128xf32>,
    %c4_i32 = arith.constant 4 : i32
    %c0_53 = arith.constant 0 : index
    %c0_54 = arith.constant 0 : index
    %123 = vector.load %arg16[%c0_53, %c0_54] : memref<8x128xf32, #tpu.memory_space<vmem>>, vector<8x128xf32>
    tpu.vector_store %arg16[%c0_53, %c0_54], %118 {strides = array<i32>} : memref<8x128xf32, #tpu.memory_space<vmem>>, vector<8x128xf32>,
    %c0_55 = arith.constant 0 : index
    %c0_56 = arith.constant 0 : index
    %124 = vector.load %arg17[%c0_55, %c0_56] : memref<8x128xf32, #tpu.memory_space<vmem>>, vector<8x128xf32>
    tpu.vector_store %arg17[%c0_55, %c0_56], %116 {strides = array<i32>} : memref<8x128xf32, #tpu.memory_space<vmem>>, vector<8x128xf32>,
    %c0_57 = arith.constant 0 : index
    %c0_58 = arith.constant 0 : index
    %125 = vector.load %arg16[%c0_57, %c0_58] : memref<8x128xf32, #tpu.memory_space<vmem>>, vector<8x128xf32>
    %c0_59 = arith.constant 0 : index
    %c0_60 = arith.constant 0 : index
    %126 = vector.load %arg12[%c0_59, %c0_60] : memref<8x128xf32, #tpu.memory_space<vmem>>, vector<8x128xf32>
    tpu.vector_store %arg12[%c0_59, %c0_60], %125 {strides = array<i32>} : memref<8x128xf32, #tpu.memory_space<vmem>>, vector<8x128xf32>,
    %c0_61 = arith.constant 0 : index
    %c0_62 = arith.constant 0 : index
    %127 = vector.load %arg17[%c0_61, %c0_62] : memref<8x128xf32, #tpu.memory_space<vmem>>, vector<8x128xf32>
    %c0_63 = arith.constant 0 : index
    %c0_64 = arith.constant 0 : index
    %128 = vector.load %arg13[%c0_63, %c0_64] : memref<8x128xf32, #tpu.memory_space<vmem>>, vector<8x128xf32>
    tpu.vector_store %arg13[%c0_63, %c0_64], %127 {strides = array<i32>} : memref<8x128xf32, #tpu.memory_space<vmem>>, vector<8x128xf32>,
    %c0_65 = arith.constant 0 : index
    %c0_66 = arith.constant 0 : index
    %c0_67 = arith.constant 0 : index
    %129 = vector.load %arg15[%c0_65, %c0_66, %c0_67] : memref<4x8x128xf32, #tpu.memory_space<vmem>>, vector<4x8x128xf32>
    %130 = vector.shape_cast %129 : vector<4x8x128xf32> to vector<32x128xf32>
    %c0_68 = arith.constant 0 : index
    %c0_69 = arith.constant 0 : index
    %131 = vector.load %arg9[%c0_68, %c0_69] : memref<128x128xf32, #tpu.memory_space<vmem>>, vector<128x128xf32>
    %cst_70 = arith.constant dense<0.000000e+00> : vector<32x128xf32>
    %132 = tpu.matmul %130, %131, %cst_70 {dimension_numbers = #tpu.dot_dimension_numbers<[1], [0], [0], [1], [0, 0, 1, 1], [], []>} : vector<32x128xf32>, vector<128x128xf32>, vector<32x128xf32> -> vector<32x128xf32>
    %c0_71 = arith.constant 0 : index
    %c0_72 = arith.constant 0 : index
    %133 = vector.load %arg10[%c0_71, %c0_72] : memref<1x128xf32, #tpu.memory_space<vmem>>, vector<1x128xf32>
    %134 = vector.broadcast %133 : vector<1x128xf32> to vector<32x128xf32>
    %135 = arith.addf %132, %134 : vector<32x128xf32>
    %c0_73 = arith.constant 0 : index
    %c0_74 = arith.constant 0 : index
    %c0_75 = arith.constant 0 : index
    %136 = vector.load %arg4[%c0_73, %c0_74, %c0_75] : memref<4x8x128xf32, #tpu.memory_space<vmem>>, vector<4x8x128xf32>
    %137 = vector.shape_cast %136 : vector<4x8x128xf32> to vector<32x128xf32>
    %138 = arith.addf %135, %137 : vector<32x128xf32>
    %139 = vector.shape_cast %138 : vector<32x128xf32> to vector<4x8x128xf32>
    %c0_76 = arith.constant 0 : index
    %c0_77 = arith.constant 0 : index
    %c0_78 = arith.constant 0 : index
    %140 = vector.load %arg11[%c0_76, %c0_77, %c0_78] : memref<4x8x128xf32, #tpu.memory_space<vmem>>, vector<4x8x128xf32>
    tpu.vector_store %arg11[%c0_76, %c0_77, %c0_78], %139 {strides = array<i32>} : memref<4x8x128xf32, #tpu.memory_space<vmem>>, vector<4x8x128xf32>,
    return
  }
  func.func @transform_0(%arg0: i32, %arg1: i32) -> (i32, i32, i32) {
    %c0_i32 = arith.constant 0 : i32
    %c0_i32_0 = arith.constant 0 : i32
    return %arg1, %arg0, %c0_i32 : i32, i32, i32
  }
  func.func @transform_1(%arg0: i32, %arg1: i32) -> (i32, i32, i32) {
    %c0_i32 = arith.constant 0 : i32
    %c0_i32_0 = arith.constant 0 : i32
    return %arg1, %arg0, %c0_i32 : i32, i32, i32
  }
  func.func @transform_2(%arg0: i32, %arg1: i32) -> (i32, i32, i32) {
    %c0_i32 = arith.constant 0 : i32
    %c0_i32_0 = arith.constant 0 : i32
    return %arg1, %arg0, %c0_i32 : i32, i32, i32
  }
  func.func @transform_3(%arg0: i32, %arg1: i32) -> (i32, i32) {
    %c0_i32 = arith.constant 0 : i32
    %c0_i32_0 = arith.constant 0 : i32
    %c0_i32_1 = arith.constant 0 : i32
    return %c0_i32, %c0_i32_0 : i32, i32
  }
  func.func @transform_4(%arg0: i32, %arg1: i32) -> (i32, i32) {
    %c0_i32 = arith.constant 0 : i32
    %c0_i32_0 = arith.constant 0 : i32
    %c0_i32_1 = arith.constant 0 : i32
    return %c0_i32, %c0_i32_0 : i32, i32
  }
  func.func @transform_5(%arg0: i32, %arg1: i32) -> (i32, i32) {
    %c0_i32 = arith.constant 0 : i32
    %c0_i32_0 = arith.constant 0 : i32
    %c0_i32_1 = arith.constant 0 : i32
    return %c0_i32, %c0_i32_0 : i32, i32
  }
  func.func @transform_6(%arg0: i32, %arg1: i32) -> (i32, i32) {
    %c0_i32 = arith.constant 0 : i32
    %c0_i32_0 = arith.constant 0 : i32
    %c0_i32_1 = arith.constant 0 : i32
    return %c0_i32, %c0_i32_0 : i32, i32
  }
  func.func @transform_7(%arg0: i32, %arg1: i32) -> (i32, i32) {
    %c0_i32 = arith.constant 0 : i32
    %c0_i32_0 = arith.constant 0 : i32
    %c0_i32_1 = arith.constant 0 : i32
    return %c0_i32, %c0_i32_0 : i32, i32
  }
  func.func @transform_8(%arg0: i32, %arg1: i32) -> (i32, i32) {
    %c0_i32 = arith.constant 0 : i32
    %c0_i32_0 = arith.constant 0 : i32
    %c0_i32_1 = arith.constant 0 : i32
    return %c0_i32, %c0_i32_0 : i32, i32
  }
  func.func @transform_9(%arg0: i32, %arg1: i32) -> (i32, i32, i32) {
    %c0_i32 = arith.constant 0 : i32
    %c0_i32_0 = arith.constant 0 : i32
    return %arg1, %arg0, %c0_i32 : i32, i32, i32
  }
  func.func @transform_10(%arg0: i32, %arg1: i32) -> (i32, i32) {
    %c0_i32 = arith.constant 0 : i32
    %c0_i32_0 = arith.constant 0 : i32
    return %arg0, %c0_i32 : i32, i32
  }
  func.func @transform_11(%arg0: i32, %arg1: i32) -> (i32, i32) {
    %c0_i32 = arith.constant 0 : i32
    %c0_i32_0 = arith.constant 0 : i32
    return %arg0, %c0_i32 : i32, i32
  }
}

</mosaic_0001>

<bundles_post_ra>
// kernel: _skip_lstm_forward.2
= control target key start
LH: loop header
LB: loop body
LE: loop exit
PB: predicated region body
PF: predicated region fallthrough
CT: control target
= control target key end

     0   :  { %s2415_s13 = smov 0   ;;  %s2417_s14 = smov 0   ;;  %s3549_s0 = inlined_call_operand.vmem [shape: f32[8,8,128], index: 0, kind: input, shape index: {}]   ;;  %s3550_s1 = inlined_call_operand.vmem [shape: f32[128,128], index: 1, kind: input, shape index: {}]   ;;  %s3551_s2 = inlined_call_operand.vmem [shape: f32[128,512], index: 2, kind: input, shape index: {}]   ;;  %s3552_s3 = inlined_call_operand.vmem [shape: f32[1,512], index: 3, kind: input, shape index: {}]   ;;  %s3553_s4 = inlined_call_operand.vmem [shape: f32[128,512], index: 4, kind: input, shape index: {}]   ;;  %s3554_s5 = inlined_call_operand.vmem [shape: f32[128,128], index: 5, kind: input, shape index: {}]   ;;  %s3555_s6 = inlined_call_operand.vmem [shape: f32[1,128], index: 6, kind: input, shape index: {}]   ;;  %s3556_s7 = inlined_call_operand.vmem [shape: f32[8,8,128], index: 7, kind: output, shape index: {0}]   ;;  %s3557_s8 = inlined_call_operand.vmem [shape: f32[8,8,128], index: 8, kind: output, shape index: {1}]   ;;  %s3558_s9 = inlined_call_operand.vmem [shape: f32[8,128], index: 9, kind: output, shape index: {2}]   ;;  %s3559_s10 = inlined_call_operand.vmem [shape: f32[8,128], index: 10, kind: output, shape index: {3}]  }
   0x1   :  { %s2419_s15 = smov 0  }
   0x2 LB: > { %s30_s16 = sadd.s32 1, %s2352_s14  ;;  %p2103_p0 = scmp.ge.s32.totalorder %s2356_s15, 1  ;;  %s2356_s15 = sphi %s2419_s15, %s21_s15   ;;  %s2352_s14 = sphi %s2417_s14, %s3666_s14   ;;  %s2348_s13 = sphi %s2415_s13, %s3665_s13  }
   0x3   : > { %p31_p1 = scmp.ge.s32.totalorder %s30_s16, 2  ;;  %p341_p2 = scmp.lt.s32.totalorder %s2356_s15, 3 }
   0x5   : > { %s3668_s16 = smov (%p31_p1, %s30_s16), 0  ;;  %p342_p3 = pnand %p2103_p0, %p341_p2 }
   0x7   : > { %345 = sbr.rel (%p342_p3) target bundleno = 1482 (0x5ca), region = 48 }
   0xc   : > { %s2104_s17 = sshll.u32 %s2348_s13, 2  ;;  %p2110_p5 = scmp.ne.s32.totalorder %s2348_s13, 0 }
   0xd   : > { %p402_p4 = scmp.lt.s32.totalorder %s2104_s17, 7 }
   0xe   : > { %439 = sbr.rel (%p2110_p5) target bundleno = 21 (0x15), region = 52 }
   0xf   : > { %s3670_s17 = smov (!%p402_p4, %s2104_s17), 7 }
  0x10   : > { %s2105_s18 = sshll.u32 %s3670_s17, 3 }
  0x11   : > { %s2436_s21 = scalar_lea.vmem %s3549_s0, %s2105_s18  ;;  %s2441_s24 = scalar_lea.vmem %s3556_s7, %s2105_s18 }
  0x12   : > { %s2446_s27 = scalar_lea.vmem %s3557_s8, %s2105_s18 }
  0x13   : > { %v2358_v0 = vmov 0.0  }
  0x14   : > { %440 = vst [vmem:[#allocation4] sm:$0xff] %v2358_v0  ;;  %441 = vst [vmem:[#allocation5] sm:$0xff] %v2358_v0 }
  0x15 PF: > { %v461_v1 = vld [vmem:[%s3550_s1 + $0x78] sm:$0xff]  ;;  %v460_v2 = vld [vmem:[%s3550_s1 + $0x70] sm:$0xff]  ;;  %v459_v3 = vld [vmem:[%s3550_s1 + $0x68] sm:$0xff] }
  0x16   : > { %2168 = vmatprep.subr.mxu0 %v461_v1  ;;  %v458_v4 = vld [vmem:[%s3550_s1 + $0x60] sm:$0xff]  ;;  %v457_v6 = vld [vmem:[%s3550_s1 + $0x58] sm:$0xff]  ;;  %v608_v7 = vld [vmem:[%s3551_s2 + $0x1e8] sm:$0xff] }
  0x17   : > { %2169 = vmatpush3.msra.mxu0 %v461_v1  ;;  %v442_v5 = vld [vmem:[%s2436_s21] sm:$0xff]  ;;  %633 = vmatprep.subr.mxu1 %v608_v7  ;;  %v456_v9 = vld [vmem:[%s3550_s1 + $0x50] sm:$0xff]  ;;  %v604_v10 = vld [vmem:[%s3551_s2 + $0x1c8] sm:$0xff] }
  0x18   : > { %2170 = vmatprep.subr.mxu0 %v460_v2  ;;  %2200 = vmatprep.mubr.f32.mxu0 %v442_v5  ;;  %v607_v8 = vld [vmem:[%s3551_s2 + $0x1e0] sm:$0xff]  ;;  %v600_v12 = vld [vmem:[%s3551_s2 + $0x1a8] sm:$0xff]  ;;  %v453_v20 = vld [vmem:[%s3550_s1 + $0x38] sm:$0xff] }
  0x19   : > { %2171 = vmatpush3.msra.mxu0 %v460_v2  ;;  %634 = vmatpush1.msra.mxu1 %v607_v8  ;;  %v603_v11 = vld [vmem:[%s3551_s2 + $0x1c0] sm:$0xff]  ;;  %v455_v13 = vld [vmem:[%s3550_s1 + $0x48] sm:$0xff]  ;;  %v452_v23 = vld [vmem:[%s3550_s1 + $0x30] sm:$0xff] }
  0x1a   : > { %2172 = vmatprep.subr.mxu0 %v459_v3  ;;  %635 = vmatprep.subr.mxu1 %v604_v10  ;;  %v599_v14 = vld [vmem:[%s3551_s2 + $0x1a0] sm:$0xff]  ;;  %v596_v15 = vld [vmem:[%s3551_s2 + $0x188] sm:$0xff]  ;;  %v449_v32 = vld [vmem:[%s3550_s1 + $0x18] sm:$0xff] }
  0x1b   : > { %2173 = vmatpush3.msra.mxu0 %v459_v3  ;;  %636 = vmatpush1.msra.mxu1 %v603_v11  ;;  %v595_v16 = vld [vmem:[%s3551_s2 + $0x180] sm:$0xff]  ;;  %v592_v18 = vld [vmem:[%s3551_s2 + $0x168] sm:$0xff]  ;;  %v448_v35 = vld [vmem:[%s3550_s1 + $0x10] sm:$0xff] }
  0x1c   : > { %2174 = vmatprep.subr.mxu0 %v458_v4  ;;  %637 = vmatprep.subr.mxu1 %v600_v12  ;;  %v454_v17 = vld [vmem:[%s3550_s1 + $0x40] sm:$0xff]  ;;  %v588_v21 = vld [vmem:[%s3551_s2 + $0x148] sm:$0xff]  ;;  %v610_v45 = vld [vmem:[%s3551_s2 + $0x1f8] sm:$0xff] }
  0x1d   : > { %2175 = vmatpush3.msra.mxu0 %v458_v4  ;;  %638 = vmatpush1.msra.mxu1 %v599_v14  ;;  %v591_v19 = vld [vmem:[%s3551_s2 + $0x160] sm:$0xff]  ;;  %v584_v24 = vld [vmem:[%s3551_s2 + $0x128] sm:$0xff]  ;;  %v444_v46 = vld [vmem:[%s2436_s21 + $0x10] sm:$0xff] }
  0x1e   : > { %2176 = vmatprep.subr.mxu0 %v457_v6  ;;  %639 = vmatprep.subr.mxu1 %v596_v15  ;;  %v587_v22 = vld [vmem:[%s3551_s2 + $0x140] sm:$0xff]  ;;  %v451_v26 = vld [vmem:[%s3550_s1 + $0x28] sm:$0xff]  ;;  %v609_v47 = vld [vmem:[%s3551_s2 + $0x1f0] sm:$0xff] }
  0x1f   : > { %2177 = vmatpush3.msra.mxu0 %v457_v6  ;;  %640 = vmatpush1.msra.mxu1 %v595_v16  ;;  %v583_v25 = vld [vmem:[%s3551_s2 + $0x120] sm:$0xff]  ;;  %v580_v27 = vld [vmem:[%s3551_s2 + $0x108] sm:$0xff]  ;;  %v606_v48 = vld [vmem:[%s3551_s2 + $0x1d8] sm:$0xff] }
  0x20   : > { %2178 = vmatprep.subr.mxu0 %v456_v9  ;;  %641 = vmatprep.subr.mxu1 %v592_v18  ;;  %v579_v28 = vld [vmem:[%s3551_s2 + $0x100] sm:$0xff]  ;;  %v576_v30 = vld [vmem:[%s3551_s2 + $0xe8] sm:$0xff]  ;;  %v605_v50 = vld [vmem:[%s3551_s2 + $0x1d0] sm:$0xff] }
  0x21   : > { %2179 = vmatpush3.msra.mxu0 %v456_v9  ;;  %642 = vmatpush1.msra.mxu1 %v591_v19  ;;  %v450_v29 = vld [vmem:[%s3550_s1 + $0x20] sm:$0xff]  ;;  %v572_v33 = vld [vmem:[%s3551_s2 + $0xc8] sm:$0xff]  ;;  %v445_v52 = vld [vmem:[%s2436_s21 + $0x18] sm:$0xff] }
  0x22   : > { %2180 = vmatprep.subr.mxu0 %v455_v13  ;;  %643 = vmatprep.subr.mxu1 %v588_v21  ;;  %v575_v31 = vld [vmem:[%s3551_s2 + $0xe0] sm:$0xff]  ;;  %v568_v36 = vld [vmem:[%s3551_s2 + $0xa8] sm:$0xff]  ;;  %v602_v53 = vld [vmem:[%s3551_s2 + $0x1b8] sm:$0xff] }
  0x23   : > { %2181 = vmatpush3.msra.mxu0 %v455_v13  ;;  %644 = vmatpush1.msra.mxu1 %v587_v22  ;;  %v571_v34 = vld [vmem:[%s3551_s2 + $0xc0] sm:$0xff]  ;;  %v447_v38 = vld [vmem:[%s3550_s1 + $0x8] sm:$0xff]  ;;  %v601_v54 = vld [vmem:[%s3551_s2 + $0x1b0] sm:$0xff] }
  0x24   : > { %2182 = vmatprep.subr.mxu0 %v454_v17  ;;  %645 = vmatprep.subr.mxu1 %v584_v24  ;;  %v567_v37 = vld [vmem:[%s3551_s2 + $0xa0] sm:$0xff]  ;;  %v564_v39 = vld [vmem:[%s3551_s2 + $0x88] sm:$0xff]  ;;  %v598_v56 = vld [vmem:[%s3551_s2 + $0x198] sm:$0xff] }
  0x25   : > { %2183 = vmatpush3.msra.mxu0 %v454_v17  ;;  %646 = vmatpush1.msra.mxu1 %v583_v25  ;;  %v563_v40 = vld [vmem:[%s3551_s2 + $0x80] sm:$0xff]  ;;  %v560_v42 = vld [vmem:[%s3551_s2 + $0x68] sm:$0xff]  ;;  %v597_v58 = vld [vmem:[%s3551_s2 + $0x190] sm:$0xff] }
  0x26   : > { %2184 = vmatprep.subr.mxu0 %v453_v20  ;;  %647 = vmatprep.subr.mxu1 %v580_v27  ;;  %v446_v41 = vld [vmem:[%s3550_s1] sm:$0xff]  ;;  %v443_v44 = vld [vmem:[%s2436_s21 + $0x8] sm:$0xff]  ;;  %v594_v59 = vld [vmem:[%s3551_s2 + $0x178] sm:$0xff] }
  0x27   : > { %2185 = vmatpush3.msra.mxu0 %v453_v20  ;;  %648 = vmatpush1.msra.mxu1 %v579_v28  ;;  %v559_v43 = vld [vmem:[%s3551_s2 + $0x60] sm:$0xff]  ;;  %v556_v49 = vld [vmem:[%s3551_s2 + $0x48] sm:$0xff]  ;;  %v593_v60 = vld [vmem:[%s3551_s2 + $0x170] sm:$0xff] }
  0x28   : > { %2186 = vmatprep.subr.mxu0 %v452_v23  ;;  %649 = vmatprep.subr.mxu1 %v576_v30  ;;  %v555_v51 = vld [vmem:[%s3551_s2 + $0x40] sm:$0xff]  ;;  %v552_v55 = vld [vmem:[%s3551_s2 + $0x28] sm:$0xff]  ;;  %v590_v61 = vld [vmem:[%s3551_s2 + $0x158] sm:$0xff] }
  0x29   : > { %2187 = vmatpush3.msra.mxu0 %v452_v23  ;;  %650 = vmatpush1.msra.mxu1 %v575_v31  ;;  %v551_v57 = vld [vmem:[%s3551_s2 + $0x20] sm:$0xff]  ;;  %v589_v62 = vld [vmem:[%s3551_s2 + $0x150] sm:$0xff]  ;;  %v586_v63 = vld [vmem:[%s3551_s2 + $0x138] sm:$0xff]  ;;  %v3560_v23 = vmov 0.0  }
  0x2a   : > { %2188 = vmatprep.subr.mxu0 %v451_v26  ;;  %651 = vmatprep.subr.mxu1 %v572_v33  ;;  %v585_v0 = vld [vmem:[%s3551_s2 + $0x130] sm:$0xff]  ;;  %v582_v1 = vld [vmem:[%s3551_s2 + $0x118] sm:$0xff]  ;;  %v548_v17 = vld [vmem:[%s3551_s2 + $0x8] sm:$0xff] }
  0x2b   : > { %2189 = vmatpush3.msra.mxu0 %v451_v26  ;;  %652 = vmatpush1.msra.mxu1 %v571_v34  ;;  %v581_v2 = vld [vmem:[%s3551_s2 + $0x110] sm:$0xff]  ;;  %v578_v3 = vld [vmem:[%s3551_s2 + $0xf8] sm:$0xff]  ;;  %v547_v19 = vld [vmem:[%s3551_s2] sm:$0xff] }
  0x2c   : > { %2190 = vmatprep.subr.mxu0 %v450_v29  ;;  %653 = vmatprep.subr.mxu1 %v568_v36  ;;  %v577_v4 = vld [vmem:[%s3551_s2 + $0xf0] sm:$0xff]  ;;  %v574_v5 = vld [vmem:[%s3551_s2 + $0xd8] sm:$0xff]  ;;  %v2695_v21 = vld [vmem:[%s3553_s4 + $0x1e8] sm:$0xff] }
  0x2d   : > { %2191 = vmatpush3.msra.mxu0 %v450_v29  ;;  %654 = vmatpush1.msra.mxu1 %v567_v37  ;;  %v573_v6 = vld [vmem:[%s3551_s2 + $0xd0] sm:$0xff]  ;;  %v570_v7 = vld [vmem:[%s3551_s2 + $0xb8] sm:$0xff]  ;;  %v2709_v25 = vld [vmem:[%s3553_s4 + $0x1e0] sm:$0xff] }
  0x2e   : > { %2192 = vmatprep.subr.mxu0 %v449_v32  ;;  %655 = vmatprep.subr.mxu1 %v564_v39  ;;  %v569_v8 = vld [vmem:[%s3551_s2 + $0xb0] sm:$0xff]  ;;  %v566_v9 = vld [vmem:[%s3551_s2 + $0x98] sm:$0xff]  ;;  %v2719_v28 = vld [vmem:[%s3553_s4 + $0x1c8] sm:$0xff] }
  0x2f   : > { %2193 = vmatpush3.msra.mxu0 %v449_v32  ;;  %656 = vmatpush1.msra.mxu1 %v563_v40  ;;  %v565_v10 = vld [vmem:[%s3551_s2 + $0x90] sm:$0xff]  ;;  %v562_v11 = vld [vmem:[%s3551_s2 + $0x78] sm:$0xff]  ;;  %v2729_v30 = vld [vmem:[%s3553_s4 + $0x1c0] sm:$0xff] }
  0x30   : > { %2194 = vmatprep.subr.mxu0 %v448_v35  ;;  %657 = vmatprep.subr.mxu1 %v560_v42  ;;  %v561_v12 = vld [vmem:[%s3551_s2 + $0x70] sm:$0xff]  ;;  %v558_v13 = vld [vmem:[%s3551_s2 + $0x58] sm:$0xff]  ;;  %v2743_v32 = vld [vmem:[%s3553_s4 + $0x1a8] sm:$0xff] }
  0x31   : > { %2195 = vmatpush3.msra.mxu0 %v448_v35  ;;  %658 = vmatpush1.msra.mxu1 %v559_v43  ;;  %v557_v14 = vld [vmem:[%s3551_s2 + $0x50] sm:$0xff]  ;;  %v554_v15 = vld [vmem:[%s3551_s2 + $0x38] sm:$0xff]  ;;  %v2757_v34 = vld [vmem:[%s3553_s4 + $0x1a0] sm:$0xff] }
  0x32   : > { %2196 = vmatprep.subr.mxu0 %v447_v38  ;;  %659 = vmatprep.subr.mxu1 %v556_v49  ;;  %v553_v16 = vld [vmem:[%s3551_s2 + $0x30] sm:$0xff]  ;;  %v550_v18 = vld [vmem:[%s3551_s2 + $0x18] sm:$0xff]  ;;  %v2769_v36 = vld [vmem:[%s3553_s4 + $0x188] sm:$0xff] }
  0x33   : > { %2197 = vmatpush3.msra.mxu0 %v447_v38  ;;  %660 = vmatpush1.msra.mxu1 %v555_v51  ;;  %v549_v20 = vld [vmem:[%s3551_s2 + $0x10] sm:$0xff]  ;;  %v2700_v22 = vld [vmem:[%s3553_s4 + $0x1f8] sm:$0xff]  ;;  %v2779_v38 = vld [vmem:[%s3553_s4 + $0x180] sm:$0xff] }
  0x34   : > { %2198 = vmatprep.subr.mxu0 %v446_v41  ;;  %661 = vmatprep.subr.mxu1 %v552_v55  ;;  %v2714_v26 = vld [vmem:[%s3553_s4 + $0x1f0] sm:$0xff]  ;;  %v2724_v29 = vld [vmem:[%s3553_s4 + $0x1d8] sm:$0xff]  ;;  %v2791_v40 = vld [vmem:[%s3553_s4 + $0x168] sm:$0xff] }
  0x35   : > { %2199 = vmatpush3.msra.mxu0 %v446_v41  ;;  %662 = vmatpush1.msra.mxu1 %v551_v57  ;;  %v2734_v31 = vld [vmem:[%s3553_s4 + $0x1d0] sm:$0xff]  ;;  %v2748_v33 = vld [vmem:[%s3553_s4 + $0x1b8] sm:$0xff]  ;;  %v2803_v42 = vld [vmem:[%s3553_s4 + $0x160] sm:$0xff] }
  0x36   : > { %2201 = vmatmul.mubr.f32.vlgmr.msra.gmra.mxu0 %v443_v44  ;;  %722 = vmatprep.subr.mxu0 %v610_v45  ;;  %v2762_v35 = vld [vmem:[%s3553_s4 + $0x1b0] sm:$0xff]  ;;  %v2774_v37 = vld [vmem:[%s3553_s4 + $0x198] sm:$0xff]  ;;  %v2815_v44 = vld [vmem:[%s3553_s4 + $0x148] sm:$0xff] }
  0x37   : > { %2203 = vmatprep.mubr.f32.mxu0 %v444_v46  ;;  %723 = vmatpush1.msra.mxu0 %v609_v47  ;;  %v2784_v39 = vld [vmem:[%s3553_s4 + $0x190] sm:$0xff]  ;;  %v2796_v41 = vld [vmem:[%s3553_s4 + $0x178] sm:$0xff]  ;;  %v2827_v46 = vld [vmem:[%s3553_s4 + $0x140] sm:$0xff] }
  0x38   : > { %724 = vmatprep.subr.mxu0 %v606_v48  ;;  %663 = vmatprep.subr.mxu1 %v548_v17  ;;  %v2808_v43 = vld [vmem:[%s3553_s4 + $0x170] sm:$0xff]  ;;  %v2820_v45 = vld [vmem:[%s3553_s4 + $0x158] sm:$0xff]  ;;  %v2839_v48 = vld [vmem:[%s3553_s4 + $0x128] sm:$0xff] }
  0x39   : > { %725 = vmatpush1.msra.mxu0 %v605_v50  ;;  %664 = vmatpush1.msra.mxu1 %v547_v19  ;;  %v2832_v47 = vld [vmem:[%s3553_s4 + $0x150] sm:$0xff]  ;;  %v2844_v49 = vld [vmem:[%s3553_s4 + $0x138] sm:$0xff]  ;;  %v2851_v51 = vld [vmem:[%s3553_s4 + $0x120] sm:$0xff] }
  0x3a   : > { %2204 = vmatmul.mubr.f32.gmra.mxu0 %v445_v52  ;;  %726 = vmatprep.subr.mxu0 %v602_v53  ;;  %v2856_v52 = vld [vmem:[%s3553_s4 + $0x130] sm:$0xff]  ;;  %v2863_v53 = vld [vmem:[%s3553_s4 + $0x108] sm:$0xff]  ;;  %v2877_v55 = vld [vmem:[%s3553_s4 + $0x100] sm:$0xff] }
  0x3b   : > { %727 = vmatpush1.msra.mxu0 %v601_v54  ;;  %697 = vmatprep.mubr.f32.mxu1 %v3560_v23  ;;  %v2868_v54 = vld [vmem:[%s3553_s4 + $0x118] sm:$0xff]  ;;  %v3028_v17 = vld [vmem:[%s3553_s4 + $0x50] sm:$0xff] }
  0x3c   : > { %728 = vmatprep.subr.mxu0 %v598_v56  ;;  %786 = vmatprep.mubr.f32.mxu0 %v3560_v23  ;;  %v2882_v56 = vld [vmem:[%s3553_s4 + $0x110] sm:$0xff]  ;;  %3604 = vst [vmem:[#allocation21_spill] sm:$0xff] %v3028_v17  ;;  %v3040_v19 = vld [vmem:[%s3553_s4 + $0x38] sm:$0xff] }
  0x3d   : > { %729 = vmatpush1.msra.mxu0 %v597_v58  ;;  %897 = vmatprep.subr.mxu1 %v2695_v21  ;;  %v2891_v58 = vld [vmem:[%s3553_s4 + $0xe8] sm:$0xff]  ;;  %3606 = vst [vmem:[#allocation23_spill] sm:$0xff] %v3040_v19 }
  0x3e   : > { %730 = vmatprep.subr.mxu0 %v594_v59  ;;  %v2896_v59 = vld [vmem:[%s3553_s4 + $0xf8] sm:$0xff] }
  0x3f   : > { %731 = vmatpush1.msra.mxu0 %v593_v60  ;;  %v2903_v60 = vld [vmem:[%s3553_s4 + $0xe0] sm:$0xff] }
  0x40   : > { %732 = vmatprep.subr.mxu0 %v590_v61  ;;  %v2908_v61 = vld [vmem:[%s3553_s4 + $0xf0] sm:$0xff] }
  0x41   : > { %733 = vmatpush1.msra.mxu0 %v589_v62  ;;  %v2913_v62 = vld [vmem:[%s3553_s4 + $0xc8] sm:$0xff] }
  0x42   : > { %734 = vmatprep.subr.mxu0 %v586_v63  ;;  %v2918_v63 = vld [vmem:[%s3553_s4 + $0xd8] sm:$0xff] }
  0x43   : > { %735 = vmatpush1.msra.mxu0 %v585_v0  ;;  %v2927_v0 = vld [vmem:[%s3553_s4 + $0xc0] sm:$0xff] }
  0x44   : > { %736 = vmatprep.subr.mxu0 %v582_v1  ;;  %v2932_v1 = vld [vmem:[%s3553_s4 + $0xd0] sm:$0xff] }
  0x45   : > { %737 = vmatpush1.msra.mxu0 %v581_v2  ;;  %v2941_v2 = vld [vmem:[%s3553_s4 + $0xa8] sm:$0xff] }
  0x46   : > { %738 = vmatprep.subr.mxu0 %v578_v3  ;;  %3589 = vst [vmem:[#allocation6_spill] sm:$0xff] %v2941_v2  ;;  %v2946_v3 = vld [vmem:[%s3553_s4 + $0xb8] sm:$0xff] }
  0x47   : > { %739 = vmatpush1.msra.mxu0 %v577_v4  ;;  %3590 = vst [vmem:[#allocation7_spill] sm:$0xff] %v2946_v3  ;;  %v2953_v4 = vld [vmem:[%s3553_s4 + $0xa0] sm:$0xff] }
  0x48   : > { %740 = vmatprep.subr.mxu0 %v574_v5  ;;  %3591 = vst [vmem:[#allocation8_spill] sm:$0xff] %v2953_v4  ;;  %v2958_v5 = vld [vmem:[%s3553_s4 + $0xb0] sm:$0xff] }
  0x49   : > { %741 = vmatpush1.msra.mxu0 %v573_v6  ;;  %3592 = vst [vmem:[#allocation9_spill] sm:$0xff] %v2958_v5  ;;  %v2963_v6 = vld [vmem:[%s3553_s4 + $0x88] sm:$0xff] }
  0x4a   : > { %742 = vmatprep.subr.mxu0 %v570_v7  ;;  %3593 = vst [vmem:[#allocation10_spill] sm:$0xff] %v2963_v6  ;;  %v2968_v7 = vld [vmem:[%s3553_s4 + $0x98] sm:$0xff] }
  0x4b   : > { %743 = vmatpush1.msra.mxu0 %v569_v8  ;;  %3594 = vst [vmem:[#allocation11_spill] sm:$0xff] %v2968_v7  ;;  %v2975_v8 = vld [vmem:[%s3553_s4 + $0x80] sm:$0xff] }
  0x4c   : > { %744 = vmatprep.subr.mxu0 %v566_v9  ;;  %3595 = vst [vmem:[#allocation12_spill] sm:$0xff] %v2975_v8  ;;  %v2980_v9 = vld [vmem:[%s3553_s4 + $0x90] sm:$0xff] }
  0x4d   : > { %745 = vmatpush1.msra.mxu0 %v565_v10  ;;  %3596 = vst [vmem:[#allocation13_spill] sm:$0xff] %v2980_v9  ;;  %v2987_v10 = vld [vmem:[%s3553_s4 + $0x68] sm:$0xff] }
  0x4e   : > { %746 = vmatprep.subr.mxu0 %v562_v11  ;;  %3597 = vst [vmem:[#allocation14_spill] sm:$0xff] %v2987_v10  ;;  %v2992_v11 = vld [vmem:[%s3553_s4 + $0x78] sm:$0xff] }
  0x4f   : > { %747 = vmatpush1.msra.mxu0 %v561_v12  ;;  %3598 = vst [vmem:[#allocation15_spill] sm:$0xff] %v2992_v11  ;;  %v2999_v12 = vld [vmem:[%s3553_s4 + $0x60] sm:$0xff] }
  0x50   : > { %748 = vmatprep.subr.mxu0 %v558_v13  ;;  %3599 = vst [vmem:[#allocation16_spill] sm:$0xff] %v2999_v12  ;;  %v3004_v13 = vld [vmem:[%s3553_s4 + $0x70] sm:$0xff] }
  0x51   : > { %749 = vmatpush1.msra.mxu0 %v557_v14  ;;  %3600 = vst [vmem:[#allocation17_spill] sm:$0xff] %v3004_v13  ;;  %v3011_v14 = vld [vmem:[%s3553_s4 + $0x48] sm:$0xff] }
  0x52   : > { %750 = vmatprep.subr.mxu0 %v554_v15  ;;  %3601 = vst [vmem:[#allocation18_spill] sm:$0xff] %v3011_v14  ;;  %v3016_v15 = vld [vmem:[%s3553_s4 + $0x58] sm:$0xff] }
  0x53   : > { %751 = vmatpush1.msra.mxu0 %v553_v16  ;;  %3602 = vst [vmem:[#allocation19_spill] sm:$0xff] %v3016_v15  ;;  %v3023_v16 = vld [vmem:[%s3553_s4 + $0x40] sm:$0xff] }
  0x54   : > { %752 = vmatprep.subr.mxu0 %v550_v18  ;;  %3603 = vst [vmem:[#allocation20_spill] sm:$0xff] %v3023_v16  ;;  %v3035_v18 = vld [vmem:[%s3553_s4 + $0x28] sm:$0xff] }
  0x55   : > { %753 = vmatpush1.msra.mxu0 %v549_v20  ;;  %3605 = vst [vmem:[#allocation22_spill] sm:$0xff] %v3035_v18  ;;  %v3047_v20 = vld [vmem:[%s3553_s4 + $0x20] sm:$0xff] }
  0x56   : > { %968 = vmatprep.subr.mxu0 %v2700_v22  ;;  %3607 = vst [vmem:[#allocation24_spill] sm:$0xff] %v3047_v20 }
  0xf6   : > { %v2202_v24 = vpop.f32.mrf.mxu0 }
  0xf8   : > { %v528_v27 = vpop.f32.mrf.mxu0 }
  0xf9   : > { %698 = vmatmul.mubr.f32.vlgmr.msra.gmra.mxu1 %v528_v27  ;;  %787 = vmatmul.mubr.f32.vlgmr.msra.gmra.mxu0 %v528_v27  ;;  %v3059_v27 = vld [vmem:[%s3553_s4 + $0x8] sm:$0xff] }
  0xfa   : > { %898 = vmatpush1.msra.mxu1 %v2709_v25  ;;  %969 = vmatpush1.msra.mxu0 %v2714_v26  ;;  %v2205_v50 = vpop.f32.mrf.mxu0  ;;  %3609 = vst [vmem:[#allocation26_spill] sm:$0xff] %v3059_v27 }
  0xfb   : > { %899 = vmatprep.subr.mxu1 %v2719_v28  ;;  %970 = vmatprep.subr.mxu0 %v2724_v29 }
  0xfc   : > { %900 = vmatpush1.msra.mxu1 %v2729_v30  ;;  %971 = vmatpush1.msra.mxu0 %v2734_v31  ;;  %v538_v57 = vpop.f32.mrf.mxu0 }
  0xfd   : > { %703 = vmatprep.mubr.f32.mxu1 %v3560_v23  ;;  %792 = vmatprep.mubr.f32.mxu0 %v3560_v23 }
  0xfe   : > { %901 = vmatprep.subr.mxu1 %v2743_v32  ;;  %972 = vmatprep.subr.mxu0 %v2748_v33 }
  0xff   : > { %704 = vmatmul.mubr.f32.gmra.mxu1 %v2202_v24  ;;  %793 = vmatmul.mubr.f32.gmra.mxu0 %v2202_v24  ;;  %v3052_v24 = vld [vmem:[%s3553_s4 + $0x30] sm:$0xff] }
 0x100   : > { %902 = vmatpush1.msra.mxu1 %v2757_v34  ;;  %973 = vmatpush1.msra.mxu0 %v2762_v35  ;;  %3608 = vst [vmem:[#allocation25_spill] sm:$0xff] %v3052_v24 }
 0x101   : > { %903 = vmatprep.subr.mxu1 %v2769_v36  ;;  %974 = vmatprep.subr.mxu0 %v2774_v37 }
 0x102   : > { %904 = vmatpush1.msra.mxu1 %v2779_v38  ;;  %975 = vmatpush1.msra.mxu0 %v2784_v39 }
 0x103   : > { %905 = vmatprep.subr.mxu1 %v2791_v40  ;;  %976 = vmatprep.subr.mxu0 %v2796_v41 }
 0x104   : > { %906 = vmatpush1.msra.mxu1 %v2803_v42  ;;  %977 = vmatpush1.msra.mxu0 %v2808_v43 }
 0x105   : > { %907 = vmatprep.subr.mxu1 %v2815_v44  ;;  %978 = vmatprep.subr.mxu0 %v2820_v45 }
 0x106   : > { %908 = vmatpush1.msra.mxu1 %v2827_v46  ;;  %979 = vmatpush1.msra.mxu0 %v2832_v47 }
 0x107   : > { %909 = vmatprep.subr.mxu1 %v2839_v48  ;;  %980 = vmatprep.subr.mxu0 %v2844_v49 }
 0x108   : > { %910 = vmatpush1.msra.mxu1 %v2851_v51  ;;  %981 = vmatpush1.msra.mxu0 %v2856_v52 }
 0x109   : > { %911 = vmatprep.subr.mxu1 %v2863_v53  ;;  %982 = vmatprep.subr.mxu0 %v2868_v54 }
 0x10a   : > { %709 = vmatprep.mubr.f32.mxu1 %v3560_v23  ;;  %798 = vmatprep.mubr.f32.mxu0 %v3560_v23 }
 0x10b   : > { %912 = vmatpush1.msra.mxu1 %v2877_v55  ;;  %983 = vmatpush1.msra.mxu0 %v2882_v56 }
 0x10c   : > { %710 = vmatmul.mubr.f32.gmra.mxu1 %v538_v57  ;;  %799 = vmatmul.mubr.f32.gmra.mxu0 %v538_v57  ;;  %v3071_v57 = vld [vmem:[%s3553_s4] sm:$0xff] }
 0x10d   : > { %913 = vmatprep.subr.mxu1 %v2891_v58  ;;  %984 = vmatprep.subr.mxu0 %v2896_v59  ;;  %3611 = vst [vmem:[#allocation28_spill] sm:$0xff] %v3071_v57 }
 0x10e   : > { %914 = vmatpush1.msra.mxu1 %v2903_v60  ;;  %985 = vmatpush1.msra.mxu0 %v2908_v61 }
 0x10f   : > { %915 = vmatprep.subr.mxu1 %v2913_v62  ;;  %986 = vmatprep.subr.mxu0 %v2918_v63 }
 0x110   : > { %715 = vmatprep.mubr.f32.mxu1 %v3560_v23  ;;  %804 = vmatprep.mubr.f32.mxu0 %v3560_v23  ;;  %v3078_v23 = vld [vmem:[%s3553_s4 + $0x10] sm:$0xff] }
 0x111   : > { %916 = vmatpush1.msra.mxu1 %v2927_v0  ;;  %987 = vmatpush1.msra.mxu0 %v2932_v1  ;;  %3612 = vst [vmem:[#allocation29_spill] sm:$0xff] %v3078_v23 }
 0x112   : > { %716 = vmatmul.mubr.f32.gmra.mxu1 %v2205_v50  ;;  %805 = vmatmul.mubr.f32.gmra.mxu0 %v2205_v50  ;;  %v3064_v50 = vld [vmem:[%s3553_s4 + $0x18] sm:$0xff] }
 0x113   : > { %917 = vmatprep.subr.mxu1 %v2941_v2  ;;  %988 = vmatprep.subr.mxu0 %v2946_v3  ;;  %3610 = vst [vmem:[#allocation27_spill] sm:$0xff] %v3064_v50 }
 0x114   : > { %918 = vmatpush1.msra.mxu1 %v2953_v4  ;;  %989 = vmatpush1.msra.mxu0 %v2958_v5 }
 0x115   : > { %919 = vmatprep.subr.mxu1 %v2963_v6  ;;  %990 = vmatprep.subr.mxu0 %v2968_v7 }
 0x116   : > { %920 = vmatpush1.msra.mxu1 %v2975_v8  ;;  %991 = vmatpush1.msra.mxu0 %v2980_v9 }
 0x117   : > { %921 = vmatprep.subr.mxu1 %v2987_v10  ;;  %992 = vmatprep.subr.mxu0 %v2992_v11 }
 0x118   : > { %922 = vmatpush1.msra.mxu1 %v2999_v12  ;;  %993 = vmatpush1.msra.mxu0 %v3004_v13 }
 0x119   : > { %923 = vmatprep.subr.mxu1 %v3011_v14  ;;  %994 = vmatprep.subr.mxu0 %v3016_v15 }
 0x11a   : > { %924 = vmatpush1.msra.mxu1 %v3023_v16  ;;  %995 = vmatpush1.msra.mxu0 %v3028_v17 }
 0x11b   : > { %925 = vmatprep.subr.mxu1 %v3035_v18  ;;  %996 = vmatprep.subr.mxu0 %v3040_v19  ;;  %v827_v18 = vld [vmem:[#allocation4] sm:$0xff]  ;;  %v3613_v19 = vmov 0.0  }
 0x11c   : > { %926 = vmatpush1.msra.mxu1 %v3047_v20  ;;  %997 = vmatpush1.msra.mxu0 %v3052_v24 }
 0x11d   : > { %927 = vmatprep.subr.mxu1 %v3059_v27  ;;  %998 = vmatprep.subr.mxu0 %v3064_v50 }
 0x11e   : > { %928 = vmatpush1.msra.mxu1 %v3071_v57  ;;  %961 = vmatprep.mubr.f32.mxu1 %v3613_v19 }
 0x11f   : > { %999 = vmatpush1.msra.mxu0 %v3078_v23  ;;  %1032 = vmatprep.mubr.f32.mxu0 %v3613_v19 }
 0x120   : > { %962 = vmatmul.mubr.f32.vlgmr.msra.gmra.mxu1 %v827_v18  ;;  %1033 = vmatmul.mubr.f32.vlgmr.msra.gmra.mxu0 %v827_v18  ;;  %v3614_v18 = vld [vmem:[#allocation22_spill] sm:$0xff] }
 0x121   : > { %1137 = vmatprep.subr.mxu1 %v2695_v21  ;;  %1208 = vmatprep.subr.mxu0 %v2700_v22 }
 0x122   : > { %1138 = vmatpush1.msra.mxu1 %v2709_v25  ;;  %1209 = vmatpush1.msra.mxu0 %v2714_v26 }
 0x123   : > { %1139 = vmatprep.subr.mxu1 %v2719_v28  ;;  %1210 = vmatprep.subr.mxu0 %v2724_v29 }
 0x124   : > { %1140 = vmatpush1.msra.mxu1 %v2729_v30  ;;  %1211 = vmatpush1.msra.mxu0 %v2734_v31 }
 0x125   : > { %1141 = vmatprep.subr.mxu1 %v2743_v32  ;;  %1212 = vmatprep.subr.mxu0 %v2748_v33 }
 0x126   : > { %1142 = vmatpush1.msra.mxu1 %v2757_v34  ;;  %1213 = vmatpush1.msra.mxu0 %v2762_v35 }
 0x127   : > { %1143 = vmatprep.subr.mxu1 %v2769_v36  ;;  %1214 = vmatprep.subr.mxu0 %v2774_v37 }
 0x128   : > { %1144 = vmatpush1.msra.mxu1 %v2779_v38  ;;  %1215 = vmatpush1.msra.mxu0 %v2784_v39 }
 0x129   : > { %1145 = vmatprep.subr.mxu1 %v2791_v40  ;;  %1216 = vmatprep.subr.mxu0 %v2796_v41 }
 0x12a   : > { %1146 = vmatpush1.msra.mxu1 %v2803_v42  ;;  %1217 = vmatpush1.msra.mxu0 %v2808_v43 }
 0x12b   : > { %1147 = vmatprep.subr.mxu1 %v2815_v44  ;;  %1218 = vmatprep.subr.mxu0 %v2820_v45 }
 0x12c   : > { %1148 = vmatpush1.msra.mxu1 %v2827_v46  ;;  %1219 = vmatpush1.msra.mxu0 %v2832_v47 }
 0x12d   : > { %1149 = vmatprep.subr.mxu1 %v2839_v48  ;;  %1220 = vmatprep.subr.mxu0 %v2844_v49 }
 0x12e   : > { %1150 = vmatpush1.msra.mxu1 %v2851_v51  ;;  %1221 = vmatpush1.msra.mxu0 %v2856_v52 }
 0x12f   : > { %1151 = vmatprep.subr.mxu1 %v2863_v53  ;;  %1222 = vmatprep.subr.mxu0 %v2868_v54 }
 0x130   : > { %1152 = vmatpush1.msra.mxu1 %v2877_v55  ;;  %1223 = vmatpush1.msra.mxu0 %v2882_v56 }
 0x131   : > { %1153 = vmatprep.subr.mxu1 %v2891_v58  ;;  %1224 = vmatprep.subr.mxu0 %v2896_v59 }
 0x132   : > { %1154 = vmatpush1.msra.mxu1 %v2903_v60  ;;  %1225 = vmatpush1.msra.mxu0 %v2908_v61 }
 0x133   : > { %1155 = vmatprep.subr.mxu1 %v2913_v62  ;;  %1226 = vmatprep.subr.mxu0 %v2918_v63 }
 0x134   : > { %1156 = vmatpush1.msra.mxu1 %v2927_v0  ;;  %1227 = vmatpush1.msra.mxu0 %v2932_v1 }
 0x135   : > { %1157 = vmatprep.subr.mxu1 %v2941_v2  ;;  %1228 = vmatprep.subr.mxu0 %v2946_v3 }
 0x136   : > { %1158 = vmatpush1.msra.mxu1 %v2953_v4  ;;  %1229 = vmatpush1.msra.mxu0 %v2958_v5 }
 0x137   : > { %1159 = vmatprep.subr.mxu1 %v2963_v6  ;;  %1230 = vmatprep.subr.mxu0 %v2968_v7 }
 0x138   : > { %1160 = vmatpush1.msra.mxu1 %v2975_v8  ;;  %1231 = vmatpush1.msra.mxu0 %v2980_v9  ;;  %v3615_v8 = vld [vmem:[#allocation23_spill] sm:$0xff] }
 0x139   : > { %1161 = vmatprep.subr.mxu1 %v2987_v10  ;;  %1232 = vmatprep.subr.mxu0 %v2992_v11 }
 0x13a   : > { %1162 = vmatpush1.msra.mxu1 %v2999_v12  ;;  %1233 = vmatpush1.msra.mxu0 %v3004_v13 }
 0x13b   : > { %1163 = vmatprep.subr.mxu1 %v3011_v14  ;;  %1234 = vmatprep.subr.mxu0 %v3016_v15 }
 0x13c   : > { %1164 = vmatpush1.msra.mxu1 %v3023_v16  ;;  %1235 = vmatpush1.msra.mxu0 %v3028_v17 }
 0x13d   : > { %1165 = vmatprep.subr.mxu1 %v3614_v18  ;;  %1236 = vmatprep.subr.mxu0 %v3615_v8  ;;  %v613_v8 = vlaneseq }
 0x13e   : > { %1166 = vmatpush1.msra.mxu1 %v3047_v20  ;;  %1237 = vmatpush1.msra.mxu0 %v3052_v24 }
 0x13f   : > { %1167 = vmatprep.subr.mxu1 %v3059_v27  ;;  %1238 = vmatprep.subr.mxu0 %v3064_v50  ;;  %v614_v20 = vshrl.u32 %v613_v8, 7 }
 0x140   : > { %1168 = vmatpush1.msra.mxu1 %v3071_v57  ;;  %1201 = vmatprep.mubr.f32.mxu1 %v3613_v19  ;;  %v611_v57 = vld [vmem:[%s3552_s3] sm:$0xf] }
 0x141   : > { %1239 = vmatpush1.msra.mxu0 %v3078_v23  ;;  %1272 = vmatprep.mubr.f32.mxu0 %v3613_v19  ;;  %v615_v17 = vsub.s32 0, %v614_v20  ;;  %v623_v27 = vsub.s32 2, %v614_v20  ;;  %v619_v15 = vsub.s32 1, %v614_v20  ;;  %v627_v23 = vsub.s32 3, %v614_v20 }
 0x142   : > { %1378 = vmatprep.subr.mxu1 %v2695_v21  ;;  %1449 = vmatprep.subr.mxu0 %v2700_v22 }
 0x143   : > { %v616_v14 = vrot.slane %v611_v57, %v615_v17  ;;  %v624_v19 = vrot.slane %v611_v57, %v623_v27  ;;  %v620_v12 = vrot.slane %v611_v57, %v619_v15  ;;  %v628_v22 = vrot.slane %v611_v57, %v627_v23 }
 0x1b9   : > { %v699_v18 = vpop.f32.mrf.mxu1  ;;  %v788_v24 = vpop.f32.mrf.mxu0 }
 0x1bb   : > { %v701_v50 = vpop.f32.mrf.mxu1  ;;  %v790_v16 = vpop.f32.mrf.mxu0 }
 0x1bf   : > { %v705_v13 = vpop.f32.mrf.mxu1  ;;  %v794_v21 = vpop.f32.mrf.mxu0 }
 0x1c0   : > { %v3157_v11 = vadd.f32 %v705_v13, %v616_v14  ;;  %v3159_v8 = vadd.f32 %v794_v21, %v624_v19 }
 0x1c1   : > { %v707_v10 = vpop.f32.mrf.mxu1  ;;  %v796_v9 = vpop.f32.mrf.mxu0 }
 0x1c2   : > { %3616 = vst [vmem:[#allocation30_spill] sm:$0xff] %v3157_v11  ;;  %3617 = vst [vmem:[#allocation31_spill] sm:$0xff] %v3159_v8  ;;  %v3161_v7 = vadd.f32 %v707_v10, %v620_v12  ;;  %v3163_v6 = vadd.f32 %v796_v9, %v628_v22  ;;  %v791_v11 = vadd.f32 %v790_v16, %v628_v22 }
 0x1c4   : > { %3618 = vst [vmem:[#allocation32_spill] sm:$0xff] %v3161_v7  ;;  %3619 = vst [vmem:[#allocation33_spill] sm:$0xff] %v3163_v6 }
 0x1cc   : > { %v711_v5 = vpop.f32.mrf.mxu1  ;;  %v800_v4 = vpop.f32.mrf.mxu0 }
 0x1cd   : > { %v3165_v3 = vadd.f32 %v711_v5, %v616_v14  ;;  %v3167_v17 = vadd.f32 %v800_v4, %v624_v19  ;;  %v700_v4 = vadd.f32 %v699_v18, %v616_v14 }
 0x1ce   : > { %v713_v20 = vpop.f32.mrf.mxu1  ;;  %v802_v27 = vpop.f32.mrf.mxu0 }
 0x1cf   : > { %3620 = vst [vmem:[#allocation34_spill] sm:$0xff] %v3165_v3  ;;  %3621 = vst [vmem:[#allocation35_spill] sm:$0xff] %v3167_v17  ;;  %v3169_v15 = vadd.f32 %v713_v20, %v620_v12  ;;  %v3171_v23 = vadd.f32 %v802_v27, %v628_v22  ;;  %v702_v3 = vadd.f32 %v701_v50, %v620_v12 }
 0x1d1   : > { %3622 = vst [vmem:[#allocation36_spill] sm:$0xff] %v3169_v15  ;;  %3623 = vst [vmem:[#allocation37_spill] sm:$0xff] %v3171_v23 }
 0x1d2   : > { %v717_v13 = vpop.f32.mrf.mxu1  ;;  %v806_v57 = vpop.f32.mrf.mxu0 }
 0x1d3   : > { %v3173_v21 = vadd.f32 %v717_v13, %v616_v14  ;;  %v3175_v10 = vadd.f32 %v806_v57, %v624_v19  ;;  %v828_v14 = vld [vmem:[#allocation5] sm:$0xff] }
 0x1d4   : > { %v719_v9 = vpop.f32.mrf.mxu1  ;;  %v808_v6 = vpop.f32.mrf.mxu0 }
 0x1d5   : > { %3624 = vst [vmem:[#allocation38_spill] sm:$0xff] %v3173_v21  ;;  %3625 = vst [vmem:[#allocation39_spill] sm:$0xff] %v3175_v10  ;;  %v3177_v8 = vadd.f32 %v719_v9, %v620_v12  ;;  %v3179_v5 = vadd.f32 %v808_v6, %v628_v22  ;;  %v789_v21 = vadd.f32 %v788_v24, %v624_v19 }
 0x1d7   : > { %3626 = vst [vmem:[#allocation40_spill] sm:$0xff] %v3177_v8  ;;  %3627 = vst [vmem:[#allocation41_spill] sm:$0xff] %v3179_v5 }
 0x1e0   : > { %v963_v17 = vpop.f32.mrf.mxu1  ;;  %v1034_v13 = vpop.f32.mrf.mxu0 }
 0x1e1   : > { %v1039_v7 = vadd.f32 %v963_v17, %v700_v4  ;;  %v1041_v57 = vadd.f32 %v1034_v13, %v789_v21 }
 0x1e2   : > { %v965_v20 = vpop.f32.mrf.mxu1  ;;  %v1036_v10 = vpop.f32.mrf.mxu0 }
 0x1e3   : > { %v2111_v15 = vmul.f32 -1.442695, %v1039_v7  ;;  %v1040_v27 = vadd.f32 %v965_v20, %v702_v3  ;;  %v2113_v2 = vmul.f32 -1.442695, %v1041_v57  ;;  %v1042_v8 = vadd.f32 %v1036_v10, %v791_v11 }
 0x1e5   : > { %2270 = vpow2.f32 %v2111_v15  ;;  %v2112_v23 = vmul.f32 -1.442695, %v1040_v27 }
 0x1e7   : > { %2272 = vpow2.f32 %v2112_v23 }
 0x1e8   : > { %2274 = vpow2.f32 %v2113_v2 }
 0x1f2   : > { %v2271_v9 = vpop.eup %2270 }
 0x1f3   : > { %v1052_v6 = vadd.f32 1.0, %v2271_v9 }
 0x1f4   : > { %v2273_v5 = vpop.eup %2272 }
 0x1f5   : > { %2276 = vrcp.f32 %v1052_v6  ;;  %v1053_v12 = vadd.f32 1.0, %v2273_v5  ;;  %v2275_v3 = vpop.eup %2274 }
 0x1f6   : > { %2278 = vtanh.f32 %v1042_v8  ;;  %v1054_v19 = vadd.f32 1.0, %v2275_v3  ;;  %v3656_v8 = vld [vmem:[#allocation33_spill] sm:$0xff] }
 0x1f7   : > { %2280 = vrcp.f32 %v1053_v12 }
 0x1f8   : > { %2282 = vrcp.f32 %v1054_v19  ;;  %v1618_v19 = vld [vmem:[%s3553_s4 + $0x1f8] sm:$0xff] }
 0x202   : > { %v2277_v7 = vpop.eup %2276 }
 0x203   : > { %v2279_v50 = vpop.eup %2278 }
 0x204   : > { %v2281_v18 = vpop.eup %2280  ;;  %v1063_v17 = vmul.f32 %v2279_v50, %v2277_v7  ;;  %v1616_v50 = vld [vmem:[%s3553_s4 + $0x1e8] sm:$0xff] }
 0x205   : > { %v1062_v24 = vmul.f32 %v2281_v18, %v828_v14  ;;  %v2283_v11 = vpop.eup %2282  ;;  %v1615_v18 = vld [vmem:[%s3553_s4 + $0x1e0] sm:$0xff] }
 0x207   : > { %v3181_v16 = vadd.f32 %v1063_v17, %v1062_v24  ;;  %v1612_v24 = vld [vmem:[%s3553_s4 + $0x1c8] sm:$0xff]  ;;  %v1617_v17 = vld [vmem:[%s3553_s4 + $0x1f0] sm:$0xff] }
 0x209   : > { %2284 = vtanh.f32 %v3181_v16 }
 0x216   : > { %v2285_v2 = vpop.eup %2284 }
 0x217   : > { %v3184_v22 = vmul.f32 %v2285_v2, %v2283_v11  ;;  %v1614_v11 = vld [vmem:[%s3553_s4 + $0x1d8] sm:$0xff]  ;;  %v1608_v2 = vld [vmem:[%s3553_s4 + $0x1a8] sm:$0xff] }
 0x219   : > { %1202 = vmatmul.mubr.f32.vlgmr.msra.gmra.mxu1 %v3184_v22  ;;  %1801 = vst [vmem:[%s2441_s24] sm:$0xff] %v3184_v22  ;;  %1273 = vmatmul.mubr.f32.vlgmr.msra.gmra.mxu0 %v3184_v22 }
 0x21a   : > { %1379 = vmatpush1.msra.mxu1 %v2709_v25  ;;  %1450 = vmatpush1.msra.mxu0 %v2714_v26  ;;  %v3628_v25 = vld [vmem:[#allocation6_spill] sm:$0xff]  ;;  %v3629_v26 = vld [vmem:[#allocation7_spill] sm:$0xff] }
 0x21b   : > { %1380 = vmatprep.subr.mxu1 %v2719_v28  ;;  %1451 = vmatprep.subr.mxu0 %v2724_v29  ;;  %v3630_v28 = vld [vmem:[#allocation8_spill] sm:$0xff]  ;;  %v3631_v29 = vld [vmem:[#allocation9_spill] sm:$0xff] }
 0x21c   : > { %1381 = vmatpush1.msra.mxu1 %v2729_v30  ;;  %1452 = vmatpush1.msra.mxu0 %v2734_v31  ;;  %v3632_v30 = vld [vmem:[#allocation10_spill] sm:$0xff]  ;;  %v3633_v31 = vld [vmem:[#allocation11_spill] sm:$0xff] }
 0x21d   : > { %1382 = vmatprep.subr.mxu1 %v2743_v32  ;;  %1453 = vmatprep.subr.mxu0 %v2748_v33  ;;  %v3634_v32 = vld [vmem:[#allocation12_spill] sm:$0xff]  ;;  %v3635_v33 = vld [vmem:[#allocation13_spill] sm:$0xff] }
 0x21e   : > { %1383 = vmatpush1.msra.mxu1 %v2757_v34  ;;  %1454 = vmatpush1.msra.mxu0 %v2762_v35  ;;  %v3636_v34 = vld [vmem:[#allocation14_spill] sm:$0xff]  ;;  %v3637_v35 = vld [vmem:[#allocation15_spill] sm:$0xff] }
 0x21f   : > { %1384 = vmatprep.subr.mxu1 %v2769_v36  ;;  %1455 = vmatprep.subr.mxu0 %v2774_v37  ;;  %v3638_v36 = vld [vmem:[#allocation16_spill] sm:$0xff]  ;;  %v3639_v37 = vld [vmem:[#allocation17_spill] sm:$0xff] }
 0x220   : > { %1385 = vmatpush1.msra.mxu1 %v2779_v38  ;;  %1456 = vmatpush1.msra.mxu0 %v2784_v39  ;;  %v3640_v38 = vld [vmem:[#allocation18_spill] sm:$0xff]  ;;  %v3641_v39 = vld [vmem:[#allocation19_spill] sm:$0xff] }
 0x221   : > { %1386 = vmatprep.subr.mxu1 %v2791_v40  ;;  %1457 = vmatprep.subr.mxu0 %v2796_v41  ;;  %v3642_v40 = vld [vmem:[#allocation20_spill] sm:$0xff]  ;;  %v3643_v41 = vld [vmem:[#allocation21_spill] sm:$0xff] }
 0x222   : > { %1387 = vmatpush1.msra.mxu1 %v2803_v42  ;;  %1458 = vmatpush1.msra.mxu0 %v2808_v43  ;;  %v3644_v42 = vld [vmem:[#allocation22_spill] sm:$0xff]  ;;  %v3645_v43 = vld [vmem:[#allocation23_spill] sm:$0xff] }
 0x223   : > { %1388 = vmatprep.subr.mxu1 %v2815_v44  ;;  %1459 = vmatprep.subr.mxu0 %v2820_v45  ;;  %v3646_v44 = vld [vmem:[#allocation24_spill] sm:$0xff]  ;;  %v3647_v45 = vld [vmem:[#allocation25_spill] sm:$0xff] }
 0x224   : > { %1389 = vmatpush1.msra.mxu1 %v2827_v46  ;;  %1460 = vmatpush1.msra.mxu0 %v2832_v47  ;;  %v3648_v46 = vld [vmem:[#allocation26_spill] sm:$0xff]  ;;  %v3649_v47 = vld [vmem:[#allocation27_spill] sm:$0xff] }
 0x225   : > { %1390 = vmatprep.subr.mxu1 %v2839_v48  ;;  %1461 = vmatprep.subr.mxu0 %v2844_v49  ;;  %v3650_v48 = vld [vmem:[#allocation28_spill] sm:$0xff]  ;;  %v3651_v49 = vmov 0.0  }
 0x226   : > { %1391 = vmatpush1.msra.mxu1 %v2851_v51  ;;  %1462 = vmatpush1.msra.mxu0 %v2856_v52  ;;  %v3652_v51 = vld [vmem:[#allocation29_spill] sm:$0xff] }
 0x227   : > { %1392 = vmatprep.subr.mxu1 %v2863_v53  ;;  %1463 = vmatprep.subr.mxu0 %v2868_v54  ;;  %v3653_v53 = vld [vmem:[#allocation30_spill] sm:$0xff] }
 0x228   : > { %1393 = vmatpush1.msra.mxu1 %v2877_v55  ;;  %1464 = vmatpush1.msra.mxu0 %v2882_v56 }
 0x229   : > { %1394 = vmatprep.subr.mxu1 %v2891_v58  ;;  %1465 = vmatprep.subr.mxu0 %v2896_v59  ;;  %v3654_v58 = vld [vmem:[#allocation32_spill] sm:$0xff] }
 0x22a   : > { %1395 = vmatpush1.msra.mxu1 %v2903_v60  ;;  %1466 = vmatpush1.msra.mxu0 %v2908_v61 }
 0x22b   : > { %1396 = vmatprep.subr.mxu1 %v2913_v62  ;;  %1467 = vmatprep.subr.mxu0 %v2918_v63  ;;  %v3655_v62 = vld [vmem:[#allocation31_spill] sm:$0xff] }
 0x22c   : > { %1397 = vmatpush1.msra.mxu1 %v2927_v0  ;;  %1468 = vmatpush1.msra.mxu0 %v2932_v1 }
 0x22d   : > { %1398 = vmatprep.subr.mxu1 %v3628_v25  ;;  %1469 = vmatprep.subr.mxu0 %v3629_v26  ;;  %v1613_v25 = vld [vmem:[%s3553_s4 + $0x1d0] sm:$0xff]  ;;  %v1607_v26 = vld [vmem:[%s3553_s4 + $0x1a0] sm:$0xff] }
 0x22e   : > { %1399 = vmatpush1.msra.mxu1 %v3630_v28  ;;  %1470 = vmatpush1.msra.mxu0 %v3631_v29  ;;  %v1610_v28 = vld [vmem:[%s3553_s4 + $0x1b8] sm:$0xff]  ;;  %v1604_v29 = vld [vmem:[%s3553_s4 + $0x188] sm:$0xff] }
 0x22f   : > { %1400 = vmatprep.subr.mxu1 %v3632_v30  ;;  %1471 = vmatprep.subr.mxu0 %v3633_v31  ;;  %v1609_v30 = vld [vmem:[%s3553_s4 + $0x1b0] sm:$0xff]  ;;  %v1603_v31 = vld [vmem:[%s3553_s4 + $0x180] sm:$0xff] }
 0x230   : > { %1401 = vmatpush1.msra.mxu1 %v3634_v32  ;;  %1472 = vmatpush1.msra.mxu0 %v3635_v33  ;;  %v1606_v32 = vld [vmem:[%s3553_s4 + $0x198] sm:$0xff]  ;;  %v1600_v33 = vld [vmem:[%s3553_s4 + $0x168] sm:$0xff] }
 0x231   : > { %1402 = vmatprep.subr.mxu1 %v3636_v34  ;;  %1473 = vmatprep.subr.mxu0 %v3637_v35  ;;  %v1605_v34 = vld [vmem:[%s3553_s4 + $0x190] sm:$0xff]  ;;  %v1599_v35 = vld [vmem:[%s3553_s4 + $0x160] sm:$0xff] }
 0x232   : > { %1403 = vmatpush1.msra.mxu1 %v3638_v36  ;;  %1474 = vmatpush1.msra.mxu0 %v3639_v37  ;;  %v1602_v36 = vld [vmem:[%s3553_s4 + $0x178] sm:$0xff]  ;;  %v1596_v37 = vld [vmem:[%s3553_s4 + $0x148] sm:$0xff] }
 0x233   : > { %1404 = vmatprep.subr.mxu1 %v3640_v38  ;;  %1475 = vmatprep.subr.mxu0 %v3641_v39  ;;  %v1601_v38 = vld [vmem:[%s3553_s4 + $0x170] sm:$0xff]  ;;  %v1595_v39 = vld [vmem:[%s3553_s4 + $0x140] sm:$0xff] }
 0x234   : > { %1405 = vmatpush1.msra.mxu1 %v3642_v40  ;;  %1476 = vmatpush1.msra.mxu0 %v3643_v41  ;;  %v1598_v40 = vld [vmem:[%s3553_s4 + $0x158] sm:$0xff]  ;;  %v1592_v41 = vld [vmem:[%s3553_s4 + $0x128] sm:$0xff] }
 0x235   : > { %1406 = vmatprep.subr.mxu1 %v3644_v42  ;;  %1477 = vmatprep.subr.mxu0 %v3645_v43  ;;  %v1597_v42 = vld [vmem:[%s3553_s4 + $0x150] sm:$0xff]  ;;  %v1591_v43 = vld [vmem:[%s3553_s4 + $0x120] sm:$0xff] }
 0x236   : > { %1407 = vmatpush1.msra.mxu1 %v3646_v44  ;;  %1478 = vmatpush1.msra.mxu0 %v3647_v45  ;;  %v1594_v44 = vld [vmem:[%s3553_s4 + $0x138] sm:$0xff]  ;;  %v1588_v45 = vld [vmem:[%s3553_s4 + $0x108] sm:$0xff] }
 0x237   : > { %1408 = vmatprep.subr.mxu1 %v3648_v46  ;;  %1479 = vmatprep.subr.mxu0 %v3649_v47  ;;  %v1593_v46 = vld [vmem:[%s3553_s4 + $0x130] sm:$0xff]  ;;  %v1587_v47 = vld [vmem:[%s3553_s4 + $0x100] sm:$0xff] }
 0x238   : > { %1409 = vmatpush1.msra.mxu1 %v3650_v48  ;;  %1442 = vmatprep.mubr.f32.mxu1 %v3651_v49  ;;  %v1590_v48 = vld [vmem:[%s3553_s4 + $0x118] sm:$0xff] }
 0x239   : > { %1480 = vmatpush1.msra.mxu0 %v3652_v51  ;;  %1513 = vmatprep.mubr.f32.mxu0 %v3651_v49  ;;  %v1589_v51 = vld [vmem:[%s3553_s4 + $0x110] sm:$0xff] }
 0x23a   : > { %1619 = vmatprep.subr.mxu1 %v1616_v50  ;;  %1690 = vmatprep.subr.mxu0 %v1618_v19  ;;  %v1555_v50 = vld [vmem:[%s3553_s4] sm:$0xff]  ;;  %v1557_v19 = vld [vmem:[%s3553_s4 + $0x10] sm:$0xff] }
 0x2d9   : > { %v1203_v52 = vpop.f32.mrf.mxu1  ;;  %v1274_v61 = vpop.f32.mrf.mxu0 }
 0x2da   : > { %v1279_v54 = vadd.f32 %v1203_v52, %v3653_v53  ;;  %v1281_v63 = vadd.f32 %v1274_v61, %v3655_v62  ;;  %v1583_v52 = vld [vmem:[%s3553_s4 + $0xe0] sm:$0xff]  ;;  %v1586_v53 = vld [vmem:[%s3553_s4 + $0xf8] sm:$0xff] }
 0x2db   : > { %v1205_v55 = vpop.f32.mrf.mxu1  ;;  %v1276_v0 = vpop.f32.mrf.mxu0  ;;  %v1575_v61 = vld [vmem:[%s3553_s4 + $0xa0] sm:$0xff]  ;;  %v1578_v62 = vld [vmem:[%s3553_s4 + $0xb8] sm:$0xff] }
 0x2dc   : > { %v2114_v56 = vmul.f32 -1.442695, %v1279_v54  ;;  %v1280_v59 = vadd.f32 %v1205_v55, %v3654_v58  ;;  %v2116_v1 = vmul.f32 -1.442695, %v1281_v63  ;;  %v1282_v15 = vadd.f32 %v1276_v0, %v3656_v8  ;;  %v1580_v54 = vld [vmem:[%s3553_s4 + $0xc8] sm:$0xff]  ;;  %v1585_v55 = vld [vmem:[%s3553_s4 + $0xf0] sm:$0xff] }
 0x2dd   : > { %v1582_v58 = vld [vmem:[%s3553_s4 + $0xd8] sm:$0xff]  ;;  %v1572_v63 = vld [vmem:[%s3553_s4 + $0x88] sm:$0xff]  ;;  %v1577_v0 = vld [vmem:[%s3553_s4 + $0xb0] sm:$0xff] }
 0x2de   : > { %2286 = vpow2.f32 %v2114_v56  ;;  %v2115_v60 = vmul.f32 -1.442695, %v1280_v59  ;;  %v1579_v56 = vld [vmem:[%s3553_s4 + $0xc0] sm:$0xff]  ;;  %v1576_v59 = vld [vmem:[%s3553_s4 + $0xa8] sm:$0xff]  ;;  %v1574_v8 = vld [vmem:[%s3553_s4 + $0x98] sm:$0xff] }
 0x2e0   : > { %2288 = vpow2.f32 %v2115_v60  ;;  %v1581_v60 = vld [vmem:[%s3553_s4 + $0xd0] sm:$0xff] }
 0x2e1   : > { %2290 = vpow2.f32 %v2116_v1  ;;  %v1571_v1 = vld [vmem:[%s3553_s4 + $0x80] sm:$0xff] }
 0x2e2   : > { %2292 = vtanh.f32 %v1282_v15  ;;  %v1568_v15 = vld [vmem:[%s3553_s4 + $0x68] sm:$0xff] }
 0x2eb   : > { %v2287_v23 = vpop.eup %2286 }
 0x2ec   : > { %v1292_v21 = vadd.f32 1.0, %v2287_v23  ;;  %v1573_v23 = vld [vmem:[%s3553_s4 + $0x90] sm:$0xff] }
 0x2ed   : > { %v2289_v10 = vpop.eup %2288 }
 0x2ee   : > { %2294 = vrcp.f32 %v1292_v21  ;;  %v1293_v5 = vadd.f32 1.0, %v2289_v10  ;;  %v2291_v4 = vpop.eup %2290  ;;  %v1567_v21 = vld [vmem:[%s3553_s4 + $0x60] sm:$0xff]  ;;  %v1570_v10 = vld [vmem:[%s3553_s4 + $0x78] sm:$0xff] }
 0x2ef   : > { %v2293_v20 = vpop.eup %2292  ;;  %v1294_v9 = vadd.f32 1.0, %v2291_v4  ;;  %v1569_v4 = vld [vmem:[%s3553_s4 + $0x70] sm:$0xff] }
 0x2f0   : > { %2296 = vrcp.f32 %v1293_v5  ;;  %v1564_v5 = vld [vmem:[%s3553_s4 + $0x48] sm:$0xff] }
 0x2f1   : > { %2298 = vrcp.f32 %v1294_v9  ;;  %v1559_v9 = vld [vmem:[%s3553_s4 + $0x20] sm:$0xff] }
 0x2fb   : > { %v2295_v27 = vpop.eup %2294 }
 0x2fc   : > { %v1303_v13 = vmul.f32 %v2295_v27, %v2293_v20  ;;  %v1563_v20 = vld [vmem:[%s3553_s4 + $0x40] sm:$0xff]  ;;  %v1566_v27 = vld [vmem:[%s3553_s4 + $0x58] sm:$0xff] }
 0x2fd   : > { %v2297_v57 = vpop.eup %2296 }
 0x2fe   : > { %v1302_v6 = vmul.f32 %v2297_v57, %v3181_v16  ;;  %v2299_v3 = vpop.eup %2298  ;;  %v1611_v16 = vld [vmem:[%s3553_s4 + $0x1c0] sm:$0xff]  ;;  %v1565_v57 = vld [vmem:[%s3553_s4 + $0x50] sm:$0xff] }
 0x300   : > { %v3259_v12 = vadd.f32 %v1303_v13, %v1302_v6  ;;  %v1560_v13 = vld [vmem:[%s3553_s4 + $0x28] sm:$0xff]  ;;  %v1562_v6 = vld [vmem:[%s3553_s4 + $0x38] sm:$0xff] }
 0x302   : > { %2300 = vtanh.f32 %v3259_v12 }
 0x30f   : > { %v2301_v7 = vpop.eup %2300 }
 0x310   : > { %v3262_v14 = vmul.f32 %v2301_v7, %v2299_v3  ;;  %v1556_v3 = vld [vmem:[%s3553_s4 + $0x8] sm:$0xff]  ;;  %v1561_v7 = vld [vmem:[%s3553_s4 + $0x30] sm:$0xff] }
 0x312   : > { %1443 = vmatmul.mubr.f32.vlgmr.msra.gmra.mxu1 %v3262_v14  ;;  %1802 = vst [vmem:[%s2441_s24 + $0x8] sm:$0xff] %v3262_v14  ;;  %1514 = vmatmul.mubr.f32.vlgmr.msra.gmra.mxu0 %v3262_v14 }
 0x313   : > { %1683 = vmatprep.mubr.f32.mxu1 %v3651_v49  ;;  %1754 = vmatprep.mubr.f32.mxu0 %v3651_v49  ;;  %v1584_v49 = vld [vmem:[%s3553_s4 + $0xe8] sm:$0xff] }
 0x314   : > { %1620 = vmatpush1.msra.mxu1 %v1615_v18  ;;  %1691 = vmatpush1.msra.mxu0 %v1617_v17  ;;  %v1558_v18 = vld [vmem:[%s3553_s4 + $0x18] sm:$0xff] }
 0x315   : > { %1621 = vmatprep.subr.mxu1 %v1612_v24  ;;  %1692 = vmatprep.subr.mxu0 %v1614_v11  ;;  %v1824_v24 = vld [vmem:[%s3554_s5 + $0x78] sm:$0xff] }
 0x316   : > { %1622 = vmatpush1.msra.mxu1 %v1611_v16  ;;  %1693 = vmatpush1.msra.mxu0 %v1613_v25  ;;  %v3657_v16 = vld [vmem:[#allocation34_spill] sm:$0xff] }
 0x317   : > { %1623 = vmatprep.subr.mxu1 %v1608_v2  ;;  %1694 = vmatprep.subr.mxu0 %v1610_v28 }
 0x318   : > { %1624 = vmatpush1.msra.mxu1 %v1607_v26  ;;  %1695 = vmatpush1.msra.mxu0 %v1609_v30  ;;  %v3658_v26 = vld [vmem:[#allocation36_spill] sm:$0xff] }
 0x319   : > { %1625 = vmatprep.subr.mxu1 %v1604_v29  ;;  %1696 = vmatprep.subr.mxu0 %v1606_v32 }
 0x31a   : > { %1626 = vmatpush1.msra.mxu1 %v1603_v31  ;;  %1697 = vmatpush1.msra.mxu0 %v1605_v34  ;;  %v3659_v31 = vld [vmem:[#allocation35_spill] sm:$0xff] }
 0x31b   : > { %1627 = vmatprep.subr.mxu1 %v1600_v33  ;;  %1698 = vmatprep.subr.mxu0 %v1602_v36 }
 0x31c   : > { %1628 = vmatpush1.msra.mxu1 %v1599_v35  ;;  %1699 = vmatpush1.msra.mxu0 %v1601_v38  ;;  %v3660_v35 = vld [vmem:[#allocation37_spill] sm:$0xff] }
 0x31d   : > { %1629 = vmatprep.subr.mxu1 %v1596_v37  ;;  %1700 = vmatprep.subr.mxu0 %v1598_v40 }
 0x31e   : > { %1630 = vmatpush1.msra.mxu1 %v1595_v39  ;;  %1701 = vmatpush1.msra.mxu0 %v1597_v42 }
 0x31f   : > { %1631 = vmatprep.subr.mxu1 %v1592_v41  ;;  %1702 = vmatprep.subr.mxu0 %v1594_v44 }
 0x320   : > { %1632 = vmatpush1.msra.mxu1 %v1591_v43  ;;  %1703 = vmatpush1.msra.mxu0 %v1593_v46 }
 0x321   : > { %1633 = vmatprep.subr.mxu1 %v1588_v45  ;;  %1704 = vmatprep.subr.mxu0 %v1590_v48 }
 0x322   : > { %1634 = vmatpush1.msra.mxu1 %v1587_v47  ;;  %1705 = vmatpush1.msra.mxu0 %v1589_v51 }
 0x323   : > { %1635 = vmatprep.subr.mxu1 %v1584_v49  ;;  %1706 = vmatprep.subr.mxu0 %v1586_v53  ;;  %v1823_v53 = vld [vmem:[%s3554_s5 + $0x70] sm:$0xff] }
 0x324   : > { %1636 = vmatpush1.msra.mxu1 %v1583_v52  ;;  %1707 = vmatpush1.msra.mxu0 %v1585_v55  ;;  %v1820_v55 = vld [vmem:[%s3554_s5 + $0x58] sm:$0xff] }
 0x325   : > { %1637 = vmatprep.subr.mxu1 %v1580_v54  ;;  %1708 = vmatprep.subr.mxu0 %v1582_v58  ;;  %v1821_v54 = vld [vmem:[%s3554_s5 + $0x60] sm:$0xff] }
 0x326   : > { %1638 = vmatpush1.msra.mxu1 %v1579_v56  ;;  %1709 = vmatpush1.msra.mxu0 %v1581_v60  ;;  %v1818_v56 = vld [vmem:[%s3554_s5 + $0x48] sm:$0xff]  ;;  %v1817_v58 = vld [vmem:[%s3554_s5 + $0x40] sm:$0xff]  ;;  %v1815_v60 = vld [vmem:[%s3554_s5 + $0x30] sm:$0xff] }
 0x327   : > { %1639 = vmatprep.subr.mxu1 %v1576_v59  ;;  %1710 = vmatprep.subr.mxu0 %v1578_v62  ;;  %v1816_v59 = vld [vmem:[%s3554_s5 + $0x38] sm:$0xff]  ;;  %v1813_v62 = vld [vmem:[%s3554_s5 + $0x20] sm:$0xff] }
 0x328   : > { %1640 = vmatpush1.msra.mxu1 %v1575_v61  ;;  %1711 = vmatpush1.msra.mxu0 %v1577_v0  ;;  %v1814_v61 = vld [vmem:[%s3554_s5 + $0x28] sm:$0xff]  ;;  %v1811_v0 = vld [vmem:[%s3554_s5 + $0x10] sm:$0xff] }
 0x329   : > { %1641 = vmatprep.subr.mxu1 %v1572_v63  ;;  %1712 = vmatprep.subr.mxu0 %v1574_v8  ;;  %v1812_v63 = vld [vmem:[%s3554_s5 + $0x18] sm:$0xff]  ;;  %v1809_v8 = vld [vmem:[%s3554_s5] sm:$0xff] }
 0x32a   : > { %1642 = vmatpush1.msra.mxu1 %v1571_v1  ;;  %1713 = vmatpush1.msra.mxu0 %v1573_v23  ;;  %v1810_v1 = vld [vmem:[%s3554_s5 + $0x8] sm:$0xff]  ;;  %v3661_v23 = vld [vmem:[#allocation38_spill] sm:$0xff] }
 0x32b   : > { %1643 = vmatprep.subr.mxu1 %v1568_v15  ;;  %1714 = vmatprep.subr.mxu0 %v1570_v10 }
 0x32c   : > { %1644 = vmatpush1.msra.mxu1 %v1567_v21  ;;  %1715 = vmatpush1.msra.mxu0 %v1569_v4  ;;  %v3662_v4 = vld [vmem:[#allocation40_spill] sm:$0xff] }
 0x32d   : > { %1645 = vmatprep.subr.mxu1 %v1564_v5  ;;  %1716 = vmatprep.subr.mxu0 %v1566_v27 }
 0x32e   : > { %1646 = vmatpush1.msra.mxu1 %v1563_v20  ;;  %1717 = vmatpush1.msra.mxu0 %v1565_v57  ;;  %v3663_v57 = vld [vmem:[#allocation39_spill] sm:$0xff] }
 0x32f   : > { %1647 = vmatprep.subr.mxu1 %v1560_v13  ;;  %1718 = vmatprep.subr.mxu0 %v1562_v6 }
 0x330   : > { %1648 = vmatpush1.msra.mxu1 %v1559_v9  ;;  %1719 = vmatpush1.msra.mxu0 %v1561_v7  ;;  %v3664_v7 = vld [vmem:[#allocation41_spill] sm:$0xff] }
 0x331   : > { %1649 = vmatprep.subr.mxu1 %v1556_v3  ;;  %1720 = vmatprep.subr.mxu0 %v1558_v18 }
 0x332   : > { %1650 = vmatpush1.msra.mxu1 %v1555_v50  ;;  %1721 = vmatpush1.msra.mxu0 %v1557_v19 }
 0x333   : > { %2206 = vmatprep.subr.mxu1 %v1824_v24 }
 0x3d2   : > { %v1444_v17 = vpop.f32.mrf.mxu1  ;;  %v1515_v30 = vpop.f32.mrf.mxu0 }
 0x3d3   : > { %v1520_v11 = vadd.f32 %v1444_v17, %v3657_v16  ;;  %v1522_v32 = vadd.f32 %v1515_v30, %v3659_v31 }
 0x3d4   : > { %v1446_v2 = vpop.f32.mrf.mxu1  ;;  %v1517_v33 = vpop.f32.mrf.mxu0 }
 0x3d5   : > { %v2117_v25 = vmul.f32 -1.442695, %v1520_v11  ;;  %v1521_v28 = vadd.f32 %v1446_v2, %v3658_v26  ;;  %v2119_v34 = vmul.f32 -1.442695, %v1522_v32  ;;  %v1523_v36 = vadd.f32 %v1517_v33, %v3660_v35  ;;  %v2123_v2 = vld [vmem:[%s3555_s6] ss:$0 sm:$0xff] }
 0x3d7   : > { %2302 = vpow2.f32 %v2117_v25  ;;  %v2118_v29 = vmul.f32 -1.442695, %v1521_v28 }
 0x3d9   : > { %2304 = vpow2.f32 %v2118_v29 }
 0x3da   : > { %2306 = vpow2.f32 %v2119_v34 }
 0x3db   : > { %2308 = vtanh.f32 %v1523_v36 }
 0x3e4   : > { %v2303_v37 = vpop.eup %2302 }
 0x3e5   : > { %v1533_v38 = vadd.f32 1.0, %v2303_v37 }
 0x3e6   : > { %v2305_v39 = vpop.eup %2304 }
 0x3e7   : > { %2310 = vrcp.f32 %v1533_v38  ;;  %v1534_v40 = vadd.f32 1.0, %v2305_v39  ;;  %v2307_v41 = vpop.eup %2306 }
 0x3e8   : > { %v2309_v42 = vpop.eup %2308  ;;  %v1535_v46 = vadd.f32 1.0, %v2307_v41 }
 0x3e9   : > { %2312 = vrcp.f32 %v1534_v40 }
 0x3ea   : > { %2314 = vrcp.f32 %v1535_v46 }
 0x3f4   : > { %v2311_v43 = vpop.eup %2310 }
 0x3f5   : > { %v1544_v44 = vmul.f32 %v2311_v43, %v2309_v42 }
 0x3f6   : > { %v2313_v45 = vpop.eup %2312 }
 0x3f7   : > { %v1543_v47 = vmul.f32 %v2313_v45, %v3259_v12  ;;  %v2315_v49 = vpop.eup %2314  ;;  %v1822_v12 = vld [vmem:[%s3554_s5 + $0x68] sm:$0xff] }
 0x3f9   : > { %v3470_v48 = vadd.f32 %v1544_v44, %v1543_v47 }
 0x3fb   : > { %2316 = vtanh.f32 %v3470_v48 }
 0x408   : > { %v2317_v51 = vpop.eup %2316 }
 0x409   : > { %v1547_v52 = vmul.f32 %v2317_v51, %v2315_v49 }
 0x40b   : > { %1684 = vmatmul.mubr.f32.vlgmr.msra.gmra.mxu1 %v1547_v52  ;;  %1803 = vst [vmem:[%s2441_s24 + $0x10] sm:$0xff] %v1547_v52  ;;  %1755 = vmatmul.mubr.f32.vlgmr.msra.gmra.mxu0 %v1547_v52 }
 0x40c   : > { %2207 = vmatpush3.msra.mxu1 %v1824_v24  ;;  %2238 = vmatprep.mubr.f32.mxu1 %v3184_v22  ;;  %v1819_v22 = vld [vmem:[%s3554_s5 + $0x50] sm:$0xff] }
 0x40d   : > { %2208 = vmatprep.subr.mxu1 %v1823_v53 }
 0x40e   : > { %2209 = vmatpush3.msra.mxu1 %v1823_v53 }
 0x40f   : > { %2210 = vmatprep.subr.mxu1 %v1822_v12 }
 0x410   : > { %2211 = vmatpush3.msra.mxu1 %v1822_v12 }
 0x411   : > { %2212 = vmatprep.subr.mxu1 %v1821_v54 }
 0x412   : > { %2213 = vmatpush3.msra.mxu1 %v1821_v54 }
 0x413   : > { %2214 = vmatprep.subr.mxu1 %v1820_v55 }
 0x414   : > { %2215 = vmatpush3.msra.mxu1 %v1820_v55 }
 0x415   : > { %2216 = vmatprep.subr.mxu1 %v1819_v22 }
 0x416   : > { %2217 = vmatpush3.msra.mxu1 %v1819_v22 }
 0x417   : > { %2218 = vmatprep.subr.mxu1 %v1818_v56 }
 0x418   : > { %2219 = vmatpush3.msra.mxu1 %v1818_v56 }
 0x419   : > { %2220 = vmatprep.subr.mxu1 %v1817_v58 }
 0x41a   : > { %2221 = vmatpush3.msra.mxu1 %v1817_v58 }
 0x41b   : > { %2222 = vmatprep.subr.mxu1 %v1816_v59 }
 0x41c   : > { %2223 = vmatpush3.msra.mxu1 %v1816_v59 }
 0x41d   : > { %2224 = vmatprep.subr.mxu1 %v1815_v60 }
 0x41e   : > { %2225 = vmatpush3.msra.mxu1 %v1815_v60 }
 0x41f   : > { %2226 = vmatprep.subr.mxu1 %v1814_v61 }
 0x420   : > { %2227 = vmatpush3.msra.mxu1 %v1814_v61 }
 0x421   : > { %2228 = vmatprep.subr.mxu1 %v1813_v62 }
 0x422   : > { %2229 = vmatpush3.msra.mxu1 %v1813_v62 }
 0x423   : > { %2230 = vmatprep.subr.mxu1 %v1812_v63 }
 0x424   : > { %2231 = vmatpush3.msra.mxu1 %v1812_v63 }
 0x425   : > { %2232 = vmatprep.subr.mxu1 %v1811_v0 }
 0x426   : > { %2233 = vmatpush3.msra.mxu1 %v1811_v0 }
 0x427   : > { %2234 = vmatprep.subr.mxu1 %v1810_v1 }
 0x428   : > { %2235 = vmatpush3.msra.mxu1 %v1810_v1 }
 0x429   : > { %2236 = vmatprep.subr.mxu1 %v1809_v8 }
 0x42a   : > { %2237 = vmatpush3.msra.mxu1 %v1809_v8 }
 0x42b   : > { %2239 = vmatmul.mubr.f32.vlgmr.msra.gmra.mxu1 %v3262_v14 }
 0x42c   : > { %2241 = vmatprep.mubr.f32.mxu1 %v1547_v52 }
 0x4cb   : > { %v1685_v15 = vpop.f32.mrf.mxu1  ;;  %v1756_v13 = vpop.f32.mrf.mxu0 }
 0x4cc   : > { %v1761_v21 = vadd.f32 %v1685_v15, %v3661_v23  ;;  %v1763_v9 = vadd.f32 %v1756_v13, %v3663_v57 }
 0x4cd   : > { %v1687_v10 = vpop.f32.mrf.mxu1  ;;  %v1758_v6 = vpop.f32.mrf.mxu0 }
 0x4ce   : > { %v2120_v5 = vmul.f32 -1.442695, %v1761_v21  ;;  %v1762_v20 = vadd.f32 %v1687_v10, %v3662_v4  ;;  %v2122_v3 = vmul.f32 -1.442695, %v1763_v9  ;;  %v1764_v50 = vadd.f32 %v1758_v6, %v3664_v7 }
 0x4d0   : > { %2318 = vpow2.f32 %v2120_v5  ;;  %v2121_v27 = vmul.f32 -1.442695, %v1762_v20 }
 0x4d2   : > { %2320 = vpow2.f32 %v2121_v27 }
 0x4d3   : > { %2322 = vpow2.f32 %v2122_v3 }
 0x4d4   : > { %2324 = vtanh.f32 %v1764_v50 }
 0x4dd   : > { %v2319_v18 = vpop.eup %2318 }
 0x4de   : > { %v1774_v14 = vadd.f32 1.0, %v2319_v18 }
 0x4df   : > { %v2321_v19 = vpop.eup %2320 }
 0x4e0   : > { %2326 = vrcp.f32 %v1774_v14  ;;  %v1775_v24 = vadd.f32 1.0, %v2321_v19  ;;  %v2323_v17 = vpop.eup %2322 }
 0x4e1   : > { %v2325_v11 = vpop.eup %2324  ;;  %v1776_v31 = vadd.f32 1.0, %v2323_v17 }
 0x4e2   : > { %2328 = vrcp.f32 %v1775_v24 }
 0x4e3   : > { %2330 = vrcp.f32 %v1776_v31 }
 0x4eb   : > { %v2240_v16 = vpop.f32.mrf.mxu1 }
 0x4ec   : > { %v1904_v32 = vadd.f32 %v2240_v16, %v2123_v2 }
 0x4ed   : > { %v2327_v25 = vpop.eup %2326  ;;  %v1898_v26 = vpop.f32.mrf.mxu1 }
 0x4ee   : > { %v1785_v28 = vmul.f32 %v2327_v25, %v2325_v11  ;;  %v1899_v29 = vadd.f32 %v2123_v2, %v1898_v26  ;;  %1918 = vst [vmem:[%s2446_s27 + $0x8] sm:$0xff] %v1904_v32 }
 0x4ef   : > { %v2329_v30 = vpop.eup %2328 }
 0x4f0   : > { %v1784_v33 = vmul.f32 %v2329_v30, %v3470_v48  ;;  %1917 = vst [vmem:[%s2446_s27] sm:$0xff] %v1899_v29  ;;  %v2331_v35 = vpop.eup %2330 }
 0x4f2   : > { %v1786_v34 = vadd.f32 %v1785_v28, %v1784_v33 }
 0x4f4   : > { %1792 = vst [vmem:[#allocation5] sm:$0xff] %v1786_v34  ;;  %1796 = vst [vmem:[%s3559_s10] sm:$0xff] %v1786_v34  ;;  %2332 = vtanh.f32 %v1786_v34 }
 0x501   : > { %v2333_v36 = vpop.eup %2332 }
 0x502   : > { %v1788_v37 = vmul.f32 %v2333_v36, %v2331_v35 }
 0x504   : > { %1791 = vst [vmem:[#allocation4] sm:$0xff] %v1788_v37  ;;  %1794 = vst [vmem:[%s3558_s9] sm:$0xff] %v1788_v37  ;;  %2242 = vmatmul.mubr.f32.gmra.mxu1 %v1788_v37 }
 0x505   : > { %1804 = vst [vmem:[%s2441_s24 + $0x18] sm:$0xff] %v1788_v37 }
 0x5c4   : > { %v2243_v38 = vpop.f32.mrf.mxu1 }
 0x5c5   : > { %v1914_v41 = vadd.f32 %v2243_v38, %v2123_v2 }
 0x5c6   : > { %v1908_v39 = vpop.f32.mrf.mxu1 }
 0x5c7   : > { %v1909_v40 = vadd.f32 %v2123_v2, %v1908_v39  ;;  %1920 = vst [vmem:[%s2446_s27 + $0x18] sm:$0xff] %v1914_v41 }
 0x5c9   : > { %1919 = vst [vmem:[%s2446_s27 + $0x10] sm:$0xff] %v1909_v40 }
 0x5ca PF: > { %s21_s15 = sadd.s32 1, %s2356_s15   ;;  %s3665_s13 = smov %s2352_s14 }
 0x5cb   : > { %p18_p6 = scmp.ge.s32.totalorder %s21_s15, 4   ;;  %s3666_s14 = smov %s3668_s16 }
 0x5cd   :  { %20 = sbr.rel (!%p18_p6) target bundleno = 2 (0x2), region = 124 }

// kernel: _skip_lstm_forward.3
= control target key start
LH: loop header
LB: loop body
LE: loop exit
PB: predicated region body
PF: predicated region fallthrough
CT: control target
= control target key end

     0   :  { %s2484_s17 = smov 0   ;;  %s2486_s18 = smov 0   ;;  %s3625_s0 = inlined_call_operand.vmem [shape: f32[8,8,128], index: 0, kind: input, shape index: {}]   ;;  %s3626_s1 = inlined_call_operand.vmem [shape: f32[8,8,128], index: 1, kind: input, shape index: {}]   ;;  %s3627_s2 = inlined_call_operand.vmem [shape: f32[8,8,128], index: 2, kind: input, shape index: {}, may-alias: {2,9}]   ;;  %s3628_s3 = inlined_call_operand.vmem [shape: f32[128,128], index: 3, kind: input, shape index: {}]   ;;  %s3629_s4 = inlined_call_operand.vmem [shape: f32[128,512], index: 4, kind: input, shape index: {}]   ;;  %s3630_s5 = inlined_call_operand.vmem [shape: f32[1,512], index: 5, kind: input, shape index: {}]   ;;  %s3631_s6 = inlined_call_operand.vmem [shape: f32[128,512], index: 6, kind: input, shape index: {}]   ;;  %s3632_s7 = inlined_call_operand.vmem [shape: f32[128,128], index: 7, kind: input, shape index: {}]   ;;  %s3633_s8 = inlined_call_operand.vmem [shape: f32[1,128], index: 8, kind: input, shape index: {}]   ;;  %s3634_s9 = inlined_call_operand.vmem [shape: f32[8,8,128], index: 9, kind: output, shape index: {0}, may-alias: {2,9}]   ;;  %s3635_s10 = inlined_call_operand.vmem [shape: f32[8,128], index: 10, kind: output, shape index: {1}]   ;;  %s3636_s11 = inlined_call_operand.vmem [shape: f32[8,128], index: 11, kind: output, shape index: {2}]  }
   0x1   :  { %s2488_s19 = smov 0  }
   0x2 LB: > { %s31_s20 = sadd.s32 1, %s2416_s18  ;;  %p2165_p0 = scmp.ge.s32.totalorder %s2420_s19, 1  ;;  %s2420_s19 = sphi %s2488_s19, %s22_s19   ;;  %s2416_s18 = sphi %s2486_s18, %s3743_s18   ;;  %s2412_s17 = sphi %s2484_s17, %s3742_s17  }
   0x3   : > { %p32_p1 = scmp.ge.s32.totalorder %s31_s20, 2  ;;  %p394_p2 = scmp.lt.s32.totalorder %s2420_s19, 3 }
   0x5   : > { %s3745_s20 = smov (%p32_p1, %s31_s20), 0  ;;  %p395_p3 = pnand %p2165_p0, %p394_p2 }
   0x7   : > { %398 = sbr.rel (%p395_p3) target bundleno = 1486 (0x5ce), region = 56 }
   0xc   : > { %s2166_s21 = sshll.u32 %s2412_s17, 2  ;;  %p2174_p5 = scmp.ne.s32.totalorder %s2412_s17, 0 }
   0xd   : > { %p465_p4 = scmp.lt.s32.totalorder %s2166_s21, 7 }
   0xe   : > { %511 = sbr.rel (%p2174_p5) target bundleno = 21 (0x15), region = 60 }
   0xf   : > { %s3747_s21 = smov (!%p465_p4, %s2166_s21), 7 }
  0x10   : > { %s2167_s22 = sshll.u32 %s3747_s21, 3 }
  0x11   : > { %s2505_s25 = scalar_lea.vmem %s3625_s0, %s2167_s22  ;;  %s2510_s28 = scalar_lea.vmem %s3626_s1, %s2167_s22 }
  0x12   : > { %s2515_s12 = scalar_lea.vmem %s3627_s2, %s2167_s22  ;;  %s2520_s15 = scalar_lea.vmem %s3634_s9, %s2167_s22 }
  0x13   : > { %v2422_v0 = vmov 0.0  }
  0x14   : > { %512 = vst [vmem:[#allocation4] sm:$0xff] %v2422_v0  ;;  %513 = vst [vmem:[#allocation5] sm:$0xff] %v2422_v0 }
  0x15 PF: > { %v533_v1 = vld [vmem:[%s3628_s3 + $0x78] sm:$0xff]  ;;  %v532_v2 = vld [vmem:[%s3628_s3 + $0x70] sm:$0xff]  ;;  %v531_v3 = vld [vmem:[%s3628_s3 + $0x68] sm:$0xff] }
  0x16   : > { %2232 = vmatprep.subr.mxu0 %v533_v1  ;;  %v530_v4 = vld [vmem:[%s3628_s3 + $0x60] sm:$0xff]  ;;  %v529_v6 = vld [vmem:[%s3628_s3 + $0x58] sm:$0xff]  ;;  %v684_v7 = vld [vmem:[%s3629_s4 + $0x1e8] sm:$0xff] }
  0x17   : > { %2233 = vmatpush3.msra.mxu0 %v533_v1  ;;  %v514_v5 = vld [vmem:[%s2505_s25] sm:$0xff]  ;;  %709 = vmatprep.subr.mxu1 %v684_v7  ;;  %v528_v9 = vld [vmem:[%s3628_s3 + $0x50] sm:$0xff]  ;;  %v680_v10 = vld [vmem:[%s3629_s4 + $0x1c8] sm:$0xff] }
  0x18   : > { %2234 = vmatprep.subr.mxu0 %v532_v2  ;;  %2264 = vmatprep.mubr.f32.mxu0 %v514_v5  ;;  %v683_v8 = vld [vmem:[%s3629_s4 + $0x1e0] sm:$0xff]  ;;  %v676_v12 = vld [vmem:[%s3629_s4 + $0x1a8] sm:$0xff]  ;;  %v525_v20 = vld [vmem:[%s3628_s3 + $0x38] sm:$0xff] }
  0x19   : > { %2235 = vmatpush3.msra.mxu0 %v532_v2  ;;  %710 = vmatpush1.msra.mxu1 %v683_v8  ;;  %v679_v11 = vld [vmem:[%s3629_s4 + $0x1c0] sm:$0xff]  ;;  %v527_v13 = vld [vmem:[%s3628_s3 + $0x48] sm:$0xff]  ;;  %v524_v23 = vld [vmem:[%s3628_s3 + $0x30] sm:$0xff] }
  0x1a   : > { %2236 = vmatprep.subr.mxu0 %v531_v3  ;;  %711 = vmatprep.subr.mxu1 %v680_v10  ;;  %v675_v14 = vld [vmem:[%s3629_s4 + $0x1a0] sm:$0xff]  ;;  %v672_v15 = vld [vmem:[%s3629_s4 + $0x188] sm:$0xff]  ;;  %v521_v32 = vld [vmem:[%s3628_s3 + $0x18] sm:$0xff] }
  0x1b   : > { %2237 = vmatpush3.msra.mxu0 %v531_v3  ;;  %712 = vmatpush1.msra.mxu1 %v679_v11  ;;  %v671_v16 = vld [vmem:[%s3629_s4 + $0x180] sm:$0xff]  ;;  %v668_v18 = vld [vmem:[%s3629_s4 + $0x168] sm:$0xff]  ;;  %v520_v35 = vld [vmem:[%s3628_s3 + $0x10] sm:$0xff] }
  0x1c   : > { %2238 = vmatprep.subr.mxu0 %v530_v4  ;;  %713 = vmatprep.subr.mxu1 %v676_v12  ;;  %v526_v17 = vld [vmem:[%s3628_s3 + $0x40] sm:$0xff]  ;;  %v664_v21 = vld [vmem:[%s3629_s4 + $0x148] sm:$0xff]  ;;  %v686_v45 = vld [vmem:[%s3629_s4 + $0x1f8] sm:$0xff] }
  0x1d   : > { %2239 = vmatpush3.msra.mxu0 %v530_v4  ;;  %714 = vmatpush1.msra.mxu1 %v675_v14  ;;  %v667_v19 = vld [vmem:[%s3629_s4 + $0x160] sm:$0xff]  ;;  %v660_v24 = vld [vmem:[%s3629_s4 + $0x128] sm:$0xff]  ;;  %v516_v46 = vld [vmem:[%s2505_s25 + $0x10] sm:$0xff] }
  0x1e   : > { %2240 = vmatprep.subr.mxu0 %v529_v6  ;;  %715 = vmatprep.subr.mxu1 %v672_v15  ;;  %v663_v22 = vld [vmem:[%s3629_s4 + $0x140] sm:$0xff]  ;;  %v523_v26 = vld [vmem:[%s3628_s3 + $0x28] sm:$0xff]  ;;  %v685_v47 = vld [vmem:[%s3629_s4 + $0x1f0] sm:$0xff] }
  0x1f   : > { %2241 = vmatpush3.msra.mxu0 %v529_v6  ;;  %716 = vmatpush1.msra.mxu1 %v671_v16  ;;  %v659_v25 = vld [vmem:[%s3629_s4 + $0x120] sm:$0xff]  ;;  %v656_v27 = vld [vmem:[%s3629_s4 + $0x108] sm:$0xff]  ;;  %v682_v48 = vld [vmem:[%s3629_s4 + $0x1d8] sm:$0xff] }
  0x20   : > { %2242 = vmatprep.subr.mxu0 %v528_v9  ;;  %717 = vmatprep.subr.mxu1 %v668_v18  ;;  %v655_v28 = vld [vmem:[%s3629_s4 + $0x100] sm:$0xff]  ;;  %v652_v30 = vld [vmem:[%s3629_s4 + $0xe8] sm:$0xff]  ;;  %v681_v50 = vld [vmem:[%s3629_s4 + $0x1d0] sm:$0xff] }
  0x21   : > { %2243 = vmatpush3.msra.mxu0 %v528_v9  ;;  %718 = vmatpush1.msra.mxu1 %v667_v19  ;;  %v522_v29 = vld [vmem:[%s3628_s3 + $0x20] sm:$0xff]  ;;  %v648_v33 = vld [vmem:[%s3629_s4 + $0xc8] sm:$0xff]  ;;  %v517_v52 = vld [vmem:[%s2505_s25 + $0x18] sm:$0xff] }
  0x22   : > { %2244 = vmatprep.subr.mxu0 %v527_v13  ;;  %719 = vmatprep.subr.mxu1 %v664_v21  ;;  %v651_v31 = vld [vmem:[%s3629_s4 + $0xe0] sm:$0xff]  ;;  %v644_v36 = vld [vmem:[%s3629_s4 + $0xa8] sm:$0xff]  ;;  %v678_v53 = vld [vmem:[%s3629_s4 + $0x1b8] sm:$0xff] }
  0x23   : > { %2245 = vmatpush3.msra.mxu0 %v527_v13  ;;  %720 = vmatpush1.msra.mxu1 %v663_v22  ;;  %v647_v34 = vld [vmem:[%s3629_s4 + $0xc0] sm:$0xff]  ;;  %v519_v38 = vld [vmem:[%s3628_s3 + $0x8] sm:$0xff]  ;;  %v677_v54 = vld [vmem:[%s3629_s4 + $0x1b0] sm:$0xff] }
  0x24   : > { %2246 = vmatprep.subr.mxu0 %v526_v17  ;;  %721 = vmatprep.subr.mxu1 %v660_v24  ;;  %v643_v37 = vld [vmem:[%s3629_s4 + $0xa0] sm:$0xff]  ;;  %v640_v39 = vld [vmem:[%s3629_s4 + $0x88] sm:$0xff]  ;;  %v674_v55 = vld [vmem:[%s3629_s4 + $0x198] sm:$0xff] }
  0x25   : > { %2247 = vmatpush3.msra.mxu0 %v526_v17  ;;  %722 = vmatpush1.msra.mxu1 %v659_v25  ;;  %v639_v40 = vld [vmem:[%s3629_s4 + $0x80] sm:$0xff]  ;;  %v636_v42 = vld [vmem:[%s3629_s4 + $0x68] sm:$0xff]  ;;  %v673_v56 = vld [vmem:[%s3629_s4 + $0x190] sm:$0xff] }
  0x26   : > { %2248 = vmatprep.subr.mxu0 %v525_v20  ;;  %723 = vmatprep.subr.mxu1 %v656_v27  ;;  %v518_v41 = vld [vmem:[%s3628_s3] sm:$0xff]  ;;  %v515_v44 = vld [vmem:[%s2505_s25 + $0x8] sm:$0xff]  ;;  %v670_v57 = vld [vmem:[%s3629_s4 + $0x178] sm:$0xff] }
  0x27   : > { %2249 = vmatpush3.msra.mxu0 %v525_v20  ;;  %724 = vmatpush1.msra.mxu1 %v655_v28  ;;  %v635_v43 = vld [vmem:[%s3629_s4 + $0x60] sm:$0xff]  ;;  %v632_v49 = vld [vmem:[%s3629_s4 + $0x48] sm:$0xff]  ;;  %v669_v58 = vld [vmem:[%s3629_s4 + $0x170] sm:$0xff] }
  0x28   : > { %2250 = vmatprep.subr.mxu0 %v524_v23  ;;  %725 = vmatprep.subr.mxu1 %v652_v30  ;;  %v631_v51 = vld [vmem:[%s3629_s4 + $0x40] sm:$0xff]  ;;  %v666_v59 = vld [vmem:[%s3629_s4 + $0x158] sm:$0xff]  ;;  %v665_v60 = vld [vmem:[%s3629_s4 + $0x150] sm:$0xff] }
  0x29   : > { %2251 = vmatpush3.msra.mxu0 %v524_v23  ;;  %726 = vmatpush1.msra.mxu1 %v651_v31  ;;  %v662_v61 = vld [vmem:[%s3629_s4 + $0x138] sm:$0xff]  ;;  %v661_v62 = vld [vmem:[%s3629_s4 + $0x130] sm:$0xff]  ;;  %v628_v13 = vld [vmem:[%s3629_s4 + $0x28] sm:$0xff]  ;;  %v3637_v23 = vmov 0.0  }
  0x2a   : > { %2252 = vmatprep.subr.mxu0 %v523_v26  ;;  %727 = vmatprep.subr.mxu1 %v648_v33  ;;  %v658_v63 = vld [vmem:[%s3629_s4 + $0x118] sm:$0xff]  ;;  %v657_v0 = vld [vmem:[%s3629_s4 + $0x110] sm:$0xff]  ;;  %v627_v15 = vld [vmem:[%s3629_s4 + $0x20] sm:$0xff] }
  0x2b   : > { %2253 = vmatpush3.msra.mxu0 %v523_v26  ;;  %728 = vmatpush1.msra.mxu1 %v647_v34  ;;  %v654_v1 = vld [vmem:[%s3629_s4 + $0xf8] sm:$0xff]  ;;  %v653_v2 = vld [vmem:[%s3629_s4 + $0xf0] sm:$0xff]  ;;  %v624_v17 = vld [vmem:[%s3629_s4 + $0x8] sm:$0xff] }
  0x2c   : > { %2254 = vmatprep.subr.mxu0 %v522_v29  ;;  %729 = vmatprep.subr.mxu1 %v644_v36  ;;  %v650_v3 = vld [vmem:[%s3629_s4 + $0xd8] sm:$0xff]  ;;  %v649_v4 = vld [vmem:[%s3629_s4 + $0xd0] sm:$0xff]  ;;  %v623_v19 = vld [vmem:[%s3629_s4] sm:$0xff] }
  0x2d   : > { %2255 = vmatpush3.msra.mxu0 %v522_v29  ;;  %730 = vmatpush1.msra.mxu1 %v643_v37  ;;  %v646_v5 = vld [vmem:[%s3629_s4 + $0xb8] sm:$0xff]  ;;  %v645_v6 = vld [vmem:[%s3629_s4 + $0xb0] sm:$0xff]  ;;  %v2769_v21 = vld [vmem:[%s3631_s6 + $0x1e8] sm:$0xff] }
  0x2e   : > { %2256 = vmatprep.subr.mxu0 %v521_v32  ;;  %731 = vmatprep.subr.mxu1 %v640_v39  ;;  %v642_v7 = vld [vmem:[%s3629_s4 + $0x98] sm:$0xff]  ;;  %v641_v8 = vld [vmem:[%s3629_s4 + $0x90] sm:$0xff]  ;;  %v534_v25 = vld [vmem:[%s2510_s28] sm:$0xff] }
  0x2f   : > { %2257 = vmatpush3.msra.mxu0 %v521_v32  ;;  %732 = vmatpush1.msra.mxu1 %v639_v40  ;;  %v638_v9 = vld [vmem:[%s3629_s4 + $0x78] sm:$0xff]  ;;  %v637_v10 = vld [vmem:[%s3629_s4 + $0x70] sm:$0xff]  ;;  %v2784_v28 = vld [vmem:[%s3631_s6 + $0x1e0] sm:$0xff] }
  0x30   : > { %2258 = vmatprep.subr.mxu0 %v520_v35  ;;  %733 = vmatprep.subr.mxu1 %v636_v42  ;;  %v634_v11 = vld [vmem:[%s3629_s4 + $0x58] sm:$0xff]  ;;  %v633_v12 = vld [vmem:[%s3629_s4 + $0x50] sm:$0xff]  ;;  %v2794_v30 = vld [vmem:[%s3631_s6 + $0x1c8] sm:$0xff] }
  0x31   : > { %2259 = vmatpush3.msra.mxu0 %v520_v35  ;;  %734 = vmatpush1.msra.mxu1 %v635_v43  ;;  %v630_v14 = vld [vmem:[%s3629_s4 + $0x38] sm:$0xff]  ;;  %v629_v16 = vld [vmem:[%s3629_s4 + $0x30] sm:$0xff]  ;;  %v2804_v32 = vld [vmem:[%s3631_s6 + $0x1c0] sm:$0xff] }
  0x32   : > { %2260 = vmatprep.subr.mxu0 %v519_v38  ;;  %735 = vmatprep.subr.mxu1 %v632_v49  ;;  %v626_v18 = vld [vmem:[%s3629_s4 + $0x18] sm:$0xff]  ;;  %v625_v20 = vld [vmem:[%s3629_s4 + $0x10] sm:$0xff]  ;;  %v535_v34 = vld [vmem:[%s2510_s28 + $0x8] sm:$0xff] }
  0x33   : > { %2261 = vmatpush3.msra.mxu0 %v519_v38  ;;  %736 = vmatpush1.msra.mxu1 %v631_v51  ;;  %v2774_v22 = vld [vmem:[%s3631_s6 + $0x1f8] sm:$0xff]  ;;  %v2789_v29 = vld [vmem:[%s3631_s6 + $0x1f0] sm:$0xff]  ;;  %v2819_v35 = vld [vmem:[%s3631_s6 + $0x1a8] sm:$0xff] }
  0x34   : > { %2262 = vmatprep.subr.mxu0 %v518_v41  ;;  %737 = vmatprep.subr.mxu1 %v628_v13  ;;  %v2799_v31 = vld [vmem:[%s3631_s6 + $0x1d8] sm:$0xff]  ;;  %v2809_v33 = vld [vmem:[%s3631_s6 + $0x1d0] sm:$0xff]  ;;  %v2833_v38 = vld [vmem:[%s3631_s6 + $0x1a0] sm:$0xff] }
  0x35   : > { %2263 = vmatpush3.msra.mxu0 %v518_v41  ;;  %738 = vmatpush1.msra.mxu1 %v627_v15  ;;  %v2824_v36 = vld [vmem:[%s3631_s6 + $0x1b8] sm:$0xff]  ;;  %v2838_v39 = vld [vmem:[%s3631_s6 + $0x1b0] sm:$0xff]  ;;  %v2845_v40 = vld [vmem:[%s3631_s6 + $0x188] sm:$0xff] }
  0x36   : > { %2265 = vmatmul.mubr.f32.vlgmr.msra.gmra.mxu0 %v515_v44  ;;  %798 = vmatprep.subr.mxu0 %v686_v45  ;;  %v2850_v41 = vld [vmem:[%s3631_s6 + $0x198] sm:$0xff]  ;;  %v2855_v42 = vld [vmem:[%s3631_s6 + $0x180] sm:$0xff]  ;;  %v2860_v43 = vld [vmem:[%s3631_s6 + $0x190] sm:$0xff] }
  0x37   : > { %2267 = vmatprep.mubr.f32.mxu0 %v516_v46  ;;  %799 = vmatpush1.msra.mxu0 %v685_v47  ;;  %v2867_v44 = vld [vmem:[%s3631_s6 + $0x168] sm:$0xff]  ;;  %v2872_v45 = vld [vmem:[%s3631_s6 + $0x178] sm:$0xff]  ;;  %v2879_v46 = vld [vmem:[%s3631_s6 + $0x160] sm:$0xff] }
  0x38   : > { %800 = vmatprep.subr.mxu0 %v682_v48  ;;  %739 = vmatprep.subr.mxu1 %v624_v17  ;;  %v2884_v47 = vld [vmem:[%s3631_s6 + $0x170] sm:$0xff]  ;;  %v2891_v49 = vld [vmem:[%s3631_s6 + $0x148] sm:$0xff]  ;;  %v2903_v51 = vld [vmem:[%s3631_s6 + $0x140] sm:$0xff] }
  0x39   : > { %801 = vmatpush1.msra.mxu0 %v681_v50  ;;  %740 = vmatpush1.msra.mxu1 %v623_v19  ;;  %v2896_v50 = vld [vmem:[%s3631_s6 + $0x158] sm:$0xff]  ;;  %v3036_v13 = vld [vmem:[%s3631_s6 + $0xb0] sm:$0xff] }
  0x3a   : > { %2268 = vmatmul.mubr.f32.gmra.mxu0 %v517_v52  ;;  %802 = vmatprep.subr.mxu0 %v678_v53  ;;  %v2908_v52 = vld [vmem:[%s3631_s6 + $0x150] sm:$0xff]  ;;  %v2915_v53 = vld [vmem:[%s3631_s6 + $0x128] sm:$0xff]  ;;  %3669 = vst [vmem:[#allocation9_spill] sm:$0xff] %v3036_v13  ;;  %v3046_v15 = vld [vmem:[%s3631_s6 + $0x98] sm:$0xff] }
  0x3b   : > { %803 = vmatpush1.msra.mxu0 %v677_v54  ;;  %773 = vmatprep.mubr.f32.mxu1 %v3637_v23  ;;  %v2920_v54 = vld [vmem:[%s3631_s6 + $0x138] sm:$0xff]  ;;  %3671 = vst [vmem:[#allocation11_spill] sm:$0xff] %v3046_v15  ;;  %v3058_v17 = vld [vmem:[%s3631_s6 + $0x90] sm:$0xff] }
  0x3c   : > { %804 = vmatprep.subr.mxu0 %v674_v55  ;;  %862 = vmatprep.mubr.f32.mxu0 %v3637_v23  ;;  %3673 = vst [vmem:[#allocation13_spill] sm:$0xff] %v3058_v17  ;;  %v3070_v19 = vld [vmem:[%s3631_s6 + $0x78] sm:$0xff] }
  0x3d   : > { %805 = vmatpush1.msra.mxu0 %v673_v56  ;;  %973 = vmatprep.subr.mxu1 %v2769_v21  ;;  %v536_v56 = vld [vmem:[%s2510_s28 + $0x10] sm:$0xff]  ;;  %3675 = vst [vmem:[#allocation15_spill] sm:$0xff] %v3070_v19 }
  0x3e   : > { %806 = vmatprep.subr.mxu0 %v670_v57  ;;  %v2928_v57 = vld [vmem:[%s3631_s6 + $0x120] sm:$0xff] }
  0x3f   : > { %807 = vmatpush1.msra.mxu0 %v669_v58  ;;  %v2933_v58 = vld [vmem:[%s3631_s6 + $0x130] sm:$0xff] }
  0x40   : > { %808 = vmatprep.subr.mxu0 %v666_v59  ;;  %v2940_v59 = vld [vmem:[%s3631_s6 + $0x108] sm:$0xff] }
  0x41   : > { %809 = vmatpush1.msra.mxu0 %v665_v60  ;;  %v2945_v60 = vld [vmem:[%s3631_s6 + $0x118] sm:$0xff] }
  0x42   : > { %810 = vmatprep.subr.mxu0 %v662_v61 }
  0x43   : > { %811 = vmatpush1.msra.mxu0 %v661_v62  ;;  %v2954_v62 = vld [vmem:[%s3631_s6 + $0x100] sm:$0xff] }
  0x44   : > { %812 = vmatprep.subr.mxu0 %v658_v63  ;;  %v2959_v63 = vld [vmem:[%s3631_s6 + $0x110] sm:$0xff] }
  0x45   : > { %813 = vmatpush1.msra.mxu0 %v657_v0  ;;  %v2968_v0 = vld [vmem:[%s3631_s6 + $0xe8] sm:$0xff] }
  0x46   : > { %814 = vmatprep.subr.mxu0 %v654_v1  ;;  %v2973_v1 = vld [vmem:[%s3631_s6 + $0xf8] sm:$0xff] }
  0x47   : > { %815 = vmatpush1.msra.mxu0 %v653_v2  ;;  %v537_v2 = vld [vmem:[%s2510_s28 + $0x18] sm:$0xff] }
  0x48   : > { %816 = vmatprep.subr.mxu0 %v650_v3  ;;  %v2981_v3 = vld [vmem:[%s3631_s6 + $0xe0] sm:$0xff] }
  0x49   : > { %817 = vmatpush1.msra.mxu0 %v649_v4  ;;  %v2986_v4 = vld [vmem:[%s3631_s6 + $0xf0] sm:$0xff] }
  0x4a   : > { %818 = vmatprep.subr.mxu0 %v646_v5  ;;  %v2991_v5 = vld [vmem:[%s3631_s6 + $0xc8] sm:$0xff] }
  0x4b   : > { %819 = vmatpush1.msra.mxu0 %v645_v6  ;;  %v2996_v6 = vld [vmem:[%s3631_s6 + $0xd8] sm:$0xff] }
  0x4c   : > { %820 = vmatprep.subr.mxu0 %v642_v7 }
  0x4d   : > { %821 = vmatpush1.msra.mxu0 %v641_v8  ;;  %v3005_v8 = vld [vmem:[%s3631_s6 + $0xc0] sm:$0xff] }
  0x4e   : > { %822 = vmatprep.subr.mxu0 %v638_v9  ;;  %v3010_v9 = vld [vmem:[%s3631_s6 + $0xd0] sm:$0xff] }
  0x4f   : > { %823 = vmatpush1.msra.mxu0 %v637_v10  ;;  %v3019_v10 = vld [vmem:[%s3631_s6 + $0xa8] sm:$0xff] }
  0x50   : > { %824 = vmatprep.subr.mxu0 %v634_v11  ;;  %3666 = vst [vmem:[#allocation6_spill] sm:$0xff] %v3019_v10  ;;  %v3024_v11 = vld [vmem:[%s3631_s6 + $0xb8] sm:$0xff] }
  0x51   : > { %825 = vmatpush1.msra.mxu0 %v633_v12  ;;  %3667 = vst [vmem:[#allocation7_spill] sm:$0xff] %v3024_v11  ;;  %v3031_v12 = vld [vmem:[%s3631_s6 + $0xa0] sm:$0xff] }
  0x52   : > { %826 = vmatprep.subr.mxu0 %v630_v14  ;;  %3668 = vst [vmem:[#allocation8_spill] sm:$0xff] %v3031_v12  ;;  %v3041_v14 = vld [vmem:[%s3631_s6 + $0x88] sm:$0xff] }
  0x53   : > { %827 = vmatpush1.msra.mxu0 %v629_v16  ;;  %3670 = vst [vmem:[#allocation10_spill] sm:$0xff] %v3041_v14  ;;  %v3053_v16 = vld [vmem:[%s3631_s6 + $0x80] sm:$0xff] }
  0x54   : > { %828 = vmatprep.subr.mxu0 %v626_v18  ;;  %3672 = vst [vmem:[#allocation12_spill] sm:$0xff] %v3053_v16  ;;  %v3065_v18 = vld [vmem:[%s3631_s6 + $0x68] sm:$0xff] }
  0x55   : > { %829 = vmatpush1.msra.mxu0 %v625_v20  ;;  %3674 = vst [vmem:[#allocation14_spill] sm:$0xff] %v3065_v18  ;;  %v3077_v20 = vld [vmem:[%s3631_s6 + $0x60] sm:$0xff] }
  0x56   : > { %1044 = vmatprep.subr.mxu0 %v2774_v22  ;;  %3676 = vst [vmem:[#allocation16_spill] sm:$0xff] %v3077_v20 }
  0xf6   : > { %v2266_v24 = vpop.f32.mrf.mxu0 }
  0xf7   : > { %v610_v37 = vadd.f32 %v2266_v24, %v535_v34  ;;  %v3082_v24 = vld [vmem:[%s3631_s6 + $0x70] sm:$0xff] }
  0xf8   : > { %v604_v26 = vpop.f32.mrf.mxu0  ;;  %3677 = vst [vmem:[#allocation17_spill] sm:$0xff] %v3082_v24  ;;  %v3106_v34 = vld [vmem:[%s3631_s6 + $0x50] sm:$0xff] }
  0xf9   : > { %v605_v27 = vadd.f32 %v604_v26, %v534_v25  ;;  %v3089_v25 = vld [vmem:[%s3631_s6 + $0x48] sm:$0xff]  ;;  %v3094_v26 = vld [vmem:[%s3631_s6 + $0x58] sm:$0xff]  ;;  %3681 = vst [vmem:[#allocation21_spill] sm:$0xff] %v3106_v34 }
  0xfa   : > { %v2269_v48 = vpop.f32.mrf.mxu0  ;;  %3678 = vst [vmem:[#allocation18_spill] sm:$0xff] %v3089_v25  ;;  %3679 = vst [vmem:[#allocation19_spill] sm:$0xff] %v3094_v26 }
  0xfb   : > { %774 = vmatmul.mubr.f32.vlgmr.msra.gmra.mxu1 %v605_v27  ;;  %863 = vmatmul.mubr.f32.vlgmr.msra.gmra.mxu0 %v605_v27  ;;  %v620_v7 = vadd.f32 %v2269_v48, %v537_v2  ;;  %v3101_v27 = vld [vmem:[%s3631_s6 + $0x40] sm:$0xff]  ;;  %v3118_v48 = vld [vmem:[%s3631_s6 + $0x38] sm:$0xff] }
  0xfc   : > { %974 = vmatpush1.msra.mxu1 %v2784_v28  ;;  %1045 = vmatpush1.msra.mxu0 %v2789_v29  ;;  %v614_v55 = vpop.f32.mrf.mxu0  ;;  %3680 = vst [vmem:[#allocation20_spill] sm:$0xff] %v3101_v27  ;;  %3683 = vst [vmem:[#allocation23_spill] sm:$0xff] %v3118_v48  ;;  %v3142_v2 = vld [vmem:[%s3631_s6 + $0x18] sm:$0xff] }
  0xfd   : > { %975 = vmatprep.subr.mxu1 %v2794_v30  ;;  %1046 = vmatprep.subr.mxu0 %v2799_v31  ;;  %v615_v61 = vadd.f32 %v614_v55, %v536_v56  ;;  %v3125_v55 = vld [vmem:[%s3631_s6 + $0x20] sm:$0xff]  ;;  %v3130_v56 = vld [vmem:[%s3631_s6 + $0x30] sm:$0xff]  ;;  %3687 = vst [vmem:[#allocation27_spill] sm:$0xff] %v3142_v2 }
  0xfe   : > { %976 = vmatpush1.msra.mxu1 %v2804_v32  ;;  %1047 = vmatpush1.msra.mxu0 %v2809_v33  ;;  %3684 = vst [vmem:[#allocation24_spill] sm:$0xff] %v3125_v55  ;;  %3685 = vst [vmem:[#allocation25_spill] sm:$0xff] %v3130_v56 }
  0xff   : > { %779 = vmatprep.mubr.f32.mxu1 %v3637_v23  ;;  %868 = vmatprep.mubr.f32.mxu0 %v3637_v23 }
 0x100   : > { %977 = vmatprep.subr.mxu1 %v2819_v35  ;;  %1048 = vmatprep.subr.mxu0 %v2824_v36 }
 0x101   : > { %780 = vmatmul.mubr.f32.gmra.mxu1 %v610_v37  ;;  %869 = vmatmul.mubr.f32.gmra.mxu0 %v610_v37  ;;  %v3113_v37 = vld [vmem:[%s3631_s6 + $0x28] sm:$0xff] }
 0x102   : > { %978 = vmatpush1.msra.mxu1 %v2833_v38  ;;  %1049 = vmatpush1.msra.mxu0 %v2838_v39  ;;  %3682 = vst [vmem:[#allocation22_spill] sm:$0xff] %v3113_v37 }
 0x103   : > { %979 = vmatprep.subr.mxu1 %v2845_v40  ;;  %1050 = vmatprep.subr.mxu0 %v2850_v41 }
 0x104   : > { %980 = vmatpush1.msra.mxu1 %v2855_v42  ;;  %1051 = vmatpush1.msra.mxu0 %v2860_v43 }
 0x105   : > { %981 = vmatprep.subr.mxu1 %v2867_v44  ;;  %1052 = vmatprep.subr.mxu0 %v2872_v45 }
 0x106   : > { %982 = vmatpush1.msra.mxu1 %v2879_v46  ;;  %1053 = vmatpush1.msra.mxu0 %v2884_v47 }
 0x107   : > { %983 = vmatprep.subr.mxu1 %v2891_v49  ;;  %1054 = vmatprep.subr.mxu0 %v2896_v50 }
 0x108   : > { %984 = vmatpush1.msra.mxu1 %v2903_v51  ;;  %1055 = vmatpush1.msra.mxu0 %v2908_v52 }
 0x109   : > { %985 = vmatprep.subr.mxu1 %v2915_v53  ;;  %1056 = vmatprep.subr.mxu0 %v2920_v54 }
 0x10a   : > { %986 = vmatpush1.msra.mxu1 %v2928_v57  ;;  %1057 = vmatpush1.msra.mxu0 %v2933_v58 }
 0x10b   : > { %987 = vmatprep.subr.mxu1 %v2940_v59  ;;  %1058 = vmatprep.subr.mxu0 %v2945_v60 }
 0x10c   : > { %785 = vmatprep.mubr.f32.mxu1 %v3637_v23  ;;  %874 = vmatprep.mubr.f32.mxu0 %v3637_v23 }
 0x10d   : > { %988 = vmatpush1.msra.mxu1 %v2954_v62  ;;  %1059 = vmatpush1.msra.mxu0 %v2959_v63 }
 0x10e   : > { %786 = vmatmul.mubr.f32.gmra.mxu1 %v615_v61  ;;  %875 = vmatmul.mubr.f32.gmra.mxu0 %v615_v61  ;;  %v3137_v61 = vld [vmem:[%s3631_s6 + $0x8] sm:$0xff] }
 0x10f   : > { %989 = vmatprep.subr.mxu1 %v2968_v0  ;;  %1060 = vmatprep.subr.mxu0 %v2973_v1  ;;  %3686 = vst [vmem:[#allocation26_spill] sm:$0xff] %v3137_v61 }
 0x110   : > { %990 = vmatpush1.msra.mxu1 %v2981_v3  ;;  %1061 = vmatpush1.msra.mxu0 %v2986_v4 }
 0x111   : > { %991 = vmatprep.subr.mxu1 %v2991_v5  ;;  %1062 = vmatprep.subr.mxu0 %v2996_v6 }
 0x112   : > { %791 = vmatprep.mubr.f32.mxu1 %v3637_v23  ;;  %880 = vmatprep.mubr.f32.mxu0 %v3637_v23  ;;  %v3156_v23 = vld [vmem:[%s3631_s6 + $0x10] sm:$0xff] }
 0x113   : > { %992 = vmatpush1.msra.mxu1 %v3005_v8  ;;  %1063 = vmatpush1.msra.mxu0 %v3010_v9  ;;  %3689 = vst [vmem:[#allocation29_spill] sm:$0xff] %v3156_v23 }
 0x114   : > { %792 = vmatmul.mubr.f32.gmra.mxu1 %v620_v7  ;;  %881 = vmatmul.mubr.f32.gmra.mxu0 %v620_v7  ;;  %v3149_v7 = vld [vmem:[%s3631_s6] sm:$0xff] }
 0x115   : > { %993 = vmatprep.subr.mxu1 %v3019_v10  ;;  %1064 = vmatprep.subr.mxu0 %v3024_v11  ;;  %3688 = vst [vmem:[#allocation28_spill] sm:$0xff] %v3149_v7 }
 0x116   : > { %994 = vmatpush1.msra.mxu1 %v3031_v12  ;;  %1065 = vmatpush1.msra.mxu0 %v3036_v13 }
 0x117   : > { %995 = vmatprep.subr.mxu1 %v3041_v14  ;;  %1066 = vmatprep.subr.mxu0 %v3046_v15 }
 0x118   : > { %996 = vmatpush1.msra.mxu1 %v3053_v16  ;;  %1067 = vmatpush1.msra.mxu0 %v3058_v17 }
 0x119   : > { %997 = vmatprep.subr.mxu1 %v3065_v18  ;;  %1068 = vmatprep.subr.mxu0 %v3070_v19 }
 0x11a   : > { %998 = vmatpush1.msra.mxu1 %v3077_v20  ;;  %1069 = vmatpush1.msra.mxu0 %v3082_v24 }
 0x11b   : > { %999 = vmatprep.subr.mxu1 %v3089_v25  ;;  %1070 = vmatprep.subr.mxu0 %v3094_v26 }
 0x11c   : > { %1000 = vmatpush1.msra.mxu1 %v3101_v27  ;;  %1071 = vmatpush1.msra.mxu0 %v3106_v34 }
 0x11d   : > { %1001 = vmatprep.subr.mxu1 %v3113_v37  ;;  %1072 = vmatprep.subr.mxu0 %v3118_v48  ;;  %v903_v37 = vld [vmem:[#allocation4] sm:$0xff]  ;;  %v3690_v48 = vmov 0.0  }
 0x11e   : > { %1002 = vmatpush1.msra.mxu1 %v3125_v55  ;;  %1073 = vmatpush1.msra.mxu0 %v3130_v56 }
 0x11f   : > { %1003 = vmatprep.subr.mxu1 %v3137_v61  ;;  %1074 = vmatprep.subr.mxu0 %v3142_v2 }
 0x120   : > { %1004 = vmatpush1.msra.mxu1 %v3149_v7  ;;  %1037 = vmatprep.mubr.f32.mxu1 %v3690_v48 }
 0x121   : > { %1075 = vmatpush1.msra.mxu0 %v3156_v23  ;;  %1108 = vmatprep.mubr.f32.mxu0 %v3690_v48 }
 0x122   : > { %1038 = vmatmul.mubr.f32.vlgmr.msra.gmra.mxu1 %v903_v37  ;;  %1109 = vmatmul.mubr.f32.vlgmr.msra.gmra.mxu0 %v903_v37  ;;  %v3691_v37 = vld [vmem:[#allocation22_spill] sm:$0xff] }
 0x123   : > { %1213 = vmatprep.subr.mxu1 %v2769_v21  ;;  %1284 = vmatprep.subr.mxu0 %v2774_v22 }
 0x124   : > { %1214 = vmatpush1.msra.mxu1 %v2784_v28  ;;  %1285 = vmatpush1.msra.mxu0 %v2789_v29 }
 0x125   : > { %1215 = vmatprep.subr.mxu1 %v2794_v30  ;;  %1286 = vmatprep.subr.mxu0 %v2799_v31 }
 0x126   : > { %1216 = vmatpush1.msra.mxu1 %v2804_v32  ;;  %1287 = vmatpush1.msra.mxu0 %v2809_v33 }
 0x127   : > { %1217 = vmatprep.subr.mxu1 %v2819_v35  ;;  %1288 = vmatprep.subr.mxu0 %v2824_v36 }
 0x128   : > { %1218 = vmatpush1.msra.mxu1 %v2833_v38  ;;  %1289 = vmatpush1.msra.mxu0 %v2838_v39 }
 0x129   : > { %1219 = vmatprep.subr.mxu1 %v2845_v40  ;;  %1290 = vmatprep.subr.mxu0 %v2850_v41 }
 0x12a   : > { %1220 = vmatpush1.msra.mxu1 %v2855_v42  ;;  %1291 = vmatpush1.msra.mxu0 %v2860_v43 }
 0x12b   : > { %1221 = vmatprep.subr.mxu1 %v2867_v44  ;;  %1292 = vmatprep.subr.mxu0 %v2872_v45 }
 0x12c   : > { %1222 = vmatpush1.msra.mxu1 %v2879_v46  ;;  %1293 = vmatpush1.msra.mxu0 %v2884_v47 }
 0x12d   : > { %1223 = vmatprep.subr.mxu1 %v2891_v49  ;;  %1294 = vmatprep.subr.mxu0 %v2896_v50 }
 0x12e   : > { %1224 = vmatpush1.msra.mxu1 %v2903_v51  ;;  %1295 = vmatpush1.msra.mxu0 %v2908_v52 }
 0x12f   : > { %1225 = vmatprep.subr.mxu1 %v2915_v53  ;;  %1296 = vmatprep.subr.mxu0 %v2920_v54 }
 0x130   : > { %1226 = vmatpush1.msra.mxu1 %v2928_v57  ;;  %1297 = vmatpush1.msra.mxu0 %v2933_v58 }
 0x131   : > { %1227 = vmatprep.subr.mxu1 %v2940_v59  ;;  %1298 = vmatprep.subr.mxu0 %v2945_v60 }
 0x132   : > { %1228 = vmatpush1.msra.mxu1 %v2954_v62  ;;  %1299 = vmatpush1.msra.mxu0 %v2959_v63 }
 0x133   : > { %1229 = vmatprep.subr.mxu1 %v2968_v0  ;;  %1300 = vmatprep.subr.mxu0 %v2973_v1 }
 0x134   : > { %1230 = vmatpush1.msra.mxu1 %v2981_v3  ;;  %1301 = vmatpush1.msra.mxu0 %v2986_v4 }
 0x135   : > { %1231 = vmatprep.subr.mxu1 %v2991_v5  ;;  %1302 = vmatprep.subr.mxu0 %v2996_v6 }
 0x136   : > { %1232 = vmatpush1.msra.mxu1 %v3005_v8  ;;  %1303 = vmatpush1.msra.mxu0 %v3010_v9 }
 0x137   : > { %1233 = vmatprep.subr.mxu1 %v3019_v10  ;;  %1304 = vmatprep.subr.mxu0 %v3024_v11 }
 0x138   : > { %1234 = vmatpush1.msra.mxu1 %v3031_v12  ;;  %1305 = vmatpush1.msra.mxu0 %v3036_v13 }
 0x139   : > { %1235 = vmatprep.subr.mxu1 %v3041_v14  ;;  %1306 = vmatprep.subr.mxu0 %v3046_v15 }
 0x13a   : > { %1236 = vmatpush1.msra.mxu1 %v3053_v16  ;;  %1307 = vmatpush1.msra.mxu0 %v3058_v17  ;;  %v3692_v16 = vld [vmem:[#allocation23_spill] sm:$0xff] }
 0x13b   : > { %1237 = vmatprep.subr.mxu1 %v3065_v18  ;;  %1308 = vmatprep.subr.mxu0 %v3070_v19 }
 0x13c   : > { %1238 = vmatpush1.msra.mxu1 %v3077_v20  ;;  %1309 = vmatpush1.msra.mxu0 %v3082_v24 }
 0x13d   : > { %1239 = vmatprep.subr.mxu1 %v3089_v25  ;;  %1310 = vmatprep.subr.mxu0 %v3094_v26 }
 0x13e   : > { %1240 = vmatpush1.msra.mxu1 %v3101_v27  ;;  %1311 = vmatpush1.msra.mxu0 %v3106_v34 }
 0x13f   : > { %1241 = vmatprep.subr.mxu1 %v3691_v37  ;;  %1312 = vmatprep.subr.mxu0 %v3692_v16  ;;  %v689_v16 = vlaneseq }
 0x140   : > { %1242 = vmatpush1.msra.mxu1 %v3125_v55  ;;  %1313 = vmatpush1.msra.mxu0 %v3130_v56 }
 0x141   : > { %1243 = vmatprep.subr.mxu1 %v3137_v61  ;;  %1314 = vmatprep.subr.mxu0 %v3142_v2  ;;  %v690_v55 = vshrl.u32 %v689_v16, 7 }
 0x142   : > { %1244 = vmatpush1.msra.mxu1 %v3149_v7  ;;  %1277 = vmatprep.mubr.f32.mxu1 %v3690_v48  ;;  %v687_v7 = vld [vmem:[%s3630_s5] sm:$0xf] }
 0x143   : > { %1315 = vmatpush1.msra.mxu0 %v3156_v23  ;;  %1348 = vmatprep.mubr.f32.mxu0 %v3690_v48  ;;  %v691_v34 = vsub.s32 0, %v690_v55  ;;  %v699_v61 = vsub.s32 2, %v690_v55  ;;  %v695_v26 = vsub.s32 1, %v690_v55  ;;  %v703_v23 = vsub.s32 3, %v690_v55 }
 0x144   : > { %1454 = vmatprep.subr.mxu1 %v2769_v21  ;;  %1525 = vmatprep.subr.mxu0 %v2774_v22 }
 0x145   : > { %v692_v25 = vrot.slane %v687_v7, %v691_v34  ;;  %v700_v48 = vrot.slane %v687_v7, %v699_v61  ;;  %v696_v20 = vrot.slane %v687_v7, %v695_v26  ;;  %v704_v22 = vrot.slane %v687_v7, %v703_v23 }
 0x1bb   : > { %v775_v37 = vpop.f32.mrf.mxu1  ;;  %v864_v56 = vpop.f32.mrf.mxu0 }
 0x1bd   : > { %v777_v2 = vpop.f32.mrf.mxu1  ;;  %v866_v27 = vpop.f32.mrf.mxu0 }
 0x1c1   : > { %v781_v24 = vpop.f32.mrf.mxu1  ;;  %v870_v21 = vpop.f32.mrf.mxu0 }
 0x1c2   : > { %v3235_v19 = vadd.f32 %v781_v24, %v692_v25  ;;  %v3237_v16 = vadd.f32 %v870_v21, %v700_v48 }
 0x1c3   : > { %v783_v18 = vpop.f32.mrf.mxu1  ;;  %v872_v17 = vpop.f32.mrf.mxu0 }
 0x1c4   : > { %3693 = vst [vmem:[#allocation30_spill] sm:$0xff] %v3235_v19  ;;  %3694 = vst [vmem:[#allocation31_spill] sm:$0xff] %v3237_v16  ;;  %v3239_v15 = vadd.f32 %v783_v18, %v696_v20  ;;  %v3241_v14 = vadd.f32 %v872_v17, %v704_v22  ;;  %v867_v19 = vadd.f32 %v866_v27, %v704_v22 }
 0x1c6   : > { %3695 = vst [vmem:[#allocation32_spill] sm:$0xff] %v3239_v15  ;;  %3696 = vst [vmem:[#allocation33_spill] sm:$0xff] %v3241_v14 }
 0x1ce   : > { %v787_v13 = vpop.f32.mrf.mxu1  ;;  %v876_v12 = vpop.f32.mrf.mxu0 }
 0x1cf   : > { %v3243_v11 = vadd.f32 %v787_v13, %v692_v25  ;;  %v3245_v34 = vadd.f32 %v876_v12, %v700_v48  ;;  %v776_v12 = vadd.f32 %v775_v37, %v692_v25 }
 0x1d0   : > { %v789_v55 = vpop.f32.mrf.mxu1  ;;  %v878_v61 = vpop.f32.mrf.mxu0 }
 0x1d1   : > { %3697 = vst [vmem:[#allocation34_spill] sm:$0xff] %v3243_v11  ;;  %3698 = vst [vmem:[#allocation35_spill] sm:$0xff] %v3245_v34  ;;  %v3247_v26 = vadd.f32 %v789_v55, %v696_v20  ;;  %v3249_v23 = vadd.f32 %v878_v61, %v704_v22  ;;  %v778_v11 = vadd.f32 %v777_v2, %v696_v20 }
 0x1d3   : > { %3699 = vst [vmem:[#allocation36_spill] sm:$0xff] %v3247_v26  ;;  %3700 = vst [vmem:[#allocation37_spill] sm:$0xff] %v3249_v23 }
 0x1d4   : > { %v793_v24 = vpop.f32.mrf.mxu1  ;;  %v882_v7 = vpop.f32.mrf.mxu0 }
 0x1d5   : > { %v3251_v21 = vadd.f32 %v793_v24, %v692_v25  ;;  %v3253_v18 = vadd.f32 %v882_v7, %v700_v48  ;;  %v904_v25 = vld [vmem:[#allocation5] sm:$0xff] }
 0x1d6   : > { %v795_v17 = vpop.f32.mrf.mxu1  ;;  %v884_v14 = vpop.f32.mrf.mxu0 }
 0x1d7   : > { %3701 = vst [vmem:[#allocation38_spill] sm:$0xff] %v3251_v21  ;;  %3702 = vst [vmem:[#allocation39_spill] sm:$0xff] %v3253_v18  ;;  %v3255_v16 = vadd.f32 %v795_v17, %v696_v20  ;;  %v3257_v13 = vadd.f32 %v884_v14, %v704_v22  ;;  %v865_v21 = vadd.f32 %v864_v56, %v700_v48  ;;  %v3733_v22 = vld [vmem:[#allocation33_spill] sm:$0xff] }
 0x1d9   : > { %3703 = vst [vmem:[#allocation40_spill] sm:$0xff] %v3255_v16  ;;  %3704 = vst [vmem:[#allocation41_spill] sm:$0xff] %v3257_v13 }
 0x1e2   : > { %v1039_v34 = vpop.f32.mrf.mxu1  ;;  %v1110_v24 = vpop.f32.mrf.mxu0 }
 0x1e3   : > { %v1115_v15 = vadd.f32 %v1039_v34, %v776_v12  ;;  %v1117_v7 = vadd.f32 %v1110_v24, %v865_v21 }
 0x1e4   : > { %v1041_v55 = vpop.f32.mrf.mxu1  ;;  %v1112_v18 = vpop.f32.mrf.mxu0 }
 0x1e5   : > { %v2175_v26 = vmul.f32 -1.442695, %v1115_v15  ;;  %v1116_v61 = vadd.f32 %v1041_v55, %v778_v11  ;;  %v2177_v10 = vmul.f32 -1.442695, %v1117_v7  ;;  %v1118_v16 = vadd.f32 %v1112_v18, %v867_v19 }
 0x1e7   : > { %2334 = vpow2.f32 %v2175_v26  ;;  %v2176_v23 = vmul.f32 -1.442695, %v1116_v61 }
 0x1e9   : > { %2336 = vpow2.f32 %v2176_v23 }
 0x1ea   : > { %2338 = vpow2.f32 %v2177_v10 }
 0x1f4   : > { %v2335_v17 = vpop.eup %2334 }
 0x1f5   : > { %v1128_v14 = vadd.f32 1.0, %v2335_v17 }
 0x1f6   : > { %v2337_v13 = vpop.eup %2336 }
 0x1f7   : > { %2340 = vrcp.f32 %v1128_v14  ;;  %v1129_v20 = vadd.f32 1.0, %v2337_v13  ;;  %v2339_v15 = vpop.eup %2338 }
 0x1f8   : > { %2342 = vtanh.f32 %v1118_v16  ;;  %v1130_v34 = vadd.f32 1.0, %v2339_v15 }
 0x1f9   : > { %2344 = vrcp.f32 %v1129_v20 }
 0x1fa   : > { %2346 = vrcp.f32 %v1130_v34  ;;  %v1694_v34 = vld [vmem:[%s3631_s6 + $0x1f8] sm:$0xff] }
 0x204   : > { %v2341_v11 = vpop.eup %2340 }
 0x205   : > { %v2343_v2 = vpop.eup %2342 }
 0x206   : > { %v2345_v37 = vpop.eup %2344  ;;  %v1139_v56 = vmul.f32 %v2343_v2, %v2341_v11  ;;  %v1692_v2 = vld [vmem:[%s3631_s6 + $0x1e8] sm:$0xff] }
 0x207   : > { %v1138_v48 = vmul.f32 %v2345_v37, %v904_v25  ;;  %v2347_v19 = vpop.eup %2346  ;;  %v1691_v37 = vld [vmem:[%s3631_s6 + $0x1e0] sm:$0xff] }
 0x209   : > { %v3259_v26 = vadd.f32 %v1139_v56, %v1138_v48  ;;  %v1688_v48 = vld [vmem:[%s3631_s6 + $0x1c8] sm:$0xff]  ;;  %v1693_v56 = vld [vmem:[%s3631_s6 + $0x1f0] sm:$0xff] }
 0x20b   : > { %2348 = vtanh.f32 %v3259_v26 }
 0x218   : > { %v2349_v27 = vpop.eup %2348 }
 0x219   : > { %v3262_v10 = vmul.f32 %v2349_v27, %v2347_v19  ;;  %v1690_v19 = vld [vmem:[%s3631_s6 + $0x1d8] sm:$0xff]  ;;  %v1684_v27 = vld [vmem:[%s3631_s6 + $0x1a8] sm:$0xff] }
 0x21b   : > { %1278 = vmatmul.mubr.f32.vlgmr.msra.gmra.mxu1 %v3262_v10  ;;  %1349 = vmatmul.mubr.f32.vlgmr.msra.gmra.mxu0 %v3262_v10 }
 0x21c   : > { %1455 = vmatpush1.msra.mxu1 %v2784_v28  ;;  %1526 = vmatpush1.msra.mxu0 %v2789_v29  ;;  %v3705_v28 = vld [vmem:[#allocation6_spill] sm:$0xff]  ;;  %v3706_v29 = vld [vmem:[#allocation7_spill] sm:$0xff] }
 0x21d   : > { %1456 = vmatprep.subr.mxu1 %v2794_v30  ;;  %1527 = vmatprep.subr.mxu0 %v2799_v31  ;;  %v3707_v30 = vld [vmem:[#allocation8_spill] sm:$0xff]  ;;  %v3708_v31 = vld [vmem:[#allocation9_spill] sm:$0xff] }
 0x21e   : > { %1457 = vmatpush1.msra.mxu1 %v2804_v32  ;;  %1528 = vmatpush1.msra.mxu0 %v2809_v33  ;;  %v3709_v32 = vld [vmem:[#allocation10_spill] sm:$0xff]  ;;  %v3710_v33 = vld [vmem:[#allocation11_spill] sm:$0xff] }
 0x21f   : > { %1458 = vmatprep.subr.mxu1 %v2819_v35  ;;  %1529 = vmatprep.subr.mxu0 %v2824_v36  ;;  %v3711_v35 = vld [vmem:[#allocation12_spill] sm:$0xff]  ;;  %v3712_v36 = vld [vmem:[#allocation13_spill] sm:$0xff] }
 0x220   : > { %1459 = vmatpush1.msra.mxu1 %v2833_v38  ;;  %1530 = vmatpush1.msra.mxu0 %v2838_v39  ;;  %v3713_v38 = vld [vmem:[#allocation14_spill] sm:$0xff]  ;;  %v3714_v39 = vld [vmem:[#allocation15_spill] sm:$0xff] }
 0x221   : > { %1460 = vmatprep.subr.mxu1 %v2845_v40  ;;  %1531 = vmatprep.subr.mxu0 %v2850_v41  ;;  %v3715_v40 = vld [vmem:[#allocation16_spill] sm:$0xff]  ;;  %v3716_v41 = vld [vmem:[#allocation17_spill] sm:$0xff] }
 0x222   : > { %1461 = vmatpush1.msra.mxu1 %v2855_v42  ;;  %1532 = vmatpush1.msra.mxu0 %v2860_v43  ;;  %v3717_v42 = vld [vmem:[#allocation18_spill] sm:$0xff]  ;;  %v3718_v43 = vld [vmem:[#allocation19_spill] sm:$0xff] }
 0x223   : > { %1462 = vmatprep.subr.mxu1 %v2867_v44  ;;  %1533 = vmatprep.subr.mxu0 %v2872_v45  ;;  %v3719_v44 = vld [vmem:[#allocation20_spill] sm:$0xff]  ;;  %v3720_v45 = vld [vmem:[#allocation21_spill] sm:$0xff] }
 0x224   : > { %1463 = vmatpush1.msra.mxu1 %v2879_v46  ;;  %1534 = vmatpush1.msra.mxu0 %v2884_v47  ;;  %v3721_v46 = vld [vmem:[#allocation22_spill] sm:$0xff]  ;;  %v3722_v47 = vld [vmem:[#allocation23_spill] sm:$0xff] }
 0x225   : > { %1464 = vmatprep.subr.mxu1 %v2891_v49  ;;  %1535 = vmatprep.subr.mxu0 %v2896_v50  ;;  %v3723_v49 = vld [vmem:[#allocation24_spill] sm:$0xff]  ;;  %v3724_v50 = vld [vmem:[#allocation25_spill] sm:$0xff] }
 0x226   : > { %1465 = vmatpush1.msra.mxu1 %v2903_v51  ;;  %1536 = vmatpush1.msra.mxu0 %v2908_v52  ;;  %v3725_v51 = vld [vmem:[#allocation26_spill] sm:$0xff]  ;;  %v3726_v52 = vld [vmem:[#allocation27_spill] sm:$0xff] }
 0x227   : > { %1466 = vmatprep.subr.mxu1 %v2915_v53  ;;  %1537 = vmatprep.subr.mxu0 %v2920_v54  ;;  %v3727_v53 = vld [vmem:[#allocation28_spill] sm:$0xff]  ;;  %v3728_v54 = vmov 0.0  }
 0x228   : > { %1467 = vmatpush1.msra.mxu1 %v2928_v57  ;;  %1538 = vmatpush1.msra.mxu0 %v2933_v58  ;;  %v3729_v57 = vld [vmem:[#allocation29_spill] sm:$0xff] }
 0x229   : > { %1468 = vmatprep.subr.mxu1 %v2940_v59  ;;  %1539 = vmatprep.subr.mxu0 %v2945_v60  ;;  %v3730_v59 = vld [vmem:[#allocation30_spill] sm:$0xff] }
 0x22a   : > { %1469 = vmatpush1.msra.mxu1 %v2954_v62  ;;  %1540 = vmatpush1.msra.mxu0 %v2959_v63 }
 0x22b   : > { %1470 = vmatprep.subr.mxu1 %v2968_v0  ;;  %1541 = vmatprep.subr.mxu0 %v2973_v1  ;;  %v3731_v0 = vld [vmem:[#allocation32_spill] sm:$0xff] }
 0x22c   : > { %1471 = vmatpush1.msra.mxu1 %v2981_v3  ;;  %1542 = vmatpush1.msra.mxu0 %v2986_v4 }
 0x22d   : > { %1472 = vmatprep.subr.mxu1 %v2991_v5  ;;  %1543 = vmatprep.subr.mxu0 %v2996_v6  ;;  %v3732_v5 = vld [vmem:[#allocation31_spill] sm:$0xff] }
 0x22e   : > { %1473 = vmatpush1.msra.mxu1 %v3005_v8  ;;  %1544 = vmatpush1.msra.mxu0 %v3010_v9 }
 0x22f   : > { %1474 = vmatprep.subr.mxu1 %v3705_v28  ;;  %1545 = vmatprep.subr.mxu0 %v3706_v29  ;;  %v1689_v28 = vld [vmem:[%s3631_s6 + $0x1d0] sm:$0xff]  ;;  %v1683_v29 = vld [vmem:[%s3631_s6 + $0x1a0] sm:$0xff] }
 0x230   : > { %1475 = vmatpush1.msra.mxu1 %v3707_v30  ;;  %1546 = vmatpush1.msra.mxu0 %v3708_v31  ;;  %v1686_v30 = vld [vmem:[%s3631_s6 + $0x1b8] sm:$0xff]  ;;  %v1680_v31 = vld [vmem:[%s3631_s6 + $0x188] sm:$0xff] }
 0x231   : > { %1476 = vmatprep.subr.mxu1 %v3709_v32  ;;  %1547 = vmatprep.subr.mxu0 %v3710_v33  ;;  %v1685_v32 = vld [vmem:[%s3631_s6 + $0x1b0] sm:$0xff]  ;;  %v1679_v33 = vld [vmem:[%s3631_s6 + $0x180] sm:$0xff] }
 0x232   : > { %1477 = vmatpush1.msra.mxu1 %v3711_v35  ;;  %1548 = vmatpush1.msra.mxu0 %v3712_v36  ;;  %v1682_v35 = vld [vmem:[%s3631_s6 + $0x198] sm:$0xff]  ;;  %v1676_v36 = vld [vmem:[%s3631_s6 + $0x168] sm:$0xff] }
 0x233   : > { %1478 = vmatprep.subr.mxu1 %v3713_v38  ;;  %1549 = vmatprep.subr.mxu0 %v3714_v39  ;;  %v1681_v38 = vld [vmem:[%s3631_s6 + $0x190] sm:$0xff]  ;;  %v1675_v39 = vld [vmem:[%s3631_s6 + $0x160] sm:$0xff] }
 0x234   : > { %1479 = vmatpush1.msra.mxu1 %v3715_v40  ;;  %1550 = vmatpush1.msra.mxu0 %v3716_v41  ;;  %v1678_v40 = vld [vmem:[%s3631_s6 + $0x178] sm:$0xff]  ;;  %v1672_v41 = vld [vmem:[%s3631_s6 + $0x148] sm:$0xff] }
 0x235   : > { %1480 = vmatprep.subr.mxu1 %v3717_v42  ;;  %1551 = vmatprep.subr.mxu0 %v3718_v43  ;;  %v1677_v42 = vld [vmem:[%s3631_s6 + $0x170] sm:$0xff]  ;;  %v1671_v43 = vld [vmem:[%s3631_s6 + $0x140] sm:$0xff] }
 0x236   : > { %1481 = vmatpush1.msra.mxu1 %v3719_v44  ;;  %1552 = vmatpush1.msra.mxu0 %v3720_v45  ;;  %v1674_v44 = vld [vmem:[%s3631_s6 + $0x158] sm:$0xff]  ;;  %v1668_v45 = vld [vmem:[%s3631_s6 + $0x128] sm:$0xff] }
 0x237   : > { %1482 = vmatprep.subr.mxu1 %v3721_v46  ;;  %1553 = vmatprep.subr.mxu0 %v3722_v47  ;;  %v1673_v46 = vld [vmem:[%s3631_s6 + $0x150] sm:$0xff]  ;;  %v1667_v47 = vld [vmem:[%s3631_s6 + $0x120] sm:$0xff] }
 0x238   : > { %1483 = vmatpush1.msra.mxu1 %v3723_v49  ;;  %1554 = vmatpush1.msra.mxu0 %v3724_v50  ;;  %v1670_v49 = vld [vmem:[%s3631_s6 + $0x138] sm:$0xff]  ;;  %v1664_v50 = vld [vmem:[%s3631_s6 + $0x108] sm:$0xff] }
 0x239   : > { %1484 = vmatprep.subr.mxu1 %v3725_v51  ;;  %1555 = vmatprep.subr.mxu0 %v3726_v52  ;;  %v1669_v51 = vld [vmem:[%s3631_s6 + $0x130] sm:$0xff]  ;;  %v1663_v52 = vld [vmem:[%s3631_s6 + $0x100] sm:$0xff] }
 0x23a   : > { %1485 = vmatpush1.msra.mxu1 %v3727_v53  ;;  %1518 = vmatprep.mubr.f32.mxu1 %v3728_v54  ;;  %v1666_v53 = vld [vmem:[%s3631_s6 + $0x118] sm:$0xff] }
 0x23b   : > { %1556 = vmatpush1.msra.mxu0 %v3729_v57  ;;  %1589 = vmatprep.mubr.f32.mxu0 %v3728_v54  ;;  %v1665_v57 = vld [vmem:[%s3631_s6 + $0x110] sm:$0xff] }
 0x23c   : > { %1695 = vmatprep.subr.mxu1 %v1692_v2  ;;  %1766 = vmatprep.subr.mxu0 %v1694_v34  ;;  %v1631_v2 = vld [vmem:[%s3631_s6] sm:$0xff]  ;;  %v1633_v34 = vld [vmem:[%s3631_s6 + $0x10] sm:$0xff] }
 0x2db   : > { %v1279_v58 = vpop.f32.mrf.mxu1  ;;  %v1350_v4 = vpop.f32.mrf.mxu0 }
 0x2dc   : > { %v1355_v60 = vadd.f32 %v1279_v58, %v3730_v59  ;;  %v1357_v6 = vadd.f32 %v1350_v4, %v3732_v5  ;;  %v1659_v58 = vld [vmem:[%s3631_s6 + $0xe0] sm:$0xff]  ;;  %v1662_v59 = vld [vmem:[%s3631_s6 + $0xf8] sm:$0xff] }
 0x2dd   : > { %v1281_v62 = vpop.f32.mrf.mxu1  ;;  %v1352_v8 = vpop.f32.mrf.mxu0  ;;  %v1651_v4 = vld [vmem:[%s3631_s6 + $0xa0] sm:$0xff]  ;;  %v1654_v5 = vld [vmem:[%s3631_s6 + $0xb8] sm:$0xff] }
 0x2de   : > { %v2178_v63 = vmul.f32 -1.442695, %v1355_v60  ;;  %v1356_v1 = vadd.f32 %v1281_v62, %v3731_v0  ;;  %v2180_v9 = vmul.f32 -1.442695, %v1357_v6  ;;  %v1358_v16 = vadd.f32 %v1352_v8, %v3733_v22  ;;  %v1656_v60 = vld [vmem:[%s3631_s6 + $0xc8] sm:$0xff]  ;;  %v1661_v62 = vld [vmem:[%s3631_s6 + $0xf0] sm:$0xff] }
 0x2df   : > { %v1658_v0 = vld [vmem:[%s3631_s6 + $0xd8] sm:$0xff]  ;;  %v1648_v6 = vld [vmem:[%s3631_s6 + $0x88] sm:$0xff]  ;;  %v1653_v8 = vld [vmem:[%s3631_s6 + $0xb0] sm:$0xff] }
 0x2e0   : > { %2350 = vpow2.f32 %v2178_v63  ;;  %v2179_v3 = vmul.f32 -1.442695, %v1356_v1  ;;  %v1655_v63 = vld [vmem:[%s3631_s6 + $0xc0] sm:$0xff]  ;;  %v1652_v1 = vld [vmem:[%s3631_s6 + $0xa8] sm:$0xff]  ;;  %v1650_v22 = vld [vmem:[%s3631_s6 + $0x98] sm:$0xff] }
 0x2e2   : > { %2352 = vpow2.f32 %v2179_v3  ;;  %v1657_v3 = vld [vmem:[%s3631_s6 + $0xd0] sm:$0xff] }
 0x2e3   : > { %2354 = vpow2.f32 %v2180_v9  ;;  %v1647_v9 = vld [vmem:[%s3631_s6 + $0x80] sm:$0xff] }
 0x2e4   : > { %2356 = vtanh.f32 %v1358_v16  ;;  %v1644_v16 = vld [vmem:[%s3631_s6 + $0x68] sm:$0xff] }
 0x2ed   : > { %v2351_v23 = vpop.eup %2350 }
 0x2ee   : > { %v1368_v21 = vadd.f32 1.0, %v2351_v23  ;;  %v1649_v23 = vld [vmem:[%s3631_s6 + $0x90] sm:$0xff] }
 0x2ef   : > { %v2353_v18 = vpop.eup %2352 }
 0x2f0   : > { %2358 = vrcp.f32 %v1368_v21  ;;  %v1369_v13 = vadd.f32 1.0, %v2353_v18  ;;  %v2355_v12 = vpop.eup %2354  ;;  %v1643_v21 = vld [vmem:[%s3631_s6 + $0x60] sm:$0xff]  ;;  %v1646_v18 = vld [vmem:[%s3631_s6 + $0x78] sm:$0xff] }
 0x2f1   : > { %v2357_v55 = vpop.eup %2356  ;;  %v1370_v17 = vadd.f32 1.0, %v2355_v12  ;;  %v1645_v12 = vld [vmem:[%s3631_s6 + $0x70] sm:$0xff] }
 0x2f2   : > { %2360 = vrcp.f32 %v1369_v13  ;;  %v1640_v13 = vld [vmem:[%s3631_s6 + $0x48] sm:$0xff] }
 0x2f3   : > { %2362 = vrcp.f32 %v1370_v17  ;;  %v1635_v17 = vld [vmem:[%s3631_s6 + $0x20] sm:$0xff] }
 0x2fd   : > { %v2359_v61 = vpop.eup %2358 }
 0x2fe   : > { %v1379_v24 = vmul.f32 %v2359_v61, %v2357_v55  ;;  %v1639_v55 = vld [vmem:[%s3631_s6 + $0x40] sm:$0xff]  ;;  %v1642_v61 = vld [vmem:[%s3631_s6 + $0x58] sm:$0xff] }
 0x2ff   : > { %v2361_v7 = vpop.eup %2360 }
 0x300   : > { %v1378_v14 = vmul.f32 %v2361_v7, %v3259_v26  ;;  %v2363_v15 = vpop.eup %2362  ;;  %v1687_v26 = vld [vmem:[%s3631_s6 + $0x1c0] sm:$0xff]  ;;  %v1641_v7 = vld [vmem:[%s3631_s6 + $0x50] sm:$0xff] }
 0x302   : > { %v3335_v20 = vadd.f32 %v1379_v24, %v1378_v14  ;;  %v1636_v24 = vld [vmem:[%s3631_s6 + $0x28] sm:$0xff]  ;;  %v1638_v14 = vld [vmem:[%s3631_s6 + $0x38] sm:$0xff] }
 0x304   : > { %2364 = vtanh.f32 %v3335_v20 }
 0x311   : > { %v2365_v11 = vpop.eup %2364 }
 0x312   : > { %v3338_v25 = vmul.f32 %v2365_v11, %v2363_v15  ;;  %v1632_v15 = vld [vmem:[%s3631_s6 + $0x8] sm:$0xff]  ;;  %v1637_v11 = vld [vmem:[%s3631_s6 + $0x30] sm:$0xff] }
 0x314   : > { %1519 = vmatmul.mubr.f32.vlgmr.msra.gmra.mxu1 %v3338_v25  ;;  %1590 = vmatmul.mubr.f32.vlgmr.msra.gmra.mxu0 %v3338_v25 }
 0x315   : > { %1759 = vmatprep.mubr.f32.mxu1 %v3728_v54  ;;  %1830 = vmatprep.mubr.f32.mxu0 %v3728_v54  ;;  %v1660_v54 = vld [vmem:[%s3631_s6 + $0xe8] sm:$0xff] }
 0x316   : > { %1696 = vmatpush1.msra.mxu1 %v1691_v37  ;;  %1767 = vmatpush1.msra.mxu0 %v1693_v56  ;;  %v1634_v37 = vld [vmem:[%s3631_s6 + $0x18] sm:$0xff] }
 0x317   : > { %1697 = vmatprep.subr.mxu1 %v1688_v48  ;;  %1768 = vmatprep.subr.mxu0 %v1690_v19  ;;  %v1892_v48 = vld [vmem:[%s3632_s7 + $0x78] sm:$0xff] }
 0x318   : > { %1698 = vmatpush1.msra.mxu1 %v1687_v26  ;;  %1769 = vmatpush1.msra.mxu0 %v1689_v28  ;;  %v3734_v26 = vld [vmem:[#allocation34_spill] sm:$0xff] }
 0x319   : > { %1699 = vmatprep.subr.mxu1 %v1684_v27  ;;  %1770 = vmatprep.subr.mxu0 %v1686_v30 }
 0x31a   : > { %1700 = vmatpush1.msra.mxu1 %v1683_v29  ;;  %1771 = vmatpush1.msra.mxu0 %v1685_v32  ;;  %v3735_v29 = vld [vmem:[#allocation36_spill] sm:$0xff] }
 0x31b   : > { %1701 = vmatprep.subr.mxu1 %v1680_v31  ;;  %1772 = vmatprep.subr.mxu0 %v1682_v35 }
 0x31c   : > { %1702 = vmatpush1.msra.mxu1 %v1679_v33  ;;  %1773 = vmatpush1.msra.mxu0 %v1681_v38  ;;  %v3736_v33 = vld [vmem:[#allocation35_spill] sm:$0xff] }
 0x31d   : > { %1703 = vmatprep.subr.mxu1 %v1676_v36  ;;  %1774 = vmatprep.subr.mxu0 %v1678_v40 }
 0x31e   : > { %1704 = vmatpush1.msra.mxu1 %v1675_v39  ;;  %1775 = vmatpush1.msra.mxu0 %v1677_v42  ;;  %v3737_v39 = vld [vmem:[#allocation37_spill] sm:$0xff] }
 0x31f   : > { %1705 = vmatprep.subr.mxu1 %v1672_v41  ;;  %1776 = vmatprep.subr.mxu0 %v1674_v44 }
 0x320   : > { %1706 = vmatpush1.msra.mxu1 %v1671_v43  ;;  %1777 = vmatpush1.msra.mxu0 %v1673_v46 }
 0x321   : > { %1707 = vmatprep.subr.mxu1 %v1668_v45  ;;  %1778 = vmatprep.subr.mxu0 %v1670_v49 }
 0x322   : > { %1708 = vmatpush1.msra.mxu1 %v1667_v47  ;;  %1779 = vmatpush1.msra.mxu0 %v1669_v51 }
 0x323   : > { %1709 = vmatprep.subr.mxu1 %v1664_v50  ;;  %1780 = vmatprep.subr.mxu0 %v1666_v53 }
 0x324   : > { %1710 = vmatpush1.msra.mxu1 %v1663_v52  ;;  %1781 = vmatpush1.msra.mxu0 %v1665_v57 }
 0x325   : > { %1711 = vmatprep.subr.mxu1 %v1660_v54  ;;  %1782 = vmatprep.subr.mxu0 %v1662_v59  ;;  %v1891_v59 = vld [vmem:[%s3632_s7 + $0x70] sm:$0xff] }
 0x326   : > { %1712 = vmatpush1.msra.mxu1 %v1659_v58  ;;  %1783 = vmatpush1.msra.mxu0 %v1661_v62  ;;  %v1888_v62 = vld [vmem:[%s3632_s7 + $0x58] sm:$0xff] }
 0x327   : > { %1713 = vmatprep.subr.mxu1 %v1656_v60  ;;  %1784 = vmatprep.subr.mxu0 %v1658_v0  ;;  %v1889_v60 = vld [vmem:[%s3632_s7 + $0x60] sm:$0xff] }
 0x328   : > { %1714 = vmatpush1.msra.mxu1 %v1655_v63  ;;  %1785 = vmatpush1.msra.mxu0 %v1657_v3  ;;  %v1886_v63 = vld [vmem:[%s3632_s7 + $0x48] sm:$0xff]  ;;  %v1885_v0 = vld [vmem:[%s3632_s7 + $0x40] sm:$0xff]  ;;  %v1883_v3 = vld [vmem:[%s3632_s7 + $0x30] sm:$0xff] }
 0x329   : > { %1715 = vmatprep.subr.mxu1 %v1652_v1  ;;  %1786 = vmatprep.subr.mxu0 %v1654_v5  ;;  %v1884_v1 = vld [vmem:[%s3632_s7 + $0x38] sm:$0xff]  ;;  %v1881_v5 = vld [vmem:[%s3632_s7 + $0x20] sm:$0xff] }
 0x32a   : > { %1716 = vmatpush1.msra.mxu1 %v1651_v4  ;;  %1787 = vmatpush1.msra.mxu0 %v1653_v8  ;;  %v1882_v4 = vld [vmem:[%s3632_s7 + $0x28] sm:$0xff]  ;;  %v1879_v8 = vld [vmem:[%s3632_s7 + $0x10] sm:$0xff] }
 0x32b   : > { %1717 = vmatprep.subr.mxu1 %v1648_v6  ;;  %1788 = vmatprep.subr.mxu0 %v1650_v22  ;;  %v1880_v6 = vld [vmem:[%s3632_s7 + $0x18] sm:$0xff]  ;;  %v1877_v22 = vld [vmem:[%s3632_s7] sm:$0xff] }
 0x32c   : > { %1718 = vmatpush1.msra.mxu1 %v1647_v9  ;;  %1789 = vmatpush1.msra.mxu0 %v1649_v23  ;;  %v1878_v9 = vld [vmem:[%s3632_s7 + $0x8] sm:$0xff]  ;;  %v3738_v23 = vld [vmem:[#allocation38_spill] sm:$0xff] }
 0x32d   : > { %1719 = vmatprep.subr.mxu1 %v1644_v16  ;;  %1790 = vmatprep.subr.mxu0 %v1646_v18 }
 0x32e   : > { %1720 = vmatpush1.msra.mxu1 %v1643_v21  ;;  %1791 = vmatpush1.msra.mxu0 %v1645_v12  ;;  %v3739_v12 = vld [vmem:[#allocation40_spill] sm:$0xff] }
 0x32f   : > { %1721 = vmatprep.subr.mxu1 %v1640_v13  ;;  %1792 = vmatprep.subr.mxu0 %v1642_v61 }
 0x330   : > { %1722 = vmatpush1.msra.mxu1 %v1639_v55  ;;  %1793 = vmatpush1.msra.mxu0 %v1641_v7  ;;  %v3740_v7 = vld [vmem:[#allocation39_spill] sm:$0xff] }
 0x331   : > { %1723 = vmatprep.subr.mxu1 %v1636_v24  ;;  %1794 = vmatprep.subr.mxu0 %v1638_v14 }
 0x332   : > { %1724 = vmatpush1.msra.mxu1 %v1635_v17  ;;  %1795 = vmatpush1.msra.mxu0 %v1637_v11  ;;  %v3741_v11 = vld [vmem:[#allocation41_spill] sm:$0xff] }
 0x333   : > { %1725 = vmatprep.subr.mxu1 %v1632_v15  ;;  %1796 = vmatprep.subr.mxu0 %v1634_v37 }
 0x334   : > { %1726 = vmatpush1.msra.mxu1 %v1631_v2  ;;  %1797 = vmatpush1.msra.mxu0 %v1633_v34 }
 0x335   : > { %2270 = vmatprep.subr.mxu1 %v1892_v48 }
 0x3d4   : > { %v1520_v56 = vpop.f32.mrf.mxu1  ;;  %v1591_v32 = vpop.f32.mrf.mxu0 }
 0x3d5   : > { %v1596_v19 = vadd.f32 %v1520_v56, %v3734_v26  ;;  %v1598_v35 = vadd.f32 %v1591_v32, %v3736_v33  ;;  %v2187_v56 = vld [vmem:[%s3633_s8] ss:$0 sm:$0xff]  ;;  %v1986_v33 = vld [vmem:[%s2515_s12 + $0x8] sm:$0xff] }
 0x3d6   : > { %v1522_v27 = vpop.f32.mrf.mxu1  ;;  %v1593_v36 = vpop.f32.mrf.mxu0 }
 0x3d7   : > { %v2181_v28 = vmul.f32 -1.442695, %v1596_v19  ;;  %v1597_v30 = vadd.f32 %v1522_v27, %v3735_v29  ;;  %v2183_v38 = vmul.f32 -1.442695, %v1598_v35  ;;  %v1599_v40 = vadd.f32 %v1593_v36, %v3737_v39  ;;  %v1988_v39 = vld [vmem:[%s2515_s12 + $0x18] sm:$0xff] }
 0x3d9   : > { %2366 = vpow2.f32 %v2181_v28  ;;  %v2182_v31 = vmul.f32 -1.442695, %v1597_v30 }
 0x3db   : > { %2368 = vpow2.f32 %v2182_v31  ;;  %v1985_v31 = vld [vmem:[%s2515_s12] sm:$0xff] }
 0x3dc   : > { %2370 = vpow2.f32 %v2183_v38 }
 0x3dd   : > { %2372 = vtanh.f32 %v1599_v40  ;;  %v1987_v40 = vld [vmem:[%s2515_s12 + $0x10] sm:$0xff] }
 0x3e6   : > { %v2367_v41 = vpop.eup %2366 }
 0x3e7   : > { %v1609_v42 = vadd.f32 1.0, %v2367_v41 }
 0x3e8   : > { %v2369_v43 = vpop.eup %2368 }
 0x3e9   : > { %2374 = vrcp.f32 %v1609_v42  ;;  %v1610_v44 = vadd.f32 1.0, %v2369_v43  ;;  %v2371_v45 = vpop.eup %2370 }
 0x3ea   : > { %v2373_v46 = vpop.eup %2372  ;;  %v1611_v51 = vadd.f32 1.0, %v2371_v45 }
 0x3eb   : > { %2376 = vrcp.f32 %v1610_v44 }
 0x3ec   : > { %2378 = vrcp.f32 %v1611_v51 }
 0x3f6   : > { %v2375_v47 = vpop.eup %2374 }
 0x3f7   : > { %v1620_v49 = vmul.f32 %v2375_v47, %v2373_v46 }
 0x3f8   : > { %v2377_v50 = vpop.eup %2376 }
 0x3f9   : > { %v1619_v52 = vmul.f32 %v2377_v50, %v3335_v20  ;;  %v2379_v54 = vpop.eup %2378  ;;  %v1890_v20 = vld [vmem:[%s3632_s7 + $0x68] sm:$0xff] }
 0x3fb   : > { %v3544_v53 = vadd.f32 %v1620_v49, %v1619_v52 }
 0x3fd   : > { %2380 = vtanh.f32 %v3544_v53 }
 0x40a   : > { %v2381_v57 = vpop.eup %2380 }
 0x40b   : > { %v1623_v58 = vmul.f32 %v2381_v57, %v2379_v54 }
 0x40d   : > { %1760 = vmatmul.mubr.f32.vlgmr.msra.gmra.mxu1 %v1623_v58  ;;  %1831 = vmatmul.mubr.f32.vlgmr.msra.gmra.mxu0 %v1623_v58 }
 0x40e   : > { %2271 = vmatpush3.msra.mxu1 %v1892_v48  ;;  %2302 = vmatprep.mubr.f32.mxu1 %v3262_v10  ;;  %v1887_v10 = vld [vmem:[%s3632_s7 + $0x50] sm:$0xff] }
 0x40f   : > { %2272 = vmatprep.subr.mxu1 %v1891_v59 }
 0x410   : > { %2273 = vmatpush3.msra.mxu1 %v1891_v59 }
 0x411   : > { %2274 = vmatprep.subr.mxu1 %v1890_v20 }
 0x412   : > { %2275 = vmatpush3.msra.mxu1 %v1890_v20 }
 0x413   : > { %2276 = vmatprep.subr.mxu1 %v1889_v60 }
 0x414   : > { %2277 = vmatpush3.msra.mxu1 %v1889_v60 }
 0x415   : > { %2278 = vmatprep.subr.mxu1 %v1888_v62 }
 0x416   : > { %2279 = vmatpush3.msra.mxu1 %v1888_v62 }
 0x417   : > { %2280 = vmatprep.subr.mxu1 %v1887_v10 }
 0x418   : > { %2281 = vmatpush3.msra.mxu1 %v1887_v10 }
 0x419   : > { %2282 = vmatprep.subr.mxu1 %v1886_v63 }
 0x41a   : > { %2283 = vmatpush3.msra.mxu1 %v1886_v63 }
 0x41b   : > { %2284 = vmatprep.subr.mxu1 %v1885_v0 }
 0x41c   : > { %2285 = vmatpush3.msra.mxu1 %v1885_v0 }
 0x41d   : > { %2286 = vmatprep.subr.mxu1 %v1884_v1 }
 0x41e   : > { %2287 = vmatpush3.msra.mxu1 %v1884_v1 }
 0x41f   : > { %2288 = vmatprep.subr.mxu1 %v1883_v3 }
 0x420   : > { %2289 = vmatpush3.msra.mxu1 %v1883_v3 }
 0x421   : > { %2290 = vmatprep.subr.mxu1 %v1882_v4 }
 0x422   : > { %2291 = vmatpush3.msra.mxu1 %v1882_v4 }
 0x423   : > { %2292 = vmatprep.subr.mxu1 %v1881_v5 }
 0x424   : > { %2293 = vmatpush3.msra.mxu1 %v1881_v5 }
 0x425   : > { %2294 = vmatprep.subr.mxu1 %v1880_v6 }
 0x426   : > { %2295 = vmatpush3.msra.mxu1 %v1880_v6 }
 0x427   : > { %2296 = vmatprep.subr.mxu1 %v1879_v8 }
 0x428   : > { %2297 = vmatpush3.msra.mxu1 %v1879_v8 }
 0x429   : > { %2298 = vmatprep.subr.mxu1 %v1878_v9 }
 0x42a   : > { %2299 = vmatpush3.msra.mxu1 %v1878_v9 }
 0x42b   : > { %2300 = vmatprep.subr.mxu1 %v1877_v22 }
 0x42c   : > { %2301 = vmatpush3.msra.mxu1 %v1877_v22 }
 0x42d   : > { %2303 = vmatmul.mubr.f32.vlgmr.msra.gmra.mxu1 %v3338_v25 }
 0x42e   : > { %2305 = vmatprep.mubr.f32.mxu1 %v1623_v58 }
 0x4cd   : > { %v1761_v16 = vpop.f32.mrf.mxu1  ;;  %v1832_v24 = vpop.f32.mrf.mxu0 }
 0x4ce   : > { %v1837_v21 = vadd.f32 %v1761_v16, %v3738_v23  ;;  %v1839_v17 = vadd.f32 %v1832_v24, %v3740_v7 }
 0x4cf   : > { %v1763_v18 = vpop.f32.mrf.mxu1  ;;  %v1834_v14 = vpop.f32.mrf.mxu0 }
 0x4d0   : > { %v2184_v13 = vmul.f32 -1.442695, %v1837_v21  ;;  %v1838_v55 = vadd.f32 %v1763_v18, %v3739_v12  ;;  %v2186_v15 = vmul.f32 -1.442695, %v1839_v17  ;;  %v1840_v2 = vadd.f32 %v1834_v14, %v3741_v11 }
 0x4d2   : > { %2382 = vpow2.f32 %v2184_v13  ;;  %v2185_v61 = vmul.f32 -1.442695, %v1838_v55 }
 0x4d4   : > { %2384 = vpow2.f32 %v2185_v61 }
 0x4d5   : > { %2386 = vpow2.f32 %v2186_v15 }
 0x4d6   : > { %2388 = vtanh.f32 %v1840_v2 }
 0x4df   : > { %v2383_v25 = vpop.eup %2382 }
 0x4e0   : > { %v1850_v37 = vadd.f32 1.0, %v2383_v25 }
 0x4e1   : > { %v2385_v34 = vpop.eup %2384 }
 0x4e2   : > { %2390 = vrcp.f32 %v1850_v37  ;;  %v1851_v48 = vadd.f32 1.0, %v2385_v34  ;;  %v2387_v26 = vpop.eup %2386 }
 0x4e3   : > { %v2389_v27 = vpop.eup %2388  ;;  %v1852_v38 = vadd.f32 1.0, %v2387_v26 }
 0x4e4   : > { %2392 = vrcp.f32 %v1851_v48 }
 0x4e5   : > { %2394 = vrcp.f32 %v1852_v38 }
 0x4ed   : > { %v2304_v19 = vpop.f32.mrf.mxu1 }
 0x4ee   : > { %v1972_v29 = vadd.f32 %v2304_v19, %v2187_v56 }
 0x4ef   : > { %v2391_v28 = vpop.eup %2390  ;;  %v1966_v30 = vpop.f32.mrf.mxu1 }
 0x4f0   : > { %v1861_v32 = vmul.f32 %v2391_v28, %v2389_v27  ;;  %v1967_v35 = vadd.f32 %v2187_v56, %v1966_v30  ;;  %v1990_v43 = vadd.f32 %v1986_v33, %v1972_v29 }
 0x4f1   : > { %v2393_v36 = vpop.eup %2392 }
 0x4f2   : > { %v1860_v41 = vmul.f32 %v2393_v36, %v3544_v53  ;;  %v1989_v42 = vadd.f32 %v1985_v31, %v1967_v35  ;;  %1994 = vst [vmem:[%s2520_s15 + $0x8] sm:$0xff] %v1990_v43  ;;  %v2395_v45 = vpop.eup %2394 }
 0x4f4   : > { %v1862_v44 = vadd.f32 %v1861_v32, %v1860_v41  ;;  %1993 = vst [vmem:[%s2520_s15] sm:$0xff] %v1989_v42 }
 0x4f6   : > { %1868 = vst [vmem:[#allocation5] sm:$0xff] %v1862_v44  ;;  %1872 = vst [vmem:[%s3636_s11] sm:$0xff] %v1862_v44  ;;  %2396 = vtanh.f32 %v1862_v44 }
 0x503   : > { %v2397_v46 = vpop.eup %2396 }
 0x504   : > { %v1864_v47 = vmul.f32 %v2397_v46, %v2395_v45 }
 0x506   : > { %1867 = vst [vmem:[#allocation4] sm:$0xff] %v1864_v47  ;;  %1870 = vst [vmem:[%s3635_s10] sm:$0xff] %v1864_v47  ;;  %2306 = vmatmul.mubr.f32.gmra.mxu1 %v1864_v47 }
 0x5c6   : > { %v2307_v49 = vpop.f32.mrf.mxu1 }
 0x5c7   : > { %v1982_v50 = vadd.f32 %v2307_v49, %v2187_v56 }
 0x5c8   : > { %v1976_v51 = vpop.f32.mrf.mxu1 }
 0x5c9   : > { %v1977_v52 = vadd.f32 %v2187_v56, %v1976_v51  ;;  %v1992_v54 = vadd.f32 %v1988_v39, %v1982_v50 }
 0x5cb   : > { %v1991_v53 = vadd.f32 %v1987_v40, %v1977_v52  ;;  %1996 = vst [vmem:[%s2520_s15 + $0x18] sm:$0xff] %v1992_v54 }
 0x5cd   : > { %1995 = vst [vmem:[%s2520_s15 + $0x10] sm:$0xff] %v1991_v53 }
 0x5ce PF: > { %s22_s19 = sadd.s32 1, %s2420_s19   ;;  %s3742_s17 = smov %s2416_s18 }
 0x5cf   : > { %p19_p6 = scmp.ge.s32.totalorder %s22_s19, 4   ;;  %s3743_s18 = smov %s3745_s20 }
 0x5d1   :  { %21 = sbr.rel (!%p19_p6) target bundleno = 2 (0x2), region = 126 }

</bundles_post_ra>
